<compile_context>
chip_gen: v5e
topology: v5e:2x2
jax: 0.10.0
libtpu: 0.0.40
codegen_flags: <defaults>
</compile_context>

<pallas_src>
import jax
import jax.numpy as jnp
from jax.experimental import pallas as pl
from jax.experimental.pallas import tpu as pltpu

# (in_features, out_features) for fc1..fc6 (fc5 = 512 -> 32*32, fc6 = 1024 -> 32*32*3)
LAYER_DIMS = [(10, 64), (64, 128), (128, 256), (256, 512), (512, 1024), (1024, 32 * 32 * 3)]
OUT_FEAT = LAYER_DIMS[-1][1]   # 3072
IN_FEAT = LAYER_DIMS[0][0]     # 10
IN_PAD = 16                    # fc1 input padded 10 -> 16 (sublane-friendly, zero cols)

# Packed layout for the small resident weights w1..w4: one (464, 512) bf16 buffer.
# Row offsets are multiples of 8; each layer occupies [off : off+fin_pad, :fout].
_W14_ROW_OFF = (0, 16, 80, 208)   # w1 (16 rows incl. zero pad), w2 (64), w3 (128), w4 (256)
_W14_ROWS = 464
_W14_COLS = 512
_B_PACK_ROWS = 8                  # b1..b5 packed into one (8, 1024) f32 buffer (row per layer)


def decoder_kernel(x_ref, w14_ref, b15_ref, w5_ref, w6_ref, b6_ref, out_ref):
    """One fc6 output-column tile.

    Layers 1-5 are tiny (weights resident in VMEM) and recomputed per tile; fc6's
    dominant weight w6 (~6 MB bf16) is streamed / double-buffered in column tiles.
    Weights are bf16, matmuls accumulate in f32, bias add / ReLU in f32.
    """
    # TODO(synk): training-mode stochastic dropout (pltpu.prng_*) not implemented;
    # eval-mode Dropout(0.2) is an identity so the forward pass is exact.

    def linear_relu(h, w, b):
        y = jnp.dot(h.astype(jnp.bfloat16), w,
                    preferred_element_type=jnp.float32) + b
        return jnp.maximum(y, 0.0)

    h = x_ref[...]                                                    # (B, 16) f32
    h = linear_relu(h, w14_ref[0:16, 0:64],    b15_ref[0:1, 0:64])    # fc1 -> (B, 64)
    h = linear_relu(h, w14_ref[16:80, 0:128],  b15_ref[1:2, 0:128])   # fc2 -> (B, 128)
    h = linear_relu(h, w14_ref[80:208, 0:256], b15_ref[2:3, 0:256])   # fc3 -> (B, 256)
    h = linear_relu(h, w14_ref[208:464, :],    b15_ref[3:4, 0:512])   # fc4 -> (B, 512)
    h = linear_relu(h, w5_ref[...],            b15_ref[4:5, :])       # fc5 -> (B, 1024)
    # fc6 (no activation): only the current TN-wide column slice of w6 / b6 / out.
    out_ref[...] = jnp.dot(h.astype(jnp.bfloat16), w6_ref[...],
                           preferred_element_type=jnp.float32) + b6_ref[...]


def make_params(key):
    """Deterministic synthetic fp32 parameters (torch nn.Linear-style init ranges).

    Returns (weights, biases): weights[i] is (in, out) f32, biases[i] is (1, out) f32.
    """
    weights, biases = [], []
    keys = jax.random.split(key, 2 * len(LAYER_DIMS))
    for i, (fin, fout) in enumerate(LAYER_DIMS):
        bound = 1.0 / float(fin) ** 0.5
        weights.append(jax.random.uniform(keys[2 * i], (fin, fout), jnp.float32, -bound, bound))
        biases.append(jax.random.uniform(keys[2 * i + 1], (1, fout), jnp.float32, -bound, bound))
    return weights, biases


def _pack_params(weights, biases):
    """Coalesce the small per-layer tensors so the (fully exposed) kernel prologue
    issues a few large DMAs instead of ~11 tiny ones.

      w14 : (464, 512)  bf16  -- w1..w4, 8-aligned row offsets, zero padded (~127 KB waste)
      b15 : (8, 1024)   f32   -- b1..b5, one bias per row, zero padded
      w5  : (512, 1024) bf16  -- kept separate (already one dense DMA)
      w6  : (1024,3072) bf16  -- streamed in column tiles by the grid
      b6  : (1, 3072)   f32
    """
    w14 = jnp.zeros((_W14_ROWS, _W14_COLS), jnp.float32)
    for i, off in enumerate(_W14_ROW_OFF):
        fin, fout = LAYER_DIMS[i]
        w14 = w14.at[off:off + fin, :fout].set(weights[i])
    b15 = jnp.zeros((_B_PACK_ROWS, 1024), jnp.float32)
    for i in range(5):
        b15 = b15.at[i, :LAYER_DIMS[i][1]].set(biases[i][0])
    return (w14.astype(jnp.bfloat16), b15,
            weights[4].astype(jnp.bfloat16),
            weights[5].astype(jnp.bfloat16), biases[5])


def _pick_tile_n():
    """fc6 output-column tile width (chip-aware).

    v7x has 2 TensorCores and the column axis is "parallel": an even tile count
    (TN=768 -> grid=(4,)) load-balances the dominant w6 stream 2:2 per core.
    Single-TC v5e/v6e: fewer, larger tiles (TN=1536 -> grid=(2,)) minimize
    grid-step overhead and layer-1..5 recompute.  Unknown chips fall back to 768
    (correct everywhere).
    """
    try:
        kind = jax.devices()[0].device_kind.lower()
    except Exception:
        kind = ""
    single_tc = any(t in kind for t in ("v5e", "v5 lite", "v5lite", "v6e", "v6 lite", "v6lite"))
    return 1536 if single_tc else 768


def decoder_forward(x, weights, biases, tile_n=None):
    """x: (B, 10) float32 -> (B, 3, 32, 32) float32 (torch Decoder.forward, eval mode)."""
    B = x.shape[0]
    B_pad = max(8, ((B + 7) // 8) * 8)   # sublane-friendly batch
    # TODO(synk): add a second "parallel" batch grid axis (128/256-row tiles) if B ever
    # grows beyond ~128; at that point the kernel flips from DMA-bound to MXU-bound.
    xin = jnp.zeros((B_pad, IN_PAD), jnp.float32).at[:B, :IN_FEAT].set(x)

    w14, b15, w5, w6, b6 = _pack_params(weights, biases)

    tn = tile_n if tile_n is not None else _pick_tile_n()
    assert OUT_FEAT % tn == 0 and tn % 128 == 0, tn
    grid = (OUT_FEAT // tn,)

    def resident(shape):
        # Constant index_map => block stays resident across the fc6-column grid axis.
        return pl.BlockSpec(shape, lambda j: (0, 0))

    in_specs = [
        resident((B_pad, IN_PAD)),                    # x            (resident)
        resident((_W14_ROWS, _W14_COLS)),             # w1..w4 pack  (resident)
        resident((_B_PACK_ROWS, 1024)),               # b1..b5 pack  (resident)
        resident((512, 1024)),                        # w5           (resident)
        pl.BlockSpec((1024, tn), lambda j: (0, j)),   # w6: streamed column tiles
        pl.BlockSpec((1, tn), lambda j: (0, j)),      # b6: streamed column tiles
    ]
    out_spec = pl.BlockSpec((B_pad, tn), lambda j: (0, j))

    # Right-size scoped VMEM: resident blocks + double-buffered streamed tiles + slack.
    resident_bytes = xin.nbytes + w14.nbytes + b15.nbytes + w5.nbytes
    streamed_bytes = 2 * (1024 * tn * 2 + tn * 4 + B_pad * tn * 4)
    vmem_limit = int(2 * resident_bytes + streamed_bytes + (4 << 20))

    flops = 2 * B_pad * sum(fi * fo for fi, fo in LAYER_DIMS)
    bytes_accessed = (xin.nbytes + w14.nbytes + b15.nbytes + w5.nbytes
                      + w6.nbytes + b6.nbytes + B_pad * OUT_FEAT * 4)

    flat = pl.pallas_call(
        decoder_kernel,
        out_shape=jax.ShapeDtypeStruct((B_pad, OUT_FEAT), jnp.float32),
        grid=grid,
        in_specs=in_specs,
        out_specs=out_spec,
        compiler_params=pltpu.CompilerParams(
            dimension_semantics=("parallel",),   # ~free on 1-TC chips, 2-way split on v7x
            vmem_limit_bytes=vmem_limit,
        ),
        cost_estimate=pl.CostEstimate(
            flops=flops, transcendentals=0, bytes_accessed=bytes_accessed),
    )(xin, w14, b15, w5, w6, b6)

    # Glue: same as torch's x.reshape(-1, 3, 32, 32)
    return flat[:B].reshape(-1, 3, 32, 32)


def decoder_reference(x, weights, biases, compute_dtype=jnp.float32):
    """Pure-JAX reference.  compute_dtype=bfloat16 mirrors the kernel's weight /
    activation numerics (tight check); float32 is the original torch fp32 semantics
    (loose check bounding the bf16 storage error)."""
    h = x
    for i in range(5):
        w = weights[i].astype(compute_dtype)
        h = jnp.maximum(
            jnp.dot(h.astype(compute_dtype), w, preferred_element_type=jnp.float32)
            + biases[i], 0.0)
    h = jnp.dot(h.astype(compute_dtype), weights[5].astype(compute_dtype),
                preferred_element_type=jnp.float32) + biases[5]
    return h.reshape(-1, 3, 32, 32)


if __name__ == "__main__":
    key = jax.random.PRNGKey(0)
    pkey, xkey = jax.random.split(key)
    weights, biases = make_params(pkey)

    B = 8
    x = jax.random.normal(xkey, (B, IN_FEAT), jnp.float32)

    out = jax.block_until_ready(decoder_forward(x, weights, biases))
    assert out.shape == (B, 3, 32, 32), out.shape
    assert out.dtype == jnp.float32, out.dtype

    # Tight check: reference with identical bf16-weight / f32-accumulate numerics.
    ref_bf16 = jax.block_until_ready(decoder_reference(x, weights, biases, jnp.bfloat16))
    assert bool(jnp.allclose(out, ref_bf16, rtol=1e-2, atol=1e-3)), "kernel vs bf16 reference mismatch"

    # Loose check: original fp32 (torch) semantics — bounds the bf16 storage error.
    ref_f32 = jax.block_until_ready(decoder_reference(x, weights, biases, jnp.float32))
    rel_err = float(jnp.max(jnp.abs(out - ref_f32)) / (jnp.max(jnp.abs(ref_f32)) + 1e-6))
    assert rel_err < 5e-2, f"fp32-reference relative error too large: {rel_err}"

    print("KERNEL_OK")
</pallas_src>

<mosaic_0001>
module attributes {stable_mosaic.version = 11 : i64} {
  func.func @decoder_kernel(%arg0: i32, %arg1: memref<8x16xf32, #tpu.memory_space<vmem>>, %arg2: memref<464x512xbf16, #tpu.memory_space<vmem>>, %arg3: memref<8x1024xf32, #tpu.memory_space<vmem>>, %arg4: memref<512x1024xbf16, #tpu.memory_space<vmem>>, %arg5: memref<1024x768xbf16, #tpu.memory_space<vmem>>, %arg6: memref<1x768xf32, #tpu.memory_space<vmem>>, %arg7: memref<8x768xf32, #tpu.memory_space<vmem>>) attributes {dimension_semantics = [#tpu.dimension_semantics<parallel>], iteration_bounds = array<i64: 4>, scalar_prefetch = 0 : i64, scratch_operands = 0 : i64, tpu.core_type = #tpu.core_type<tc>, window_params = [{pipeline_mode = #tpu.pipeline_mode<synchronous>, transform_indices = @transform_0, window_bounds = array<i64: 8, 16>}, {pipeline_mode = #tpu.pipeline_mode<synchronous>, transform_indices = @transform_1, window_bounds = array<i64: 464, 512>}, {pipeline_mode = #tpu.pipeline_mode<synchronous>, transform_indices = @transform_2, window_bounds = array<i64: 8, 1024>}, {pipeline_mode = #tpu.pipeline_mode<synchronous>, transform_indices = @transform_3, window_bounds = array<i64: 512, 1024>}, {transform_indices = @transform_4, window_bounds = array<i64: 1024, 768>}, {transform_indices = @transform_5, window_bounds = array<i64: 1, 768>}, {transform_indices = @transform_6, window_bounds = array<i64: 8, 768>}]} {
    %c0 = arith.constant 0 : index
    %c0_0 = arith.constant 0 : index
    %0 = vector.load %arg1[%c0, %c0_0] : memref<8x16xf32, #tpu.memory_space<vmem>>, vector<8x16xf32>
    %c0_1 = arith.constant 0 : index
    %c0_2 = arith.constant 0 : index
    %1 = vector.load %arg2[%c0_1, %c0_2] : memref<464x512xbf16, #tpu.memory_space<vmem>>, vector<16x64xbf16>
    %c0_3 = arith.constant 0 : index
    %c0_4 = arith.constant 0 : index
    %2 = vector.load %arg3[%c0_3, %c0_4] : memref<8x1024xf32, #tpu.memory_space<vmem>>, vector<1x64xf32>
    %3 = arith.truncf %0 : vector<8x16xf32> to vector<8x16xbf16>
    %cst = arith.constant dense<0.000000e+00> : vector<8x64xf32>
    %4 = tpu.matmul %3, %1, %cst {dimension_numbers = #tpu.dot_dimension_numbers<[1], [0], [0], [1], [0, 0, 1, 1], [], []>} : vector<8x16xbf16>, vector<16x64xbf16>, vector<8x64xf32> -> vector<8x64xf32>
    %5 = vector.broadcast %2 : vector<1x64xf32> to vector<8x64xf32>
    %6 = arith.addf %4, %5 : vector<8x64xf32>
    %cst_5 = arith.constant 0.000000e+00 : f32
    %7 = vector.broadcast %cst_5 : f32 to vector<8x64xf32>
    %8 = arith.maximumf %6, %7 : vector<8x64xf32>
    %c16 = arith.constant 16 : index
    %c0_6 = arith.constant 0 : index
    %9 = vector.load %arg2[%c16, %c0_6] : memref<464x512xbf16, #tpu.memory_space<vmem>>, vector<64x128xbf16>
    %c1 = arith.constant 1 : index
    %c0_7 = arith.constant 0 : index
    %10 = vector.load %arg3[%c1, %c0_7] : memref<8x1024xf32, #tpu.memory_space<vmem>>, vector<1x128xf32>
    %11 = arith.truncf %8 : vector<8x64xf32> to vector<8x64xbf16>
    %cst_8 = arith.constant dense<0.000000e+00> : vector<8x128xf32>
    %12 = tpu.matmul %11, %9, %cst_8 {dimension_numbers = #tpu.dot_dimension_numbers<[1], [0], [0], [1], [0, 0, 1, 1], [], []>} : vector<8x64xbf16>, vector<64x128xbf16>, vector<8x128xf32> -> vector<8x128xf32>
    %13 = vector.broadcast %10 : vector<1x128xf32> to vector<8x128xf32>
    %14 = arith.addf %12, %13 : vector<8x128xf32>
    %cst_9 = arith.constant 0.000000e+00 : f32
    %15 = vector.broadcast %cst_9 : f32 to vector<8x128xf32>
    %16 = arith.maximumf %14, %15 : vector<8x128xf32>
    %c80 = arith.constant 80 : index
    %c0_10 = arith.constant 0 : index
    %17 = vector.load %arg2[%c80, %c0_10] : memref<464x512xbf16, #tpu.memory_space<vmem>>, vector<128x256xbf16>
    %c2 = arith.constant 2 : index
    %c0_11 = arith.constant 0 : index
    %18 = vector.load %arg3[%c2, %c0_11] : memref<8x1024xf32, #tpu.memory_space<vmem>>, vector<1x256xf32>
    %19 = arith.truncf %16 : vector<8x128xf32> to vector<8x128xbf16>
    %cst_12 = arith.constant dense<0.000000e+00> : vector<8x256xf32>
    %20 = tpu.matmul %19, %17, %cst_12 {dimension_numbers = #tpu.dot_dimension_numbers<[1], [0], [0], [1], [0, 0, 1, 1], [], []>} : vector<8x128xbf16>, vector<128x256xbf16>, vector<8x256xf32> -> vector<8x256xf32>
    %21 = vector.broadcast %18 : vector<1x256xf32> to vector<8x256xf32>
    %22 = arith.addf %20, %21 : vector<8x256xf32>
    %cst_13 = arith.constant 0.000000e+00 : f32
    %23 = vector.broadcast %cst_13 : f32 to vector<8x256xf32>
    %24 = arith.maximumf %22, %23 : vector<8x256xf32>
    %c208 = arith.constant 208 : index
    %c0_14 = arith.constant 0 : index
    %25 = vector.load %arg2[%c208, %c0_14] : memref<464x512xbf16, #tpu.memory_space<vmem>>, vector<256x512xbf16>
    %c3 = arith.constant 3 : index
    %c0_15 = arith.constant 0 : index
    %26 = vector.load %arg3[%c3, %c0_15] : memref<8x1024xf32, #tpu.memory_space<vmem>>, vector<1x512xf32>
    %27 = arith.truncf %24 : vector<8x256xf32> to vector<8x256xbf16>
    %cst_16 = arith.constant dense<0.000000e+00> : vector<8x512xf32>
    %28 = tpu.matmul %27, %25, %cst_16 {dimension_numbers = #tpu.dot_dimension_numbers<[1], [0], [0], [1], [0, 0, 1, 1], [], []>} : vector<8x256xbf16>, vector<256x512xbf16>, vector<8x512xf32> -> vector<8x512xf32>
    %29 = vector.broadcast %26 : vector<1x512xf32> to vector<8x512xf32>
    %30 = arith.addf %28, %29 : vector<8x512xf32>
    %cst_17 = arith.constant 0.000000e+00 : f32
    %31 = vector.broadcast %cst_17 : f32 to vector<8x512xf32>
    %32 = arith.maximumf %30, %31 : vector<8x512xf32>
    %c0_18 = arith.constant 0 : index
    %c0_19 = arith.constant 0 : index
    %33 = vector.load %arg4[%c0_18, %c0_19] : memref<512x1024xbf16, #tpu.memory_space<vmem>>, vector<512x1024xbf16>
    %c4 = arith.constant 4 : index
    %c0_20 = arith.constant 0 : index
    %34 = vector.load %arg3[%c4, %c0_20] : memref<8x1024xf32, #tpu.memory_space<vmem>>, vector<1x1024xf32>
    %35 = arith.truncf %32 : vector<8x512xf32> to vector<8x512xbf16>
    %cst_21 = arith.constant dense<0.000000e+00> : vector<8x1024xf32>
    %36 = tpu.matmul %35, %33, %cst_21 {dimension_numbers = #tpu.dot_dimension_numbers<[1], [0], [0], [1], [0, 0, 1, 1], [], []>} : vector<8x512xbf16>, vector<512x1024xbf16>, vector<8x1024xf32> -> vector<8x1024xf32>
    %37 = vector.broadcast %34 : vector<1x1024xf32> to vector<8x1024xf32>
    %38 = arith.addf %36, %37 : vector<8x1024xf32>
    %cst_22 = arith.constant 0.000000e+00 : f32
    %39 = vector.broadcast %cst_22 : f32 to vector<8x1024xf32>
    %40 = arith.maximumf %38, %39 : vector<8x1024xf32>
    %41 = arith.truncf %40 : vector<8x1024xf32> to vector<8x1024xbf16>
    %c0_23 = arith.constant 0 : index
    %c0_24 = arith.constant 0 : index
    %42 = vector.load %arg5[%c0_23, %c0_24] : memref<1024x768xbf16, #tpu.memory_space<vmem>>, vector<1024x768xbf16>
    %cst_25 = arith.constant dense<0.000000e+00> : vector<8x768xf32>
    %43 = tpu.matmul %41, %42, %cst_25 {dimension_numbers = #tpu.dot_dimension_numbers<[1], [0], [0], [1], [0, 0, 1, 1], [], []>} : vector<8x1024xbf16>, vector<1024x768xbf16>, vector<8x768xf32> -> vector<8x768xf32>
    %c0_26 = arith.constant 0 : index
    %c0_27 = arith.constant 0 : index
    %44 = vector.load %arg6[%c0_26, %c0_27] : memref<1x768xf32, #tpu.memory_space<vmem>>, vector<1x768xf32>
    %45 = vector.broadcast %44 : vector<1x768xf32> to vector<8x768xf32>
    %46 = arith.addf %43, %45 : vector<8x768xf32>
    %c0_28 = arith.constant 0 : index
    %c0_29 = arith.constant 0 : index
    %47 = vector.load %arg7[%c0_28, %c0_29] : memref<8x768xf32, #tpu.memory_space<vmem>>, vector<8x768xf32>
    tpu.vector_store %arg7[%c0_28, %c0_29], %46 {strides = array<i32>} : memref<8x768xf32, #tpu.memory_space<vmem>>, vector<8x768xf32>,
    return
  }
  func.func @transform_0(%arg0: i32) -> (i32, i32) {
    %c0_i32 = arith.constant 0 : i32
    %c0_i32_0 = arith.constant 0 : i32
    %c0_i32_1 = arith.constant 0 : i32
    return %c0_i32, %c0_i32_0 : i32, i32
  }
  func.func @transform_1(%arg0: i32) -> (i32, i32) {
    %c0_i32 = arith.constant 0 : i32
    %c0_i32_0 = arith.constant 0 : i32
    %c0_i32_1 = arith.constant 0 : i32
    return %c0_i32, %c0_i32_0 : i32, i32
  }
  func.func @transform_2(%arg0: i32) -> (i32, i32) {
    %c0_i32 = arith.constant 0 : i32
    %c0_i32_0 = arith.constant 0 : i32
    %c0_i32_1 = arith.constant 0 : i32
    return %c0_i32, %c0_i32_0 : i32, i32
  }
  func.func @transform_3(%arg0: i32) -> (i32, i32) {
    %c0_i32 = arith.constant 0 : i32
    %c0_i32_0 = arith.constant 0 : i32
    %c0_i32_1 = arith.constant 0 : i32
    return %c0_i32, %c0_i32_0 : i32, i32
  }
  func.func @transform_4(%arg0: i32) -> (i32, i32) {
    %c0_i32 = arith.constant 0 : i32
    %c0_i32_0 = arith.constant 0 : i32
    return %c0_i32, %arg0 : i32, i32
  }
  func.func @transform_5(%arg0: i32) -> (i32, i32) {
    %c0_i32 = arith.constant 0 : i32
    %c0_i32_0 = arith.constant 0 : i32
    return %c0_i32, %arg0 : i32, i32
  }
  func.func @transform_6(%arg0: i32) -> (i32, i32) {
    %c0_i32 = arith.constant 0 : i32
    %c0_i32_0 = arith.constant 0 : i32
    return %c0_i32, %arg0 : i32, i32
  }
}

</mosaic_0001>

<bundles_post_ra>
// kernel: tpu_custom_call.1
= control target key start
LH: loop header
LB: loop body
LE: loop exit
PB: predicated region body
PF: predicated region fallthrough
CT: control target
= control target key end

     0   :  { %s11487_s0 = inlined_call_operand.hbm [shape: f32[8,16], index: 0, kind: input, shape index: {}]   ;;  %s11488_s1 = inlined_call_operand.hbm [shape: bf16[464,512], index: 1, kind: input, shape index: {}]   ;;  %s11489_s2 = inlined_call_operand.hbm [shape: f32[8,1024], index: 2, kind: input, shape index: {}]   ;;  %s11490_s3 = inlined_call_operand.hbm [shape: bf16[512,1024], index: 3, kind: input, shape index: {}]   ;;  %s11491_s4 = inlined_call_operand.hbm [shape: bf16[1024,3072], index: 4, kind: input, shape index: {}]   ;;  %s11492_s5 = inlined_call_operand.hbm [shape: f32[1,3072], index: 5, kind: input, shape index: {}]   ;;  %s11493_s6 = inlined_call_operand.hbm [shape: f32[8,3072], index: 6, kind: output, shape index: {}]  }
   0x1   :  { %11499 = sst [smem:[#allocation22_spill]] %s11487_s0 }
   0x2   :  { %11500 = sst [smem:[#allocation23_spill]] %s11488_s1 }
   0x3   :  { %11501 = sst [smem:[#allocation24_spill]] %s11489_s2 }
   0x4   :  { %11 = vsyncpa [#allocation3], 0 }
   0x5   :  { %12 = vsyncpa [#allocation6], 0 }
   0x6   :  { %13 = vsyncpa [#allocation9], 0 }
   0x7   :  { %14 = vsyncpa [#allocation4], 0 }
   0x8   :  { %16 = vsyncpa [#allocation4 + $0x1], 0  ;;  %s10233_s21 = smov 0   ;;  %s10235_s22 = smov 0  }
   0x9   :  { %s10237_s23 = smov 0   ;;  %s10239_s24 = smov 0  }
   0xa LB: > { %11502 = sst [smem:[#allocation18_spill]] %s10173_s21  ;;  %s10254_s25 = sadd.s32 4294967295, %s10185_s24   ;;  %s10185_s24 = sphi %s10239_s24, %s11524_s24   ;;  %s10181_s23 = sphi %s10237_s23, %s11528_s23   ;;  %s10177_s22 = sphi %s10235_s22, %s11527_s22   ;;  %s10173_s21 = sphi %s10233_s21, %s11526_s21  }
   0xb   : > { %s6176_s26 = sadd.s32 4294967294, %s10185_s24   ;;  %s10258_s27 = sadd.s32 1, %s10185_s24  }
   0xc   : > { %11503 = sst [smem:[#allocation19_spill]] %s10258_s27  ;;  %s113_s28 = sadd.s32 1, %s10181_s23 }
   0xd   : > { %s110_s29 = ssub.s32 %s10185_s24, %s10258_s27  ;;  %p120_p0 = scmp.ne.s32.totalorder %s10181_s23, %s10177_s22 }
   0xe   : > { %p111_p1 = scmp.eq.s32.totalorder %s110_s29, 0  ;;  %p121_p2 = scmp.eq.s32.totalorder %s10185_s24, 0 }
   0xf   : > { %p126_p3 = scmp.ne.s32.totalorder %s10177_s22, %s10173_s21  ;;  %p11498_p4 = scmp.eq.s32.totalorder %s10254_s25, 0 }
  0x10   : > { %s10270_s30 = scalar_select %p111_p1, %s10181_s23, %s113_s28  }
  0x11   : > { %p10272_p5 = por %p121_p2, %p120_p0  ;;  %p10278_p6 = por %p11498_p4, %p126_p3 }
  0x12   : > { %11504 = sst [smem:[#allocation20_spill]] %s10270_s30  ;;  %p176_p7 = scmp.eq.s32.totalorder %s10254_s25, 3 }
  0x13   : > { %p182_p8 = scmp.eq.s32.totalorder %s6176_s26, 3  ;;  %p6177_p9 = scmp.ge.s32.totalorder %s10185_s24, 1 }
  0x14   : > { %p189_p10 = scmp.lt.s32.totalorder %s10185_s24, 5  ;;  %p10285_p11 = por %p176_p7, %p120_p0 }
  0x15   : > { %p10289_p12 = por %p182_p8, %p126_p3  ;;  %s11511_s0 = sld [smem:[#allocation22_spill]] }
  0x16   : > { %p10293_p13 = pnand %p6177_p9, %p189_p10  ;;  %s10187_s15 = smov [#allocation2]  }
  0x17   : > { %s11508_s10 = scalar_select %p10289_p12, 1, 0 }
  0x18   : > { %p9848_p1 = pneg %p10293_p13  ;;  %s203_s16 = sshll.u32 %s10187_s15, 4  ;;  %s204_s16 = int_to_ptr.vmem [resolvable:$true] %s203_s16 }
  0x19   : > { %11509 = sst [smem:[#allocation21_spill]] %s11508_s10  ;;  %p9876_p2 = scmp.lt.s32.totalorder %s10185_s24, 4 }
  0x1a   : > { %p10304_p0 = pnand %p9848_p1, %p11498_p4  ;;  %s11513_s1 = sld [smem:[#allocation23_spill]] }
  0x1b   : > { %s201_s14 = sshll.u32 %s11511_s0, 4  ;;  %p10316_p3 = pnand %p9876_p2, %p10272_p5  ;;  %s202_s14 = int_to_ptr.hbm [resolvable:$true] %s201_s14 }
  0x1c   : > { %9851 = dma.hbm_to_vmem [thread:$0]  (!%p10304_p0), %s202_s14, 128, %s204_s16, [#allocation3]  }
  0x1d   : > { %s10188_s28 = smov [#allocation5]   ;;  %s254_s12 = sand.u32 1, %s10185_s24  }
  0x1e   : > { %s214_s29 = sshll.u32 %s10188_s28, 4  ;;  %s10189_s13 = smov 256   ;;  %s215_s29 = int_to_ptr.vmem [resolvable:$true] %s214_s29 }
  0x1f   : > { %s10190_s15 = smov 16   ;;  %s256_s0 = sand.u32 1, %s10181_s23  }
  0x20   : > { %s212_s20 = sshll.u32 %s11513_s1, 4  ;;  %s9821_s18 = smul.u32 3072, %s256_s0  ;;  %s213_s20 = int_to_ptr.hbm [resolvable:$true] %s212_s20 }
  0x21   : > { %9854 = dma.hbm_to_vmem [thread:$0]  (!%p10304_p0), %s213_s20, 14848, %s215_s29, [#allocation6], %s10189_s13, %s10189_s13, %s10190_s15  }
  0x22   : > { %s9094_s19 = smul.u32 24, %s10185_s24  ;;  %s258_s1 = scalar_lea.vmem [#allocation10], %s9821_s18 }
  0x23   : > { %s266_s30 = sshll.u32 %s258_s1, 4  ;;  %s11515_s2 = sld [smem:[#allocation24_spill]]  ;;  %s267_s30 = int_to_ptr.vmem [resolvable:$true] %s266_s30 }
  0x24   : > { %s263_s16 = scalar_lea.hbm %s11491_s4, %s9094_s19  ;;  %s10333_s20 = scalar_lea.sflag [#allocation3], %s254_s12 }
  0x25   : > { %s264_s27 = sshll.u32 %s263_s16, 4  ;;  %p9991_p7 = pneg %p10316_p3  ;;  %s265_s27 = int_to_ptr.hbm [resolvable:$true] %s264_s27 }
  0x26   : > { %s9987_s29 = sshra.s32 %s265_s27, 4  ;;  %s9994_s18 = scalar_lea.hbm %s11491_s4, 12288  ;;  %s9988_s29 = int_to_ptr.hbm [resolvable:$true] %s9987_s29 }
  0x27   : > { %s9989_s13 = scalar_lea.hbm %s9988_s29, 3072  ;;  %p9995_p10 = scmp.lt.s32.totalorder %s9988_s29, %s11491_s4 }
  0x28   : > { %p9990_p5 = scmp.ne.s32.totalorder %s9988_s29, %s9989_s13  ;;  %p9996_p1 = scmp.lt.s32.totalorder %s9994_s18, %s9989_s13 }
  0x29   : > { %s227_s21 = sshll.u32 %s11515_s2, 4  ;;  %s228_s21 = int_to_ptr.hbm [resolvable:$true] %s227_s21 }
  0x2a   : > { %p9992_p8 = pnand %p9991_p7, %p9990_p5  ;;  %p9997_p2 = por %p9996_p1, %p9995_p10 }
  0x2c   : > { %p9993_p9 = pneg %p9992_p8 }
  0x2e   : > { %p9998_p4 = pnand %p9997_p2, %p9993_p9 }
  0x30   : > { %10001 = shalt.err (!%p9998_p4)
}
  0x31   : > { %s10191_s10 = smov 1536   ;;  %s10192_s12 = smov 384  }
  0x32   : > { %s10193_s7 = smov 24   ;;  %s10194_s16 = smov [#allocation7]  }
  0x33   : > { %9864 = dma.hbm_to_vmem [thread:$0]  (!%p10316_p3), %s265_s27, 49152, %s267_s30, %s10333_s20, %s10191_s10, %s10192_s12, %s10193_s7  }
  0x34   : > { %s229_s28 = sshll.u32 %s10194_s16, 4  ;;  %s238_s13 = sshll.u32 %s11490_s3, 4  ;;  %s230_s28 = int_to_ptr.vmem [resolvable:$true] %s229_s28  ;;  %s239_s13 = int_to_ptr.hbm [resolvable:$true] %s238_s13 }
  0x35   : > { %9857 = dma.hbm_to_vmem [thread:$0]  (!%p10304_p0), %s228_s21, 1024, %s230_s28, [#allocation6]  }
  0x36   : > { %s10195_s15 = smov [#allocation8]   ;;  %s9822_s19 = smul.u32 6, %s256_s0 }
  0x37   : > { %s240_s18 = sshll.u32 %s10195_s15, 4  ;;  %s10196_s14 = smov 512   ;;  %s241_s18 = int_to_ptr.vmem [resolvable:$true] %s240_s18 }
  0x38   : > { %s10197_s2 = smov 32   ;;  %s281_s27 = smul.u32 6, %s10185_s24 }
  0x39   : > { %9860 = dma.hbm_to_vmem [thread:$0]  (!%p10304_p0), %s239_s13, 32768, %s241_s18, [#allocation9], %s10196_s14, %s10196_s14, %s10197_s2  }
  0x3a   : > { %s280_s30 = scalar_lea.vmem [#allocation11], %s9822_s19  ;;  %s284_s16 = scalar_lea.hbm %s11492_s5, %s281_s27 }
  0x3b   : > { %s288_s10 = sshll.u32 %s280_s30, 4  ;;  %s286_s1 = sshll.u32 %s284_s16, 4  ;;  %s289_s10 = int_to_ptr.vmem [resolvable:$true] %s288_s10  ;;  %s287_s1 = int_to_ptr.hbm [resolvable:$true] %s286_s1 }
  0x3c   : > { %s10077_s21 = sshra.s32 %s287_s1, 4  ;;  %s10084_s17 = scalar_lea.hbm %s11492_s5, 24  ;;  %s10078_s21 = int_to_ptr.hbm [resolvable:$true] %s10077_s21 }
  0x3d   : > { %s10079_s28 = scalar_lea.hbm %s10078_s21, 6  ;;  %p10085_p0 = scmp.lt.s32.totalorder %s10078_s21, %s11492_s5 }
  0x3e   : > { %p10080_p4 = scmp.ne.s32.totalorder %s10078_s21, %s10079_s28  ;;  %p10086_p9 = scmp.lt.s32.totalorder %s10084_s17, %s10079_s28 }
  0x40   : > { %p10082_p5 = pnand %p10080_p4, %p9991_p7  ;;  %p10087_p10 = por %p10086_p9, %p10085_p0 }
  0x42   : > { %p10083_p8 = pneg %p10082_p5 }
  0x44   : > { %p10088_p1 = pnand %p10087_p10, %p10083_p8 }
  0x46   : > { %10091 = shalt.err (!%p10088_p1)
}
  0x47   : > { %9867 = dma.hbm_to_vmem [thread:$0]  (!%p10316_p3), %s287_s1, 96, %s289_s10, %s10333_s20  }
  0x48   : > { %297 = sbr.rel (%p10293_p13) target bundleno = 1419 (0x58b), region = 44  ;;  %p11516_p7 = scmp.eq.s32.totalorder (!%p10293_p13), %s10254_s25, 0 }
  0x4d   : > { %10152 = dma.done.wait (%p11516_p7), [#allocation3], 128   ;;  %p11517_p2 = pmov %p11516_p7 }
  0x4f   : > { %10154 = vsyncadd (%p11517_p2), [#allocation3], 4294967168  ;;  %p11518_p4 = pmov %p11517_p2 }
  0x50   : > { %p11519_p5 = pmov %p11517_p2 }
  0x51   : > { %10156 = dma.done.wait (%p11518_p4), [#allocation6], 15872  }
  0x52   : > { %10158 = vsyncadd (%p11519_p5), [#allocation6], 4294951424  ;;  %p11520_p8 = pmov %p11517_p2 }
  0x53   : > { %p11521_p3 = pmov %p11517_p2 }
  0x54   : > { %10160 = dma.done.wait (%p11520_p8), [#allocation9], 32768  }
  0x55   : > { %10162 = vsyncadd (%p11521_p3), [#allocation9], 4294934528  ;;  %s319_s11 = sand.u32 1, %s10254_s25   ;;  %s10390_s26 = sand.u32 1, %s10177_s22  }
  0x56   : > { %s9823_s20 = smul.u32 3072, %s10390_s26  ;;  %s320_s15 = scalar_lea.sflag [#allocation3], %s319_s11 }
  0x58   : > { %s10393_s18 = scalar_lea.vmem [#allocation10], %s9823_s20 }
  0x59   : > { %10164 = dma.done.wait (%p10278_p6), %s320_s15, 49248  }
  0x5a   : > { %10166 = vsyncadd (%p10278_p6), %s320_s15, 4294918048  ;;  %v6191_v0 = vld [vmem:[#allocation5] sm:$0xf]  ;;  %v9095_v1 = vld [vmem:[#allocation5 + $0xc] sm:$0xf0]  ;;  %vm383_vm0 = vcmask 130048  }
  0x5b   : > { %v372_v2 = vld [vmem:[#allocation2] sm:$0xff]  ;;  %v6192_v3 = vor.u32 %v9095_v1, %v6191_v0  ;;  %v6208_v4 = vld [vmem:[#allocation5 + $0x80] sm:$0xf]  ;;  %v9099_v5 = vld [vmem:[#allocation5 + $0x8c] sm:$0xf0]  ;;  %vm435_vm1 = vcmask 523264  }
  0x5c   : > { %v6204_v6 = vld [vmem:[#allocation5 + $0x60] sm:$0xf]  ;;  %v376_v7 = vpack.c.bf16 %v372_v2, %v372_v2  ;;  %v6209_v8 = vor.u32 %v9099_v5, %v6208_v4  ;;  %v9098_v9 = vld [vmem:[#allocation5 + $0x6c] sm:$0xf0]  ;;  %v9114_v19 = vld [vmem:[#allocation5 + $0x184] sm:$0xf] }
  0x5d   : > { %394 = vmatpush.bf16.msra.mxu0 %v6192_v3  ;;  %v6205_v10 = vor.u32 %v9098_v9, %v6204_v6  ;;  %v6200_v11 = vld [vmem:[#allocation5 + $0x40] sm:$0xf]  ;;  %v9097_v12 = vld [vmem:[#allocation5 + $0x4c] sm:$0xf0]  ;;  %v6271_v21 = vld [vmem:[#allocation5 + $0x190] sm:$0xf0] }
  0x5e   : > { %443 = vmatpush.bf16.msra.mxu1 %v6209_v8  ;;  %v6201_v13 = vor.u32 %v9097_v12, %v6200_v11  ;;  %v6196_v14 = vld [vmem:[#allocation5 + $0x20] sm:$0xf]  ;;  %v9096_v15 = vld [vmem:[#allocation5 + $0x2c] sm:$0xf0]  ;;  %v6274_v24 = vor.u32 %v9114_v19, %v6271_v21  ;;  %v9112_v25 = vld [vmem:[#allocation5 + $0x164] sm:$0xf] }
  0x5f   : > { %v6197_v16 = vor.u32 %v9096_v15, %v6196_v14  ;;  %v6269_v17 = vld [vmem:[#allocation5 + $0x180] sm:$0xf]  ;;  %v9115_v18 = vld [vmem:[#allocation5 + $0x18c] sm:$0xf0]  ;;  %v6263_v26 = vld [vmem:[#allocation5 + $0x170] sm:$0xf0] }
  0x60   : > { %6193 = vmatmul.msk.bf16.vlgmr.msra.gmra.mxu0 %vm383_vm0, %v376_v7  ;;  %v6270_v20 = vor.u32 %v9115_v18, %v6269_v17  ;;  %v6261_v22 = vld [vmem:[#allocation5 + $0x160] sm:$0xf]  ;;  %v9113_v23 = vld [vmem:[#allocation5 + $0x16c] sm:$0xf0]  ;;  %570 = vmatpush.bf16.msra.mxu3 %v6274_v24  ;;  %v6266_v28 = vor.u32 %v9112_v25, %v6263_v26  ;;  %v9110_v31 = vld [vmem:[#allocation5 + $0x144] sm:$0xf] }
  0x61   : > { %v6262_v27 = vor.u32 %v9113_v23, %v6261_v22  ;;  %v6253_v29 = vld [vmem:[#allocation5 + $0x140] sm:$0xf]  ;;  %v9111_v30 = vld [vmem:[#allocation5 + $0x14c] sm:$0xf0]  ;;  %v6255_v32 = vld [vmem:[#allocation5 + $0x150] sm:$0xf0] }
  0x62   : > { %444 = vmatpush.bf16.msra.mxu1 %v6205_v10  ;;  %557 = vmatpush.bf16.msra.mxu2 %v6270_v20  ;;  %v6254_v33 = vor.u32 %v9111_v30, %v6253_v29  ;;  %v6258_v34 = vor.u32 %v9110_v31, %v6255_v32  ;;  %v6245_v35 = vld [vmem:[#allocation5 + $0x120] sm:$0xf]  ;;  %v9109_v36 = vld [vmem:[#allocation5 + $0x12c] sm:$0xf0]  ;;  %v9108_v37 = vld [vmem:[#allocation5 + $0x124] sm:$0xf] }
  0x63   : > { %v6247_v38 = vld [vmem:[#allocation5 + $0x130] sm:$0xf0]  ;;  %v6246_v39 = vor.u32 %v9109_v36, %v6245_v35  ;;  %v6237_v41 = vld [vmem:[#allocation5 + $0x100] sm:$0xf]  ;;  %v9107_v42 = vld [vmem:[#allocation5 + $0x10c] sm:$0xf0] }
  0x64   : > { %571 = vmatpush.bf16.msra.mxu3 %v6266_v28  ;;  %v6250_v40 = vor.u32 %v9108_v37, %v6247_v38  ;;  %v9106_v43 = vld [vmem:[#allocation5 + $0x104] sm:$0xf]  ;;  %v6239_v44 = vld [vmem:[#allocation5 + $0x110] sm:$0xf0]  ;;  %v6238_v45 = vor.u32 %v9107_v42, %v6237_v41  ;;  %v6229_v47 = vld [vmem:[#allocation5 + $0xe0] sm:$0xf] }
  0x65   : > { %v6242_v46 = vor.u32 %v9106_v43, %v6239_v44  ;;  %v9105_v48 = vld [vmem:[#allocation5 + $0xec] sm:$0xf0]  ;;  %v9104_v49 = vld [vmem:[#allocation5 + $0xe4] sm:$0xf]  ;;  %v6231_v50 = vld [vmem:[#allocation5 + $0xf0] sm:$0xf0] }
  0x66   : > { %445 = vmatpush.bf16.msra.mxu1 %v6201_v13  ;;  %558 = vmatpush.bf16.msra.mxu2 %v6262_v27  ;;  %v6230_v51 = vor.u32 %v9105_v48, %v6229_v47  ;;  %v6234_v52 = vor.u32 %v9104_v49, %v6231_v50  ;;  %v375_v53 = vld [vmem:[#allocation7] ss:$0 sm:$0xff]  ;;  %v9103_v60 = vld [vmem:[#allocation5 + $0xcc] sm:$0xf0]  ;;  %v9102_v61 = vld [vmem:[#allocation5 + $0xc4] sm:$0xf] }
  0x67   : > { %v6221_v59 = vld [vmem:[#allocation5 + $0xc0] sm:$0xf]  ;;  %v6223_v63 = vld [vmem:[#allocation5 + $0xd0] sm:$0xf0]  ;;  %v9101_v2 = vld [vmem:[#allocation5 + $0xac] sm:$0xf0] }
  0x68   : > { %572 = vmatpush.bf16.msra.mxu3 %v6258_v34  ;;  %v6222_v62 = vor.u32 %v9103_v60, %v6221_v59  ;;  %v6226_v0 = vor.u32 %v9102_v61, %v6223_v63  ;;  %v6213_v1 = vld [vmem:[#allocation5 + $0xa0] sm:$0xf]  ;;  %v9100_v3 = vld [vmem:[#allocation5 + $0xa4] sm:$0xf]  ;;  %v6215_v5 = vld [vmem:[#allocation5 + $0xb0] sm:$0xf0] }
  0x69   : > { %v6214_v4 = vor.u32 %v9101_v2, %v6213_v1  ;;  %v6218_v6 = vor.u32 %v9100_v3, %v6215_v5  ;;  %v6389_v7 = vld [vmem:[#allocation5 + $0x280] sm:$0xf]  ;;  %v9146_v8 = vld [vmem:[#allocation5 + $0x28c] sm:$0xf0]  ;;  %v9144_v12 = vld [vmem:[#allocation5 + $0x284] sm:$0xf] }
  0x6a   : > { %446 = vmatpush.bf16.msra.mxu1 %v6197_v16  ;;  %559 = vmatpush.bf16.msra.mxu2 %v6254_v33  ;;  %v6517_v9 = vld [vmem:[#allocation5 + $0x380] sm:$0xf]  ;;  %v6390_v10 = vor.u32 %v9146_v8, %v6389_v7  ;;  %v9178_v11 = vld [vmem:[#allocation5 + $0x38c] sm:$0xf0]  ;;  %v6391_v13 = vld [vmem:[#allocation5 + $0x290] sm:$0xf0] }
  0x6b   : > { %v6518_v14 = vor.u32 %v9178_v11, %v6517_v9  ;;  %v6394_v15 = vor.u32 %v9144_v12, %v6391_v13  ;;  %v9176_v16 = vld [vmem:[#allocation5 + $0x384] sm:$0xf]  ;;  %v6519_v17 = vld [vmem:[#allocation5 + $0x390] sm:$0xf0]  ;;  %v6373_v18 = vld [vmem:[#allocation5 + $0x260] sm:$0xf] }
  0x6c   : > { %573 = vmatpush.bf16.msra.mxu3 %v6250_v40  ;;  %982 = vmatpush.bf16.msrb.mxu0 %v6390_v10  ;;  %v6522_v19 = vor.u32 %v9176_v16, %v6519_v17  ;;  %v9142_v20 = vld [vmem:[#allocation5 + $0x26c] sm:$0xf0]  ;;  %v6501_v21 = vld [vmem:[#allocation5 + $0x360] sm:$0xf]  ;;  %v9140_v25 = vld [vmem:[#allocation5 + $0x264] sm:$0xf] }
  0x6d   : > { %v9174_v22 = vld [vmem:[#allocation5 + $0x36c] sm:$0xf0]  ;;  %v6374_v23 = vor.u32 %v9142_v20, %v6373_v18  ;;  %v6375_v26 = vld [vmem:[#allocation5 + $0x270] sm:$0xf0]  ;;  %v9172_v27 = vld [vmem:[#allocation5 + $0x364] sm:$0xf] }
  0x6e   : > { %560 = vmatpush.bf16.msra.mxu2 %v6246_v39  ;;  %995 = vmatpush.bf16.msrb.mxu1 %v6518_v14  ;;  %v6502_v24 = vor.u32 %v9174_v22, %v6501_v21  ;;  %v6378_v28 = vor.u32 %v9140_v25, %v6375_v26  ;;  %v6503_v29 = vld [vmem:[#allocation5 + $0x370] sm:$0xf0]  ;;  %v6357_v30 = vld [vmem:[#allocation5 + $0x240] sm:$0xf]  ;;  %v9138_v31 = vld [vmem:[#allocation5 + $0x24c] sm:$0xf0] }
  0x6f   : > { %v6506_v32 = vor.u32 %v9172_v27, %v6503_v29  ;;  %v6485_v33 = vld [vmem:[#allocation5 + $0x340] sm:$0xf]  ;;  %v9170_v34 = vld [vmem:[#allocation5 + $0x34c] sm:$0xf0]  ;;  %v9136_v35 = vld [vmem:[#allocation5 + $0x244] sm:$0xf]  ;;  %v6358_v36 = vor.u32 %v9138_v31, %v6357_v30 }
  0x70   : > { %574 = vmatpush.bf16.msra.mxu3 %v6242_v46  ;;  %983 = vmatpush.bf16.msrb.mxu0 %v6374_v23  ;;  %v6359_v37 = vld [vmem:[#allocation5 + $0x250] sm:$0xf0]  ;;  %v9168_v38 = vld [vmem:[#allocation5 + $0x344] sm:$0xf]  ;;  %v6486_v40 = vor.u32 %v9170_v34, %v6485_v33  ;;  %v6341_v42 = vld [vmem:[#allocation5 + $0x220] sm:$0xf] }
  0x71   : > { %v6487_v39 = vld [vmem:[#allocation5 + $0x350] sm:$0xf0]  ;;  %v6362_v41 = vor.u32 %v9136_v35, %v6359_v37  ;;  %v9134_v43 = vld [vmem:[#allocation5 + $0x22c] sm:$0xf0]  ;;  %v6469_v44 = vld [vmem:[#allocation5 + $0x320] sm:$0xf] }
  0x72   : > { %561 = vmatpush.bf16.msra.mxu2 %v6238_v45  ;;  %996 = vmatpush.bf16.msrb.mxu1 %v6502_v24  ;;  %v6490_v45 = vor.u32 %v9168_v38, %v6487_v39  ;;  %v9166_v46 = vld [vmem:[#allocation5 + $0x32c] sm:$0xf0]  ;;  %v9132_v47 = vld [vmem:[#allocation5 + $0x224] sm:$0xf]  ;;  %v6343_v48 = vld [vmem:[#allocation5 + $0x230] sm:$0xf0] }
  0x73   : > { %v9164_v49 = vld [vmem:[#allocation5 + $0x324] sm:$0xf]  ;;  %v6471_v50 = vld [vmem:[#allocation5 + $0x330] sm:$0xf0]  ;;  %v6309_v2 = vld [vmem:[#allocation5 + $0x1e0] sm:$0xf] }
  0x74   : > { %575 = vmatpush.bf16.msra.mxu3 %v6234_v52  ;;  %984 = vmatpush.bf16.msrb.mxu0 %v6358_v36  ;;  %v6470_v52 = vor.u32 %v9166_v46, %v6469_v44  ;;  %v9128_v59 = vld [vmem:[#allocation5 + $0x204] sm:$0xf]  ;;  %v6327_v60 = vld [vmem:[#allocation5 + $0x210] sm:$0xf0]  ;;  %v9126_v3 = vld [vmem:[#allocation5 + $0x1ec] sm:$0xf0] }
  0x75   : > { %v9160_v61 = vld [vmem:[#allocation5 + $0x304] sm:$0xf]  ;;  %v6330_v1 = vor.u32 %v9128_v59, %v6327_v60  ;;  %v6311_v8 = vld [vmem:[#allocation5 + $0x1f0] sm:$0xf0]  ;;  %v6310_v11 = vor.u32 %v9126_v3, %v6309_v2  ;;  %v6293_v14 = vld [vmem:[#allocation5 + $0x1c0] sm:$0xf] }
  0x76   : > { %562 = vmatpush.bf16.msra.mxu2 %v6230_v51  ;;  %v6342_v51 = vor.u32 %v9134_v43, %v6341_v42  ;;  %997 = vmatpush.bf16.msrb.mxu1 %v6486_v40  ;;  %v9124_v7 = vld [vmem:[#allocation5 + $0x1e4] sm:$0xf]  ;;  %v6439_v10 = vld [vmem:[#allocation5 + $0x2f0] sm:$0xf0]  ;;  %v6421_v16 = vld [vmem:[#allocation5 + $0x2c0] sm:$0xf] }
  0x77   : > { %v9156_v9 = vld [vmem:[#allocation5 + $0x2e4] sm:$0xf]  ;;  %v6314_v13 = vor.u32 %v9124_v7, %v6311_v8  ;;  %v9154_v18 = vld [vmem:[#allocation5 + $0x2cc] sm:$0xf0]  ;;  %v6295_v20 = vld [vmem:[#allocation5 + $0x1d0] sm:$0xf0] }
  0x78   : > { %576 = vmatpush.bf16.msra.mxu3 %v6226_v0  ;;  %985 = vmatpush.bf16.msrb.mxu0 %v6342_v51  ;;  %v6442_v17 = vor.u32 %v9156_v9, %v6439_v10  ;;  %v409_v21 = vld [vmem:[#allocation7 + $0x1] ss:$0 sm:$0xff]  ;;  %v9152_v22 = vld [vmem:[#allocation5 + $0x2c4] sm:$0xf]  ;;  %v6423_v23 = vld [vmem:[#allocation5 + $0x2d0] sm:$0xf0] }
  0x79   : > { %v6277_v25 = vld [vmem:[#allocation5 + $0x1a0] sm:$0xf]  ;;  %v9118_v26 = vld [vmem:[#allocation5 + $0x1ac] sm:$0xf0]  ;;  %v6426_v34 = vor.u32 %v9152_v22, %v6423_v23  ;;  %v6279_v35 = vld [vmem:[#allocation5 + $0x1b0] sm:$0xf0] }
  0x7a   : > { %563 = vmatpush.bf16.msra.mxu2 %v6222_v62  ;;  %v6455_v62 = vld [vmem:[#allocation5 + $0x310] sm:$0xf0]  ;;  %998 = vmatpush.bf16.msrb.mxu1 %v6470_v52  ;;  %v6405_v30 = vld [vmem:[#allocation5 + $0x2a0] sm:$0xf]  ;;  %v9150_v31 = vld [vmem:[#allocation5 + $0x2ac] sm:$0xf0]  ;;  %v6278_v44 = vor.u32 %v9118_v26, %v6277_v25 }
  0x7b   : > { %v6458_v5 = vor.u32 %v9160_v61, %v6455_v62  ;;  %v9148_v36 = vld [vmem:[#allocation5 + $0x2a4] sm:$0xf]  ;;  %v6407_v37 = vld [vmem:[#allocation5 + $0x2b0] sm:$0xf0]  ;;  %v6397_v38 = vld [vmem:[#allocation5 + $0x288] sm:$0xf] }
  0x7c   : > { %577 = vmatpush.bf16.msra.mxu3 %v6218_v6  ;;  %v9158_v6 = vld [vmem:[#allocation5 + $0x2ec] sm:$0xf0]  ;;  %v9147_v39 = vld [vmem:[#allocation5 + $0x294] sm:$0xf0]  ;;  %v6525_v40 = vld [vmem:[#allocation5 + $0x388] sm:$0xf]  ;;  %v6410_v51 = vor.u32 %v9148_v36, %v6407_v37 }
  0x7d   : > { %v9179_v42 = vld [vmem:[#allocation5 + $0x394] sm:$0xf0]  ;;  %v9145_v43 = vld [vmem:[#allocation5 + $0x28c] sm:$0xf]  ;;  %v6399_v46 = vld [vmem:[#allocation5 + $0x298] sm:$0xf0]  ;;  %v6398_v52 = vor.u32 %v9147_v39, %v6397_v38 }
  0x7e   : > { %564 = vmatpush.bf16.msra.mxu2 %v6214_v4  ;;  %v6437_v4 = vld [vmem:[#allocation5 + $0x2e0] sm:$0xf]  ;;  %v9175_v59 = vld [vmem:[#allocation5 + $0x374] sm:$0xf0]  ;;  %v9141_v60 = vld [vmem:[#allocation5 + $0x26c] sm:$0xf] }
  0x7f   : > { %v6438_v12 = vor.u32 %v9158_v6, %v6437_v4  ;;  %v6383_v62 = vld [vmem:[#allocation5 + $0x278] sm:$0xf0]  ;;  %v9139_v6 = vld [vmem:[#allocation5 + $0x254] sm:$0xf0]  ;;  %v6493_v7 = vld [vmem:[#allocation5 + $0x348] sm:$0xf] }
  0x80   : > { %1021 = vmatpush.bf16.msrb.mxu3 %v6522_v19  ;;  %v9120_v19 = vld [vmem:[#allocation5 + $0x1c4] sm:$0xf]  ;;  %v6386_v3 = vor.u32 %v9141_v60, %v6383_v62  ;;  %v9171_v9 = vld [vmem:[#allocation5 + $0x354] sm:$0xf0]  ;;  %v9137_v10 = vld [vmem:[#allocation5 + $0x24c] sm:$0xf] }
  0x81   : > { %v6298_v29 = vor.u32 %v9120_v19, %v6295_v20  ;;  %v6477_v19 = vld [vmem:[#allocation5 + $0x328] sm:$0xf]  ;;  %v9133_v22 = vld [vmem:[#allocation5 + $0x22c] sm:$0xf]  ;;  %v6351_v23 = vld [vmem:[#allocation5 + $0x238] sm:$0xf0] }
  0x82   : > { %1008 = vmatpush.bf16.msrb.mxu2 %v6394_v15  ;;  %v9122_v15 = vld [vmem:[#allocation5 + $0x1cc] sm:$0xf0]  ;;  %v6354_v25 = vor.u32 %v9133_v22, %v6351_v23  ;;  %v9165_v26 = vld [vmem:[#allocation5 + $0x32c] sm:$0xf]  ;;  %v6463_v39 = vld [vmem:[#allocation5 + $0x318] sm:$0xf0] }
  0x83   : > { %v6294_v24 = vor.u32 %v9122_v15, %v6293_v14  ;;  %v9169_v14 = vld [vmem:[#allocation5 + $0x34c] sm:$0xf]  ;;  %v6495_v15 = vld [vmem:[#allocation5 + $0x358] sm:$0xf0]  ;;  %v7013_v22 = vld [vmem:[#allocation8 + $0x3c0] sm:$0xf] }
  0x84   : > { %1022 = vmatpush.bf16.msrb.mxu3 %v6506_v32  ;;  %v9116_v32 = vld [vmem:[#allocation5 + $0x1a4] sm:$0xf]  ;;  %v9161_v38 = vld [vmem:[#allocation5 + $0x30c] sm:$0xf]  ;;  %v9304_v23 = vld [vmem:[#allocation8 + $0x3dc] sm:$0xf0] }
  0x85   : > { %v9153_v60 = vld [vmem:[#allocation5 + $0x2cc] sm:$0xf]  ;;  %s9824_s8 = smul.u32 6, %s10390_s26  ;;  %s6032_s21 = scalar_lea.sflag [#allocation4], %s10390_s26 }
  0x86   : > { %1009 = vmatpush.bf16.msrb.mxu2 %v6378_v28  ;;  %v6422_v28 = vor.u32 %v9154_v18, %v6421_v16  ;;  %v6498_v16 = vor.u32 %v9169_v14, %v6495_v15  ;;  %v9135_v18 = vld [vmem:[#allocation5 + $0x234] sm:$0xf0]  ;;  %s9825_s14 = smul.u32 48, %s10390_s26  ;;  %s10127_s17 = scalar_lea.hbm %s11493_s6, 192 }
  0x87   : > { %s10834_s19 = scalar_lea.vmem [#allocation11], %s9824_s8  ;;  %s9820_s30 = smul.u32 48, %s10254_s25 }
  0x88   : > { %1023 = vmatpush.bf16.msrb.mxu3 %v6490_v45  ;;  %v6406_v45 = vor.u32 %v9150_v31, %v6405_v30  ;;  %v9131_v30 = vld [vmem:[#allocation5 + $0x214] sm:$0xf0]  ;;  %v6461_v31 = vld [vmem:[#allocation5 + $0x308] sm:$0xf]  ;;  %s11207_s27 = scalar_lea.vmem [#allocation12], %s9825_s14 }
  0x89   : > { %s6043_s7 = scalar_lea.hbm %s11493_s6, %s9820_s30  ;;  %s6045_s16 = sshll.u32 %s11207_s27, 4  ;;  %s6046_s16 = int_to_ptr.vmem [resolvable:$true] %s6045_s16 }
  0x8a   : > { %1010 = vmatpush.bf16.msrb.mxu2 %v6362_v41  ;;  %s6047_s1 = sshll.u32 %s6043_s7, 4  ;;  %s6048_s1 = int_to_ptr.hbm [resolvable:$true] %s6047_s1 }
  0x8b   : > { %s10121_s28 = sshra.s32 %s6048_s1, 4  ;;  %s10122_s28 = int_to_ptr.hbm [resolvable:$true] %s10121_s28 }
  0x8c   : > { %s10123_s0 = scalar_lea.hbm %s10122_s28, 48  ;;  %p10128_p9 = scmp.lt.s32.totalorder %s10122_s28, %s11493_s6 }
  0x8d   : > { %p10124_p6 = scmp.ne.s32.totalorder %s10122_s28, %s10123_s0  ;;  %p10129_p10 = scmp.lt.s32.totalorder %s10127_s17, %s10123_s0 }
  0x8f   : > { %p10125_p13 = pnand %p10124_p6, %p10285_p11  ;;  %p10130_p1 = por %p10129_p10, %p10128_p9 }
  0x91   : > { %p10126_p0 = pneg %p10125_p13 }
  0x93   : > { %p10131_p7 = pnand %p10130_p1, %p10126_p0 }
  0xdd   : > { %v396_v54 = vpop.f32.mrf.mxu0 }
  0xde   : > { %v397_v55 = vadd.f32 %v396_v54, %v375_v53  ;;  %v6346_v53 = vor.u32 %v9132_v47, %v6343_v48  ;;  %v6325_v54 = vld [vmem:[#allocation5 + $0x200] sm:$0xf]  ;;  %v9177_v47 = vld [vmem:[#allocation5 + $0x38c] sm:$0xf]  ;;  %v6527_v48 = vld [vmem:[#allocation5 + $0x398] sm:$0xf0] }
  0xe0   : > { %v400_v56 = vmax.f32 %v397_v55, 0.0  ;;  %v9130_v55 = vld [vmem:[#allocation5 + $0x20c] sm:$0xf0]  ;;  %1011 = vmatpush.bf16.msrb.mxu2 %v6346_v53  ;;  %v6526_v53 = vor.u32 %v9179_v42, %v6525_v40  ;;  %v6317_v40 = vld [vmem:[#allocation5 + $0x1e8] sm:$0xf] }
  0xe1   : > { %v6326_v63 = vor.u32 %v9130_v55, %v6325_v54  ;;  %v6381_v54 = vld [vmem:[#allocation5 + $0x268] sm:$0xf]  ;;  %v9143_v55 = vld [vmem:[#allocation5 + $0x274] sm:$0xf0] }
  0xe2   : > { %v410_v57 = vpack.c.bf16 %v400_v56, %v400_v56  ;;  %v6453_v56 = vld [vmem:[#allocation5 + $0x300] sm:$0xf]  ;;  %v9127_v42 = vld [vmem:[#allocation5 + $0x1f4] sm:$0xf0] }
  0xe3   : > { %986 = vmatpush.bf16.msrb.mxu0 %v6326_v63  ;;  %v9173_v63 = vld [vmem:[#allocation5 + $0x36c] sm:$0xf] }
  0xe4   : > { %6210 = vmatmul.msk.bf16.vlgmr.msra.gmra.mxu1 %vm435_vm1, %v410_v57  ;;  %v6474_v57 = vor.u32 %v9164_v49, %v6471_v50  ;;  %1012 = vmatpush.bf16.msrb.mxu2 %v6330_v1  ;;  %v6282_v50 = vor.u32 %v9116_v32, %v6279_v35  ;;  %v6382_v1 = vor.u32 %v9143_v55, %v6381_v54  ;;  %v6335_v35 = vld [vmem:[#allocation5 + $0x218] sm:$0xf0]  ;;  %v6429_v55 = vld [vmem:[#allocation5 + $0x2c8] sm:$0xf] }
  0xe5   : > { %v398_v58 = vpop.f32.mrf.mxu0 }
  0xe6   : > { %v9162_v58 = vld [vmem:[#allocation5 + $0x30c] sm:$0xf0]  ;;  %1024 = vmatpush.bf16.msrb.mxu3 %v6474_v57  ;;  %v6530_v57 = vor.u32 %v9177_v47, %v6527_v48  ;;  %v9125_v47 = vld [vmem:[#allocation5 + $0x1ec] sm:$0xf]  ;;  %v6319_v48 = vld [vmem:[#allocation5 + $0x1f8] sm:$0xf0] }
  0xe7   : > { %v6454_v0 = vor.u32 %v9162_v58, %v6453_v56  ;;  %987 = vmatpush.bf16.msrb.mxu0 %v6310_v11  ;;  %v6402_v56 = vor.u32 %v9145_v43, %v6399_v46  ;;  %v6509_v58 = vld [vmem:[#allocation5 + $0x368] sm:$0xf]  ;;  %v6367_v11 = vld [vmem:[#allocation5 + $0x258] sm:$0xf0] }
  0xe8   : > { %1013 = vmatpush.bf16.msrb.mxu2 %v6314_v13  ;;  %v6510_v2 = vor.u32 %v9175_v59, %v6509_v58  ;;  %v6370_v13 = vor.u32 %v9137_v10, %v6367_v11  ;;  %v6445_v43 = vld [vmem:[#allocation5 + $0x2e8] sm:$0xf]  ;;  %v6303_v59 = vld [vmem:[#allocation5 + $0x1d8] sm:$0xf0] }
  0xe9   : > { %999 = vmatpush.bf16.msrb.mxu1 %v6454_v0  ;;  %v6511_v0 = vld [vmem:[#allocation5 + $0x378] sm:$0xf0] }
  0xea   : > { %1025 = vmatpush.bf16.msrb.mxu3 %v6458_v5  ;;  %v6514_v4 = vor.u32 %v9173_v63, %v6511_v0  ;;  %v6365_v5 = vld [vmem:[#allocation5 + $0x248] sm:$0xf] }
  0xeb   : > { %988 = vmatpush.bf16.msrb.mxu0 %v6294_v24  ;;  %v6366_v8 = vor.u32 %v9139_v6, %v6365_v5  ;;  %v6285_v0 = vld [vmem:[#allocation5 + $0x1a8] sm:$0xf]  ;;  %v9117_v5 = vld [vmem:[#allocation5 + $0x1ac] sm:$0xf]  ;;  %v6287_v6 = vld [vmem:[#allocation5 + $0x1b8] sm:$0xf0] }
  0xec   : > { %1014 = vmatpush.bf16.msrb.mxu2 %v6298_v29  ;;  %v6333_v29 = vld [vmem:[#allocation5 + $0x208] sm:$0xf]  ;;  %v6290_v11 = vor.u32 %v9117_v5, %v6287_v6  ;;  %v9408_v5 = vld [vmem:[#allocation8 + $0x71c] sm:$0xf0] }
  0xed   : > { %1000 = vmatpush.bf16.msrb.mxu1 %v6438_v12  ;;  %v6494_v12 = vor.u32 %v9171_v9, %v6493_v7  ;;  %v6334_v32 = vor.u32 %v9131_v30, %v6333_v29  ;;  %v9149_v7 = vld [vmem:[#allocation5 + $0x2ac] sm:$0xf]  ;;  %v9432_v29 = vld [vmem:[#allocation8 + $0x7dc] sm:$0xf0] }
  0xee   : > { %1026 = vmatpush.bf16.msrb.mxu3 %v6442_v17  ;;  %v6349_v17 = vld [vmem:[#allocation5 + $0x228] sm:$0xf] }
  0xef   : > { %989 = vmatpush.bf16.msrb.mxu0 %v6278_v44  ;;  %v6350_v20 = vor.u32 %v9135_v18, %v6349_v17  ;;  %v9159_v44 = vld [vmem:[#allocation5 + $0x2f4] sm:$0xf0] }
  0xf0   : > { %1015 = vmatpush.bf16.msrb.mxu2 %v6282_v50  ;;  %v6446_v46 = vor.u32 %v9159_v44, %v6445_v43  ;;  %v6322_v50 = vor.u32 %v9125_v47, %v6319_v48  ;;  %v9424_v43 = vld [vmem:[#allocation8 + $0x79c] sm:$0xf0] }
  0xf1   : > { %1001 = vmatpush.bf16.msrb.mxu1 %v6422_v28  ;;  %v6693_v47 = vld [vmem:[#allocation8 + $0x140] sm:$0xf] }
  0xf2   : > { %1027 = vmatpush.bf16.msrb.mxu3 %v6426_v34  ;;  %v9129_v34 = vld [vmem:[#allocation5 + $0x20c] sm:$0xf]  ;;  %v9224_v48 = vld [vmem:[#allocation8 + $0x15c] sm:$0xf0] }
  0xf3   : > { %1034 = vmatpush.bf16.msra.mxu0 %v6398_v52  ;;  %v6338_v37 = vor.u32 %v9129_v34, %v6335_v35  ;;  %v6301_v52 = vld [vmem:[#allocation5 + $0x1c8] sm:$0xf]  ;;  %v9232_v34 = vld [vmem:[#allocation8 + $0x19c] sm:$0xf0]  ;;  %v7014_v35 = vor.u32 %v9304_v23, %v7013_v22 }
  0xf4   : > { %v6853_v22 = vld [vmem:[#allocation8 + $0x280] sm:$0xf] }
  0xf5   : > { %1002 = vmatpush.bf16.msrb.mxu1 %v6406_v45  ;;  %v6318_v45 = vor.u32 %v9127_v42, %v6317_v40  ;;  %v7493_v42 = vld [vmem:[#allocation8 + $0x780] sm:$0xf] }
  0xf6   : > { %1028 = vmatpush.bf16.msrb.mxu3 %v6410_v51  ;;  %v6447_v51 = vld [vmem:[#allocation5 + $0x2f8] sm:$0xf0]  ;;  %v9264_v23 = vld [vmem:[#allocation8 + $0x29c] sm:$0xf0] }
  0xf7   : > { %1035 = vmatpush.bf16.msra.mxu0 %v6382_v1  ;;  %v9119_v1 = vld [vmem:[#allocation5 + $0x1b4] sm:$0xf0] }
  0xf8   : > { %v6286_v9 = vor.u32 %v9119_v1, %v6285_v0  ;;  %v7173_v1 = vld [vmem:[#allocation8 + $0x500] sm:$0xf] }
  0xf9   : > { %1047 = vmatpush.bf16.msra.mxu1 %v6526_v53  ;;  %v9123_v53 = vld [vmem:[#allocation5 + $0x1d4] sm:$0xf0] }
  0xfa   : > { %v6302_v58 = vor.u32 %v9123_v53, %v6301_v52  ;;  %v7205_v53 = vld [vmem:[#allocation8 + $0x540] sm:$0xf] }
  0xfb   : > { %1036 = vmatpush.bf16.msra.mxu0 %v6366_v8  ;;  %v6415_v8 = vld [vmem:[#allocation5 + $0x2b8] sm:$0xf0] }
  0xfd   : > { %1048 = vmatpush.bf16.msra.mxu1 %v6510_v2  ;;  %v6413_v2 = vld [vmem:[#allocation5 + $0x2a8] sm:$0xf] }
  0xff   : > { %1037 = vmatpush.bf16.msra.mxu0 %v6350_v20  ;;  %v6757_v20 = vld [vmem:[#allocation8 + $0x1c0] sm:$0xf] }
 0x101   : > { %1049 = vmatpush.bf16.msra.mxu1 %v6494_v12  ;;  %v6418_v12 = vor.u32 %v9149_v7, %v6415_v8  ;;  %v6629_v7 = vld [vmem:[#allocation8 + $0xc0] sm:$0xf] }
 0x102   : > { %v9208_v8 = vld [vmem:[#allocation8 + $0xdc] sm:$0xf0] }
 0x103   : > { %1038 = vmatpush.bf16.msra.mxu0 %v6334_v32 }
 0x107   : > { %1039 = vmatpush.bf16.msra.mxu0 %v6318_v45 }
 0x10b   : > { %1040 = vmatpush.bf16.msra.mxu0 %v6302_v58  ;;  %v6694_v58 = vor.u32 %v9224_v48, %v6693_v47  ;;  %v6789_v47 = vld [vmem:[#allocation8 + $0x200] sm:$0xf] }
 0x10c   : > { %v9248_v48 = vld [vmem:[#allocation8 + $0x21c] sm:$0xf0] }
 0x10f   : > { %1041 = vmatpush.bf16.msra.mxu0 %v6286_v9 }
 0x161   : > { %v448_v27 = vpop.f32.mrf.mxu1 }
 0x162   : > { %v449_v33 = vadd.f32 %v448_v27, %v409_v21  ;;  %v9167_v21 = vld [vmem:[#allocation5 + $0x334] sm:$0xf0]  ;;  %v6479_v27 = vld [vmem:[#allocation5 + $0x338] sm:$0xf0] }
 0x163   : > { %v6478_v24 = vor.u32 %v9167_v21, %v6477_v19  ;;  %v6482_v28 = vor.u32 %v9165_v26, %v6479_v27  ;;  %v9240_v21 = vld [vmem:[#allocation8 + $0x1dc] sm:$0xf0] }
 0x164   : > { %v452_v41 = vmax.f32 %v449_v33, 0.0  ;;  %v9163_v33 = vld [vmem:[#allocation5 + $0x314] sm:$0xf0]  ;;  %v6758_v32 = vor.u32 %v9240_v21, %v6757_v20  ;;  %v9200_v20 = vld [vmem:[#allocation8 + $0x9c] sm:$0xf0] }
 0x165   : > { %1050 = vmatpush.bf16.msra.mxu1 %v6478_v24  ;;  %v6462_v36 = vor.u32 %v9163_v33, %v6461_v31  ;;  %v7269_v24 = vld [vmem:[#allocation8 + $0x5c0] sm:$0xf] }
 0x166   : > { %v471_v49 = vpack.c.bf16 %v452_v41, %v452_v41  ;;  %v6466_v41 = vor.u32 %v9161_v38, %v6463_v39  ;;  %v6725_v33 = vld [vmem:[#allocation8 + $0x180] sm:$0xf] }
 0x167   : > { %v7237_v39 = vld [vmem:[#allocation8 + $0x580] sm:$0xf] }
 0x168   : > { %565 = vmatmul.bf16.vlgmr.msra.gmra.mxu2 %v471_v49  ;;  %578 = vmatmul.bf16.vlgmr.msra.gmra.mxu3 %v471_v49  ;;  %v9157_v49 = vld [vmem:[#allocation5 + $0x2ec] sm:$0xf] }
 0x169   : > { %v450_v61 = vpop.f32.mrf.mxu1  ;;  %1060 = vmatpush.bf16.msra.mxu2 %v6402_v56  ;;  %1073 = vmatpush.bf16.msra.mxu3 %v6530_v57  ;;  %v6450_v54 = vor.u32 %v9157_v49, %v6447_v51  ;;  %v9155_v56 = vld [vmem:[#allocation5 + $0x2d4] sm:$0xf0]  ;;  %v9121_v57 = vld [vmem:[#allocation5 + $0x1cc] sm:$0xf]  ;;  %v9288_v51 = vld [vmem:[#allocation8 + $0x35c] sm:$0xf0] }
 0x16a   : > { %1051 = vmatpush.bf16.msra.mxu1 %v6462_v36  ;;  %v6431_v61 = vld [vmem:[#allocation5 + $0x2d8] sm:$0xf0]  ;;  %v6430_v62 = vor.u32 %v9155_v56, %v6429_v55  ;;  %v6306_v63 = vor.u32 %v9121_v57, %v6303_v59  ;;  %v6981_v36 = vld [vmem:[#allocation8 + $0x380] sm:$0xf] }
 0x16b   : > { %v9352_v55 = vld [vmem:[#allocation8 + $0x55c] sm:$0xf0] }
 0x16c   : > { %v7461_v56 = vld [vmem:[#allocation8 + $0x740] sm:$0xf]  ;;  %v7206_v0 = vor.u32 %v9352_v55, %v7205_v53  ;;  %v7015_v53 = vld [vmem:[#allocation8 + $0x3e0] sm:$0xf0] }
 0x16d   : > { %1061 = vmatpush.bf16.msra.mxu2 %v6386_v3  ;;  %1074 = vmatpush.bf16.msra.mxu3 %v6514_v4  ;;  %v6434_v3 = vor.u32 %v9153_v60, %v6431_v61  ;;  %v9151_v4 = vld [vmem:[#allocation5 + $0x2b4] sm:$0xf0]  ;;  %v9416_v57 = vld [vmem:[#allocation8 + $0x75c] sm:$0xf0] }
 0x16e   : > { %1052 = vmatpush.bf16.msra.mxu1 %v6446_v46  ;;  %v6414_v10 = vor.u32 %v9151_v4, %v6413_v2  ;;  %v6726_v46 = vor.u32 %v9232_v34, %v6725_v33  ;;  %v6661_v59 = vld [vmem:[#allocation8 + $0x100] sm:$0xf]  ;;  %v7462_v2 = vor.u32 %v9416_v57, %v7461_v56  ;;  %v6790_v57 = vor.u32 %v9248_v48, %v6789_v47  ;;  %v9180_v48 = vld [vmem:[#allocation8 + $0x4] sm:$0xf] }
 0x16f   : > { %v9216_v60 = vld [vmem:[#allocation8 + $0x11c] sm:$0xf0] }
 0x170   : > { %v7429_v4 = vld [vmem:[#allocation8 + $0x700] sm:$0xf]  ;;  %v6662_v6 = vor.u32 %v9216_v60, %v6661_v59  ;;  %v7271_v59 = vld [vmem:[#allocation8 + $0x5e0] sm:$0xf0] }
 0x171   : > { %1062 = vmatpush.bf16.msra.mxu2 %v6370_v13  ;;  %1075 = vmatpush.bf16.msra.mxu3 %v6498_v16  ;;  %v470_v13 = vld [vmem:[#allocation7 + $0x2] ss:$8 sm:$0x3] }
 0x172   : > { %1053 = vmatpush.bf16.msra.mxu1 %v6430_v62  ;;  %v473_v14 = vperm.slane %v470_v13, 0  ;;  %v474_v15 = vperm.slane %v470_v13, 1  ;;  %v6917_v62 = vld [vmem:[#allocation8 + $0x300] sm:$0xf] }
 0x173   : > { %v7141_v13 = vld [vmem:[#allocation8 + $0x4c0] sm:$0xf] }
 0x174   : > { %v6565_v33 = vld [vmem:[#allocation8 + $0x40] sm:$0xf] }
 0x175   : > { %1063 = vmatpush.bf16.msra.mxu2 %v6354_v25  ;;  %1076 = vmatpush.bf16.msra.mxu3 %v6482_v28  ;;  %v9368_v25 = vld [vmem:[#allocation8 + $0x5dc] sm:$0xf0] }
 0x176   : > { %1054 = vmatpush.bf16.msra.mxu1 %v6414_v10  ;;  %v7525_v28 = vld [vmem:[#allocation8 + $0x7c0] sm:$0xf]  ;;  %v7270_v38 = vor.u32 %v9368_v25, %v7269_v24 }
 0x177   : > { %v7526_v40 = vor.u32 %v9432_v29, %v7525_v28  ;;  %v6885_v10 = vld [vmem:[#allocation8 + $0x2c0] sm:$0xf] }
 0x178   : > { %v7109_v25 = vld [vmem:[#allocation8 + $0x480] sm:$0xf] }
 0x179   : > { %1064 = vmatpush.bf16.msra.mxu2 %v6338_v37  ;;  %1077 = vmatpush.bf16.msra.mxu3 %v6466_v41  ;;  %v9296_v37 = vld [vmem:[#allocation8 + $0x39c] sm:$0xf0] }
 0x17a   : > { %v9360_v41 = vld [vmem:[#allocation8 + $0x59c] sm:$0xf0]  ;;  %v6982_v49 = vor.u32 %v9296_v37, %v6981_v36 }
 0x17b   : > { %v7238_v52 = vor.u32 %v9360_v41, %v7237_v39  ;;  %v7365_v28 = vld [vmem:[#allocation8 + $0x680] sm:$0xf] }
 0x17c   : > { %v9392_v29 = vld [vmem:[#allocation8 + $0x69c] sm:$0xf0] }
 0x17d   : > { %1065 = vmatpush.bf16.msra.mxu2 %v6322_v50  ;;  %1078 = vmatpush.bf16.msra.mxu3 %v6450_v54  ;;  %v6949_v50 = vld [vmem:[#allocation8 + $0x340] sm:$0xf]  ;;  %v7494_v54 = vor.u32 %v9424_v43, %v7493_v42 }
 0x17e   : > { %v6950_v61 = vor.u32 %v9288_v51, %v6949_v50  ;;  %v9192_v34 = vld [vmem:[#allocation8 + $0x5c] sm:$0xf0]  ;;  %v6759_v51 = vld [vmem:[#allocation8 + $0x1e0] sm:$0xf0] }
 0x17f   : > { %v6821_v36 = vld [vmem:[#allocation8 + $0x240] sm:$0xf] }
 0x180   : > { %v9256_v37 = vld [vmem:[#allocation8 + $0x25c] sm:$0xf0] }
 0x181   : > { %1066 = vmatpush.bf16.msra.mxu2 %v6306_v63  ;;  %1079 = vmatpush.bf16.msra.mxu3 %v6434_v3  ;;  %v9280_v63 = vld [vmem:[#allocation8 + $0x31c] sm:$0xf0] }
 0x182   : > { %v9344_v3 = vld [vmem:[#allocation8 + $0x51c] sm:$0xf0]  ;;  %v6918_v9 = vor.u32 %v9280_v63, %v6917_v62  ;;  %v6727_v63 = vld [vmem:[#allocation8 + $0x1a0] sm:$0xf0] }
 0x183   : > { %v7077_v39 = vld [vmem:[#allocation8 + $0x440] sm:$0xf] }
 0x184   : > { %v9320_v41 = vld [vmem:[#allocation8 + $0x45c] sm:$0xf0] }
 0x185   : > { %1067 = vmatpush.bf16.msra.mxu2 %v6290_v11  ;;  %1080 = vmatpush.bf16.msra.mxu3 %v6418_v12  ;;  %v9272_v11 = vld [vmem:[#allocation8 + $0x2dc] sm:$0xf0]  ;;  %v7174_v12 = vor.u32 %v9344_v3, %v7173_v1  ;;  %v6983_v1 = vld [vmem:[#allocation8 + $0x3a0] sm:$0xf0] }
 0x186   : > { %v6886_v21 = vor.u32 %v9272_v11, %v6885_v10  ;;  %v7333_v42 = vld [vmem:[#allocation8 + $0x640] sm:$0xf]  ;;  %v9212_v11 = vld [vmem:[#allocation8 + $0x104] sm:$0xf] }
 0x187   : > { %v9384_v43 = vld [vmem:[#allocation8 + $0x65c] sm:$0xf0] }
 0x188   : > { %v7334_v50 = vor.u32 %v9384_v43, %v7333_v42  ;;  %v9312_v55 = vld [vmem:[#allocation8 + $0x41c] sm:$0xf0]  ;;  %v7207_v42 = vld [vmem:[#allocation8 + $0x560] sm:$0xf0] }
 0x1eb   : > { %v566_v16 = vpop.f32.mrf.mxu2  ;;  %v579_v17 = vpop.f32.mrf.mxu3 }
 0x1ec   : > { %v567_v18 = vadd.f32 %v566_v16, %v473_v14  ;;  %v580_v19 = vadd.f32 %v579_v17, %v474_v15  ;;  %v7430_v14 = vor.u32 %v9408_v5, %v7429_v4  ;;  %v9336_v15 = vld [vmem:[#allocation8 + $0x4dc] sm:$0xf0]  ;;  %v9220_v5 = vld [vmem:[#allocation8 + $0x144] sm:$0xf] }
 0x1ed   : > { %v7397_v16 = vld [vmem:[#allocation8 + $0x6c0] sm:$0xf]  ;;  %v7142_v24 = vor.u32 %v9336_v15, %v7141_v13  ;;  %v6663_v13 = vld [vmem:[#allocation8 + $0x120] sm:$0xf0] }
 0x1ee   : > { %v583_v26 = vmax.f32 %v567_v18, 0.0  ;;  %v584_v27 = vmax.f32 %v580_v19, 0.0  ;;  %v9400_v17 = vld [vmem:[#allocation8 + $0x6dc] sm:$0xf0]  ;;  %v6630_v18 = vor.u32 %v9208_v8, %v6629_v7  ;;  %v6695_v7 = vld [vmem:[#allocation8 + $0x160] sm:$0xf0] }
 0x1ef   : > { %v6597_v19 = vld [vmem:[#allocation8 + $0x80] sm:$0xf]  ;;  %v9284_v8 = vld [vmem:[#allocation8 + $0x344] sm:$0xf]  ;;  %v6698_v10 = vor.u32 %v9220_v5, %v6695_v7 }
 0x1f0   : > { %v10399_v30 = vpack.c.bf16 %v583_v26, %v583_v26  ;;  %v10401_v31 = vpack.c.bf16 %v584_v27, %v584_v27  ;;  %v7398_v26 = vor.u32 %v9400_v17, %v7397_v16  ;;  %v9328_v27 = vld [vmem:[#allocation8 + $0x49c] sm:$0xf0]  ;;  %v6919_v15 = vld [vmem:[#allocation8 + $0x320] sm:$0xf0]  ;;  %v6666_v16 = vor.u32 %v9212_v11, %v6663_v13 }
 0x1f1   : > { %v9324_v5 = vld [vmem:[#allocation8 + $0x484] sm:$0xf] }
 0x1f2   : > { %990 = vmatmul.bf16.vlgmr.msrb.gmra.mxu0 %v10399_v30  ;;  %1003 = vmatmul.bf16.vlgmr.msrb.gmra.mxu1 %v10401_v31  ;;  %v9316_v11 = vld [vmem:[#allocation8 + $0x444] sm:$0xf] }
 0x1f3   : > { %1016 = vmatmul.bf16.vlgmr.msrb.gmra.mxu2 %v10399_v30  ;;  %1029 = vmatmul.bf16.vlgmr.msrb.gmra.mxu3 %v10401_v31  ;;  %v568_v44 = vpop.f32.mrf.mxu2  ;;  %v581_v45 = vpop.f32.mrf.mxu3 }
 0x1f4   : > { %2651 = vmatpush.bf16.msrb.mxu0 %v6758_v32  ;;  %2664 = vmatpush.bf16.msrb.mxu1 %v7014_v35  ;;  %v6598_v32 = vor.u32 %v9200_v20, %v6597_v19  ;;  %v6854_v35 = vor.u32 %v9264_v23, %v6853_v22  ;;  %v9184_v44 = vld [vmem:[#allocation8 + $0x1c] sm:$0xf0]  ;;  %v6822_v45 = vor.u32 %v9256_v37, %v6821_v36  ;;  %v6631_v19 = vld [vmem:[#allocation8 + $0xe0] sm:$0xf0] }
 0x1f5   : > { %2677 = vmatpush.bf16.msrb.mxu2 %v7270_v38  ;;  %2690 = vmatpush.bf16.msrb.mxu3 %v7526_v40  ;;  %v7110_v38 = vor.u32 %v9328_v27, %v7109_v25  ;;  %v7366_v40 = vor.u32 %v9392_v29, %v7365_v28  ;;  %v6599_v22 = vld [vmem:[#allocation8 + $0xa0] sm:$0xf0]  ;;  %v9376_v27 = vld [vmem:[#allocation8 + $0x61c] sm:$0xf0] }
 0x1f6   : > { %v9356_v23 = vld [vmem:[#allocation8 + $0x584] sm:$0xf] }
 0x1f7   : > { %v7239_v25 = vld [vmem:[#allocation8 + $0x5a0] sm:$0xf0] }
 0x1f8   : > { %2652 = vmatpush.bf16.msrb.mxu0 %v6726_v46  ;;  %2665 = vmatpush.bf16.msrb.mxu1 %v6982_v49  ;;  %v9236_v46 = vld [vmem:[#allocation8 + $0x1c4] sm:$0xf]  ;;  %v7078_v49 = vor.u32 %v9320_v41, %v7077_v39  ;;  %v7242_v28 = vor.u32 %v9356_v23, %v7239_v25 }
 0x1f9   : > { %2678 = vmatpush.bf16.msrb.mxu2 %v7238_v52  ;;  %2691 = vmatpush.bf16.msrb.mxu3 %v7494_v54  ;;  %v9300_v52 = vld [vmem:[#allocation8 + $0x3c4] sm:$0xf]  ;;  %v7045_v54 = vld [vmem:[#allocation8 + $0x400] sm:$0xf]  ;;  %v6762_v60 = vor.u32 %v9236_v46, %v6759_v51 }
 0x1fa   : > { %v7018_v62 = vor.u32 %v9300_v52, %v7015_v53  ;;  %v7527_v36 = vld [vmem:[#allocation8 + $0x7e0] sm:$0xf0] }
 0x1fb   : > { %v6567_v39 = vld [vmem:[#allocation8 + $0x60] sm:$0xf0] }
 0x1fc   : > { %2653 = vmatpush.bf16.msrb.mxu0 %v6694_v58  ;;  %2666 = vmatpush.bf16.msrb.mxu1 %v6950_v61  ;;  %v9364_v58 = vld [vmem:[#allocation8 + $0x5c4] sm:$0xf] }
 0x1fd   : > { %2679 = vmatpush.bf16.msrb.mxu2 %v7206_v0  ;;  %2692 = vmatpush.bf16.msrb.mxu3 %v7462_v2  ;;  %v9228_v61 = vld [vmem:[#allocation8 + $0x184] sm:$0xf]  ;;  %v7046_v2 = vor.u32 %v9312_v55, %v7045_v54  ;;  %v7274_v3 = vor.u32 %v9364_v58, %v7271_v59 }
 0x1fe   : > { %v9292_v0 = vld [vmem:[#allocation8 + $0x384] sm:$0xf]  ;;  %v6730_v4 = vor.u32 %v9228_v61, %v6727_v63 }
 0x1ff   : > { %v7495_v46 = vld [vmem:[#allocation8 + $0x7a0] sm:$0xf0] }
 0x200   : > { %2654 = vmatpush.bf16.msrb.mxu0 %v6662_v6  ;;  %2667 = vmatpush.bf16.msrb.mxu1 %v6918_v9  ;;  %v6986_v6 = vor.u32 %v9292_v0, %v6983_v1  ;;  %v6951_v9 = vld [vmem:[#allocation8 + $0x360] sm:$0xf0] }
 0x201   : > { %2680 = vmatpush.bf16.msrb.mxu2 %v7174_v12  ;;  %2693 = vmatpush.bf16.msrb.mxu3 %v7430_v14  ;;  %v6954_v12 = vor.u32 %v9284_v8, %v6951_v9  ;;  %v9276_v14 = vld [vmem:[#allocation8 + $0x304] sm:$0xf] }
 0x202   : > { %1042 = vmatmul.bf16.vlgmr.msra.gmra.mxu0 %v10399_v30  ;;  %1055 = vmatmul.bf16.vlgmr.msra.gmra.mxu1 %v10401_v31  ;;  %v6922_v17 = vor.u32 %v9276_v14, %v6919_v15  ;;  %v9340_v51 = vld [vmem:[#allocation8 + $0x504] sm:$0xf] }
 0x203   : > { %1068 = vmatmul.bf16.vlgmr.msra.gmra.mxu2 %v10399_v30  ;;  %1081 = vmatmul.bf16.vlgmr.msra.gmra.mxu3 %v10401_v31  ;;  %v6566_v30 = vor.u32 %v9192_v34, %v6565_v33  ;;  %v6533_v31 = vld [vmem:[#allocation8] sm:$0xf]  ;;  %v6887_v33 = vld [vmem:[#allocation8 + $0x2e0] sm:$0xf0] }
 0x204   : > { %2655 = vmatpush.bf16.msrb.mxu0 %v6630_v18  ;;  %2668 = vmatpush.bf16.msrb.mxu1 %v6886_v21  ;;  %v6534_v56 = vor.u32 %v9184_v44, %v6533_v31  ;;  %v9204_v18 = vld [vmem:[#allocation8 + $0xc4] sm:$0xf] }
 0x205   : > { %2681 = vmatpush.bf16.msrb.mxu2 %v7142_v24  ;;  %2694 = vmatpush.bf16.msrb.mxu3 %v7398_v26  ;;  %v6634_v20 = vor.u32 %v9204_v18, %v6631_v19  ;;  %v9196_v21 = vld [vmem:[#allocation8 + $0x84] sm:$0xf]  ;;  %v7301_v26 = vld [vmem:[#allocation8 + $0x600] sm:$0xf] }
 0x206   : > { %v6602_v24 = vor.u32 %v9196_v21, %v6599_v22  ;;  %v7302_v29 = vor.u32 %v9376_v27, %v7301_v26  ;;  %v9428_v34 = vld [vmem:[#allocation8 + $0x7c4] sm:$0xf]  ;;  %v10411_v22 = vld [vmem:[#allocation7 + $0x3] ss:$8 sm:$0xf] }
 0x207   : > { %v7530_v37 = vor.u32 %v9428_v34, %v7527_v36  ;;  %v6855_v31 = vld [vmem:[#allocation8 + $0x2a0] sm:$0xf0]  ;;  %v6765_v34 = vld [vmem:[#allocation8 + $0x1c8] sm:$0xf]  ;;  %v655_v36 = vperm.slane %v10411_v22, 1 }
 0x208   : > { %2656 = vmatpush.bf16.msrb.mxu0 %v6598_v32  ;;  %2669 = vmatpush.bf16.msrb.mxu1 %v6854_v35  ;;  %v9268_v32 = vld [vmem:[#allocation8 + $0x2c4] sm:$0xf] }
 0x209   : > { %2682 = vmatpush.bf16.msrb.mxu2 %v7110_v38  ;;  %2695 = vmatpush.bf16.msrb.mxu3 %v7366_v40  ;;  %v6890_v35 = vor.u32 %v9268_v32, %v6887_v33  ;;  %v9188_v38 = vld [vmem:[#allocation8 + $0x44] sm:$0xf] }
 0x20a   : > { %v9348_v40 = vld [vmem:[#allocation8 + $0x544] sm:$0xf]  ;;  %v6570_v41 = vor.u32 %v9188_v38, %v6567_v39 }
 0x20b   : > { %v7210_v43 = vor.u32 %v9348_v40, %v7207_v42  ;;  %v9420_v44 = vld [vmem:[#allocation8 + $0x784] sm:$0xf]  ;;  %v6733_v42 = vld [vmem:[#allocation8 + $0x188] sm:$0xf] }
 0x20c   : > { %2657 = vmatpush.bf16.msrb.mxu0 %v6566_v30  ;;  %2670 = vmatpush.bf16.msrb.mxu1 %v6822_v45  ;;  %v9260_v30 = vld [vmem:[#allocation8 + $0x284] sm:$0xf]  ;;  %v7498_v47 = vor.u32 %v9420_v44, %v7495_v46 }
 0x20d   : > { %2683 = vmatpush.bf16.msrb.mxu2 %v7078_v49  ;;  %2696 = vmatpush.bf16.msrb.mxu3 %v7334_v50  ;;  %v6858_v45 = vor.u32 %v9260_v30, %v6855_v31  ;;  %v6535_v49 = vld [vmem:[#allocation8 + $0x20] sm:$0xf0] }
 0x20e   : > { %v6538_v50 = vor.u32 %v9180_v48, %v6535_v49  ;;  %v7175_v52 = vld [vmem:[#allocation8 + $0x520] sm:$0xf0]  ;;  %v9305_v48 = vld [vmem:[#allocation8 + $0x3e4] sm:$0xf0] }
 0x20f   : > { %v7178_v53 = vor.u32 %v9340_v51, %v7175_v52  ;;  %v9252_v54 = vld [vmem:[#allocation8 + $0x244] sm:$0xf]  ;;  %v6701_v49 = vld [vmem:[#allocation8 + $0x148] sm:$0xf] }
 0x210   : > { %2658 = vmatpush.bf16.msrb.mxu0 %v6534_v56  ;;  %2671 = vmatpush.bf16.msrb.mxu1 %v6790_v57  ;;  %v6823_v55 = vld [vmem:[#allocation8 + $0x260] sm:$0xf0] }
 0x211   : > { %2684 = vmatpush.bf16.msrb.mxu2 %v7046_v2  ;;  %2697 = vmatpush.bf16.msrb.mxu3 %v7302_v29  ;;  %v6826_v56 = vor.u32 %v9252_v54, %v6823_v55  ;;  %v9412_v57 = vld [vmem:[#allocation8 + $0x744] sm:$0xf] }
 0x212   : > { %v7463_v58 = vld [vmem:[#allocation8 + $0x760] sm:$0xf0] }
 0x213   : > { %v7466_v59 = vor.u32 %v9412_v57, %v7463_v58  ;;  %v7143_v61 = vld [vmem:[#allocation8 + $0x4e0] sm:$0xf0]  ;;  %v9297_v57 = vld [vmem:[#allocation8 + $0x3a4] sm:$0xf0] }
 0x214   : > { %2703 = vmatpush.bf16.msra.mxu0 %v6762_v60  ;;  %2716 = vmatpush.bf16.msra.mxu1 %v7018_v62  ;;  %v9332_v60 = vld [vmem:[#allocation8 + $0x4c4] sm:$0xf] }
 0x215   : > { %2729 = vmatpush.bf16.msra.mxu2 %v7274_v3  ;;  %2742 = vmatpush.bf16.msra.mxu3 %v7530_v37  ;;  %v7146_v62 = vor.u32 %v9332_v60, %v7143_v61  ;;  %v9244_v63 = vld [vmem:[#allocation8 + $0x204] sm:$0xf]  ;;  %v6669_v60 = vld [vmem:[#allocation8 + $0x108] sm:$0xf] }
 0x216   : > { %v6791_v0 = vld [vmem:[#allocation8 + $0x220] sm:$0xf0]  ;;  %v9217_v61 = vld [vmem:[#allocation8 + $0x124] sm:$0xf0] }
 0x217   : > { %v9404_v1 = vld [vmem:[#allocation8 + $0x704] sm:$0xf]  ;;  %v6794_v2 = vor.u32 %v9244_v63, %v6791_v0 }
 0x218   : > { %2704 = vmatpush.bf16.msra.mxu0 %v6730_v4  ;;  %2717 = vmatpush.bf16.msra.mxu1 %v6986_v6  ;;  %v7431_v3 = vld [vmem:[#allocation8 + $0x720] sm:$0xf0] }
 0x219   : > { %2730 = vmatpush.bf16.msra.mxu2 %v7242_v28  ;;  %2743 = vmatpush.bf16.msra.mxu3 %v7498_v47  ;;  %v7434_v4 = vor.u32 %v9404_v1, %v7431_v3  ;;  %v7111_v6 = vld [vmem:[#allocation8 + $0x4a0] sm:$0xf0]  ;;  %v7021_v47 = vld [vmem:[#allocation8 + $0x3c8] sm:$0xf] }
 0x21a   : > { %v7114_v7 = vor.u32 %v9324_v5, %v7111_v6  ;;  %v9396_v8 = vld [vmem:[#allocation8 + $0x6c4] sm:$0xf]  ;;  %v7022_v52 = vor.u32 %v9305_v48, %v7021_v47  ;;  %v6957_v3 = vld [vmem:[#allocation8 + $0x348] sm:$0xf] }
 0x21b   : > { %v7399_v9 = vld [vmem:[#allocation8 + $0x6e0] sm:$0xf0]  ;;  %v7277_v6 = vld [vmem:[#allocation8 + $0x5c8] sm:$0xf] }
 0x21c   : > { %2705 = vmatpush.bf16.msra.mxu0 %v6698_v10  ;;  %2718 = vmatpush.bf16.msra.mxu1 %v6954_v12  ;;  %v7402_v10 = vor.u32 %v9396_v8, %v7399_v9  ;;  %v7079_v12 = vld [vmem:[#allocation8 + $0x460] sm:$0xf0]  ;;  %v657_v8 = vperm.slane %v10411_v22, 3  ;;  %v6637_v9 = vld [vmem:[#allocation8 + $0xc8] sm:$0xf] }
 0x21d   : > { %2731 = vmatpush.bf16.msra.mxu2 %v7210_v43  ;;  %2744 = vmatpush.bf16.msra.mxu3 %v7466_v59  ;;  %v7082_v13 = vor.u32 %v9316_v11, %v7079_v12  ;;  %v9388_v14 = vld [vmem:[#allocation8 + $0x684] sm:$0xf]  ;;  %v9233_v43 = vld [vmem:[#allocation8 + $0x1a4] sm:$0xf0] }
 0x21e   : > { %v7367_v15 = vld [vmem:[#allocation8 + $0x6a0] sm:$0xf0]  ;;  %v6734_v46 = vor.u32 %v9233_v43, %v6733_v42  ;;  %v9193_v42 = vld [vmem:[#allocation8 + $0x64] sm:$0xf0] }
 0x21f   : > { %v7047_v18 = vld [vmem:[#allocation8 + $0x420] sm:$0xf0]  ;;  %v7501_v47 = vld [vmem:[#allocation8 + $0x788] sm:$0xf] }
 0x220   : > { %2706 = vmatpush.bf16.msra.mxu0 %v6666_v16  ;;  %2719 = vmatpush.bf16.msra.mxu1 %v6922_v17  ;;  %v7370_v16 = vor.u32 %v9388_v14, %v7367_v15  ;;  %v9308_v17 = vld [vmem:[#allocation8 + $0x404] sm:$0xf]  ;;  %v6925_v14 = vld [vmem:[#allocation8 + $0x308] sm:$0xf] }
 0x221   : > { %2732 = vmatpush.bf16.msra.mxu2 %v7178_v53  ;;  %2745 = vmatpush.bf16.msra.mxu3 %v7434_v4  ;;  %v7050_v19 = vor.u32 %v9308_v17, %v7047_v18  ;;  %v7335_v21 = vld [vmem:[#allocation8 + $0x660] sm:$0xf0]  ;;  %v656_v53 = vperm.slane %v10411_v22, 2  ;;  %v9289_v4 = vld [vmem:[#allocation8 + $0x364] sm:$0xf0] }
 0x222   : > { %v9372_v25 = vld [vmem:[#allocation8 + $0x604] sm:$0xf]  ;;  %v6958_v12 = vor.u32 %v9289_v4, %v6957_v3  ;;  %v9281_v15 = vld [vmem:[#allocation8 + $0x324] sm:$0xf0] }
 0x223   : > { %v7303_v26 = vld [vmem:[#allocation8 + $0x620] sm:$0xf0]  ;;  %v9425_v48 = vld [vmem:[#allocation8 + $0x7a4] sm:$0xf0] }
 0x224   : > { %2707 = vmatpush.bf16.msra.mxu0 %v6634_v20  ;;  %2720 = vmatpush.bf16.msra.mxu1 %v6890_v35  ;;  %v9380_v20 = vld [vmem:[#allocation8 + $0x644] sm:$0xf]  ;;  %v7306_v27 = vor.u32 %v9372_v25, %v7303_v26  ;;  %v9241_v35 = vld [vmem:[#allocation8 + $0x1e4] sm:$0xf0] }
 0x225   : > { %2733 = vmatpush.bf16.msra.mxu2 %v7146_v62  ;;  %2746 = vmatpush.bf16.msra.mxu3 %v7402_v10  ;;  %v7338_v23 = vor.u32 %v9380_v20, %v7335_v21  ;;  %v6766_v38 = vor.u32 %v9241_v35, %v6765_v34  ;;  %v9209_v10 = vld [vmem:[#allocation8 + $0xe4] sm:$0xf0] }
 0x226   : > { %v7245_v20 = vld [vmem:[#allocation8 + $0x588] sm:$0xf] }
 0x227   : > { %v9361_v21 = vld [vmem:[#allocation8 + $0x5a4] sm:$0xf0] }
 0x228   : > { %2708 = vmatpush.bf16.msra.mxu0 %v6602_v24  ;;  %2721 = vmatpush.bf16.msra.mxu1 %v6858_v45  ;;  %v654_v24 = vperm.slane %v10411_v22, 0  ;;  %v6605_v22 = vld [vmem:[#allocation8 + $0x88] sm:$0xf] }
 0x229   : > { %2734 = vmatpush.bf16.msra.mxu2 %v7114_v7  ;;  %2747 = vmatpush.bf16.msra.mxu3 %v7370_v16  ;;  %v9369_v7 = vld [vmem:[#allocation8 + $0x5e4] sm:$0xf0] }
 0x22a   : > { %v9201_v26 = vld [vmem:[#allocation8 + $0xa4] sm:$0xf0] }
 0x22b   : > { %v7533_v34 = vld [vmem:[#allocation8 + $0x7c8] sm:$0xf] }
 0x22c   : > { %2709 = vmatpush.bf16.msra.mxu0 %v6570_v41  ;;  %2722 = vmatpush.bf16.msra.mxu1 %v6826_v56  ;;  %v6989_v56 = vld [vmem:[#allocation8 + $0x388] sm:$0xf] }
 0x22d   : > { %2735 = vmatpush.bf16.msra.mxu2 %v7082_v13  ;;  %2748 = vmatpush.bf16.msra.mxu3 %v7338_v23  ;;  %v6990_v1 = vor.u32 %v9297_v57, %v6989_v56  ;;  %v7278_v13 = vor.u32 %v9369_v7, %v7277_v6  ;;  %v9433_v35 = vld [vmem:[#allocation8 + $0x7e4] sm:$0xf0] }
 0x22e   : > { %v9185_v56 = vld [vmem:[#allocation8 + $0x24] sm:$0xf0] }
 0x22f   : > { %v7149_v4 = vld [vmem:[#allocation8 + $0x4c8] sm:$0xf] }
 0x230   : > { %2710 = vmatpush.bf16.msra.mxu0 %v6538_v50  ;;  %2723 = vmatpush.bf16.msra.mxu1 %v6794_v2  ;;  %v9225_v50 = vld [vmem:[#allocation8 + $0x164] sm:$0xf0]  ;;  %v6670_v2 = vor.u32 %v9217_v61, %v6669_v60  ;;  %v6767_v60 = vld [vmem:[#allocation8 + $0x1e8] sm:$0xf0] }
 0x231   : > { %2736 = vmatpush.bf16.msra.mxu2 %v7050_v19  ;;  %2749 = vmatpush.bf16.msra.mxu3 %v7306_v27  ;;  %v6702_v55 = vor.u32 %v9225_v50, %v6701_v49  ;;  %v6638_v19 = vor.u32 %v9209_v10, %v6637_v9  ;;  %v6926_v27 = vor.u32 %v9281_v15, %v6925_v14  ;;  %v6829_v61 = vld [vmem:[#allocation8 + $0x248] sm:$0xf]  ;;  %v6735_v9 = vld [vmem:[#allocation8 + $0x1a8] sm:$0xf0] }
 0x232   : > { %v6797_v10 = vld [vmem:[#allocation8 + $0x208] sm:$0xf]  ;;  %v9301_v15 = vld [vmem:[#allocation8 + $0x3cc] sm:$0xf] }
 0x26f   : > { %v991_v28 = vpop.f32.mrf.mxu0  ;;  %v1004_v29 = vpop.f32.mrf.mxu1 }
 0x270   : > { %v992_v32 = vadd.f32 %v991_v28, %v654_v24  ;;  %v6893_v28 = vld [vmem:[#allocation8 + $0x2c8] sm:$0xf] }
 0x272   : > { %v1005_v33 = vadd.f32 %v1004_v29, %v992_v32  ;;  %v7246_v32 = vor.u32 %v9361_v21, %v7245_v20  ;;  %v9329_v20 = vld [vmem:[#allocation8 + $0x4a4] sm:$0xf0] }
 0x274   : > { %v1086_v37 = vmax.f32 %v1005_v33, 0.0  ;;  %v9273_v33 = vld [vmem:[#allocation8 + $0x2e4] sm:$0xf0] }
 0x275   : > { %v6894_v43 = vor.u32 %v9273_v33, %v6893_v28 }
 0x276   : > { %v10415_v39 = vpack.c.bf16 %v1086_v37, %v1086_v37  ;;  %v1017_v40 = vpop.f32.mrf.mxu2  ;;  %v1030_v41 = vpop.f32.mrf.mxu3  ;;  %v7213_v37 = vld [vmem:[#allocation8 + $0x548] sm:$0xf] }
 0x277   : > { %v1018_v30 = vadd.f32 %v1017_v40, %v655_v36  ;;  %v993_v31 = vpop.f32.mrf.mxu0  ;;  %v1006_v44 = vpop.f32.mrf.mxu1  ;;  %v6606_v36 = vor.u32 %v9201_v26, %v6605_v22  ;;  %v7405_v26 = vld [vmem:[#allocation8 + $0x6c8] sm:$0xf] }
 0x278   : > { %2659 = vmatmul.bf16.vlgmr.msrb.gmra.mxu0 %v10415_v39  ;;  %v6861_v31 = vld [vmem:[#allocation8 + $0x288] sm:$0xf] }
 0x279   : > { %v1031_v45 = vadd.f32 %v1030_v41, %v1018_v30  ;;  %2755 = vmatpush.bf16.msrb.mxu0 %v6766_v38  ;;  %v9353_v38 = vld [vmem:[#allocation8 + $0x564] sm:$0xf0]  ;;  %v7534_v30 = vor.u32 %v9433_v35, %v7533_v34 }
 0x27a   : > { %v6573_v41 = vld [vmem:[#allocation8 + $0x48] sm:$0xf] }
 0x27b   : > { %v1087_v51 = vmax.f32 %v1031_v45, 0.0  ;;  %v7214_v45 = vor.u32 %v9353_v38, %v7213_v37  ;;  %v7085_v34 = vld [vmem:[#allocation8 + $0x448] sm:$0xf]  ;;  %v9213_v37 = vld [vmem:[#allocation8 + $0x10c] sm:$0xf] }
 0x27c   : > { %v9321_v35 = vld [vmem:[#allocation8 + $0x464] sm:$0xf0]  ;;  %v6671_v38 = vld [vmem:[#allocation8 + $0x128] sm:$0xf0] }
 0x27d   : > { %v10419_v54 = vpack.c.bf16 %v1087_v51, %v1087_v51  ;;  %2756 = vmatpush.bf16.msrb.mxu0 %v6734_v46  ;;  %v9265_v46 = vld [vmem:[#allocation8 + $0x2a4] sm:$0xf0]  ;;  %v6574_v51 = vor.u32 %v9193_v42, %v6573_v41 }
 0x27e   : > { %v1019_v58 = vpop.f32.mrf.mxu2  ;;  %v1032_v59 = vpop.f32.mrf.mxu3  ;;  %v6862_v57 = vor.u32 %v9265_v46, %v6861_v31  ;;  %v7373_v41 = vld [vmem:[#allocation8 + $0x688] sm:$0xf]  ;;  %v6959_v31 = vld [vmem:[#allocation8 + $0x368] sm:$0xf0] }
 0x27f   : > { %2672 = vmatmul.bf16.vlgmr.msrb.gmra.mxu1 %v10419_v54  ;;  %v1043_v62 = vpop.f32.mrf.mxu0  ;;  %v1056_v63 = vpop.f32.mrf.mxu1  ;;  %v7502_v58 = vor.u32 %v9425_v48, %v7501_v47  ;;  %v9237_v59 = vld [vmem:[#allocation8 + $0x1cc] sm:$0xf]  ;;  %v9393_v42 = vld [vmem:[#allocation8 + $0x6a4] sm:$0xf0] }
 0x280   : > { %2768 = vmatpush.bf16.msrb.mxu1 %v7022_v52  ;;  %v1044_v0 = vadd.f32 %v1043_v62, %v656_v53  ;;  %v7181_v52 = vld [vmem:[#allocation8 + $0x508] sm:$0xf]  ;;  %v6770_v3 = vor.u32 %v9237_v59, %v6767_v60  ;;  %v9205_v48 = vld [vmem:[#allocation8 + $0xcc] sm:$0xf] }
 0x281   : > { %2757 = vmatpush.bf16.msrb.mxu0 %v6702_v55  ;;  %v9345_v53 = vld [vmem:[#allocation8 + $0x524] sm:$0xf0]  ;;  %v6927_v59 = vld [vmem:[#allocation8 + $0x328] sm:$0xf0] }
 0x282   : > { %v1057_v5 = vadd.f32 %v1056_v63, %v1044_v0  ;;  %v6541_v55 = vld [vmem:[#allocation8 + $0x8] sm:$0xf]  ;;  %v7182_v62 = vor.u32 %v9345_v53, %v7181_v52  ;;  %v7279_v52 = vld [vmem:[#allocation8 + $0x5e8] sm:$0xf0] }
 0x283   : > { %v9257_v63 = vld [vmem:[#allocation8 + $0x264] sm:$0xf0] }
 0x284   : > { %v1088_v11 = vmax.f32 %v1057_v5, 0.0  ;;  %2769 = vmatpush.bf16.msrb.mxu1 %v6990_v1  ;;  %v7469_v0 = vld [vmem:[#allocation8 + $0x748] sm:$0xf]  ;;  %v6830_v6 = vor.u32 %v9257_v63, %v6829_v61 }
 0x285   : > { %2758 = vmatpush.bf16.msrb.mxu0 %v6670_v2  ;;  %v9417_v1 = vld [vmem:[#allocation8 + $0x764] sm:$0xf0]  ;;  %v6542_v2 = vor.u32 %v9185_v56, %v6541_v55 }
 0x286   : > { %v10423_v16 = vpack.c.bf16 %v1088_v11, %v1088_v11  ;;  %v1069_v17 = vpop.f32.mrf.mxu2  ;;  %v1082_v18 = vpop.f32.mrf.mxu3  ;;  %v9337_v5 = vld [vmem:[#allocation8 + $0x4e4] sm:$0xf0]  ;;  %v7470_v7 = vor.u32 %v9417_v1, %v7469_v0  ;;  %v6607_v0 = vld [vmem:[#allocation8 + $0xa8] sm:$0xf0] }
 0x287   : > { %v1070_v23 = vadd.f32 %v1069_v17, %v657_v8  ;;  %v1045_v24 = vpop.f32.mrf.mxu0  ;;  %v1058_v25 = vpop.f32.mrf.mxu1  ;;  %v9229_v8 = vld [vmem:[#allocation8 + $0x18c] sm:$0xf]  ;;  %v9249_v11 = vld [vmem:[#allocation8 + $0x224] sm:$0xf0]  ;;  %v7150_v14 = vor.u32 %v9337_v5, %v7149_v4 }
 0x288   : > { %2770 = vmatpush.bf16.msrb.mxu1 %v6958_v12  ;;  %2685 = vmatmul.bf16.vlgmr.msrb.gmra.mxu2 %v10423_v16  ;;  %v7437_v12 = vld [vmem:[#allocation8 + $0x708] sm:$0xf]  ;;  %v7023_v17 = vld [vmem:[#allocation8 + $0x3e8] sm:$0xf0]  ;;  %v6798_v21 = vor.u32 %v9249_v11, %v6797_v10 }
 0x289   : > { %v1083_v29 = vadd.f32 %v1082_v18, %v1070_v23  ;;  %2711 = vmatmul.bf16.vlgmr.msra.gmra.mxu0 %v10415_v39  ;;  %2781 = vmatpush.bf16.msrb.mxu2 %v7278_v13  ;;  %v9409_v13 = vld [vmem:[#allocation8 + $0x724] sm:$0xf0]  ;;  %v6738_v18 = vor.u32 %v9229_v8, %v6735_v9  ;;  %v9221_v24 = vld [vmem:[#allocation8 + $0x14c] sm:$0xf]  ;;  %v7026_v22 = vor.u32 %v9301_v15, %v7023_v17 }
 0x28a   : > { %2759 = vmatpush.bf16.msrb.mxu0 %v6638_v19  ;;  %v7117_v19 = vld [vmem:[#allocation8 + $0x488] sm:$0xf]  ;;  %v7438_v23 = vor.u32 %v9409_v13, %v7437_v12  ;;  %v6703_v25 = vld [vmem:[#allocation8 + $0x168] sm:$0xf0] }
 0x28b   : > { %v1089_v40 = vmax.f32 %v1083_v29, 0.0  ;;  %v7118_v28 = vor.u32 %v9329_v20, %v7117_v19  ;;  %v9293_v29 = vld [vmem:[#allocation8 + $0x38c] sm:$0xf]  ;;  %v6706_v33 = vor.u32 %v9221_v24, %v6703_v25  ;;  %v7053_v46 = vld [vmem:[#allocation8 + $0x408] sm:$0xf] }
 0x28c   : > { %2771 = vmatpush.bf16.msrb.mxu1 %v6926_v27  ;;  %v9401_v27 = vld [vmem:[#allocation8 + $0x6e4] sm:$0xf0]  ;;  %v9357_v1 = vld [vmem:[#allocation8 + $0x58c] sm:$0xf] }
 0x28d   : > { %v10427_v44 = vpack.c.bf16 %v1089_v40, %v1089_v40  ;;  %2782 = vmatpush.bf16.msrb.mxu2 %v7246_v32  ;;  %v6991_v32 = vld [vmem:[#allocation8 + $0x3a8] sm:$0xf0]  ;;  %v9313_v47 = vld [vmem:[#allocation8 + $0x424] sm:$0xf0] }
 0x28e   : > { %2760 = vmatpush.bf16.msrb.mxu0 %v6606_v36  ;;  %v1071_v49 = vpop.f32.mrf.mxu2  ;;  %v1084_v50 = vpop.f32.mrf.mxu3  ;;  %v7406_v36 = vor.u32 %v9401_v27, %v7405_v26  ;;  %v6994_v40 = vor.u32 %v9293_v29, %v6991_v32  ;;  %v7341_v55 = vld [vmem:[#allocation8 + $0x648] sm:$0xf]  ;;  %v9429_v8 = vld [vmem:[#allocation8 + $0x7cc] sm:$0xf] }
 0x28f   : > { %2698 = vmatmul.bf16.vlgmr.msrb.gmra.mxu3 %v10427_v44  ;;  %2724 = vmatmul.bf16.vlgmr.msra.gmra.mxu1 %v10419_v54  ;;  %v7374_v49 = vor.u32 %v9393_v42, %v7373_v41  ;;  %v6639_v50 = vld [vmem:[#allocation8 + $0xe8] sm:$0xf0]  ;;  %v9385_v56 = vld [vmem:[#allocation8 + $0x664] sm:$0xf0] }
 0x290   : > { %2772 = vmatpush.bf16.msrb.mxu1 %v6894_v43  ;;  %2794 = vmatpush.bf16.msrb.mxu3 %v7534_v30  ;;  %v7086_v43 = vor.u32 %v9321_v35, %v7085_v34  ;;  %v9285_v30 = vld [vmem:[#allocation8 + $0x34c] sm:$0xf]  ;;  %v6642_v60 = vor.u32 %v9205_v48, %v6639_v50  ;;  %v7342_v63 = vor.u32 %v9385_v56, %v7341_v55  ;;  %v7309_v4 = vld [vmem:[#allocation8 + $0x608] sm:$0xf]  ;;  %v6773_v34 = vld [vmem:[#allocation8 + $0x1d0] sm:$0xf] }
 0x291   : > { %2783 = vmatpush.bf16.msrb.mxu2 %v7214_v45  ;;  %v6674_v45 = vor.u32 %v9213_v37, %v6671_v38  ;;  %v6962_v53 = vor.u32 %v9285_v30, %v6959_v31  ;;  %v9377_v5 = vld [vmem:[#allocation8 + $0x624] sm:$0xf0]  ;;  %v7535_v9 = vld [vmem:[#allocation8 + $0x7e8] sm:$0xf0]  ;;  %v9242_v35 = vld [vmem:[#allocation8 + $0x1ec] sm:$0xf0] }
 0x292   : > { %2761 = vmatpush.bf16.msrb.mxu0 %v6574_v51  ;;  %v9365_v51 = vld [vmem:[#allocation8 + $0x5cc] sm:$0xf]  ;;  %v7310_v13 = vor.u32 %v9377_v5, %v7309_v4  ;;  %v7538_v19 = vor.u32 %v9429_v8, %v7535_v9  ;;  %v9234_v48 = vld [vmem:[#allocation8 + $0x1ac] sm:$0xf0] }
 0x293   : > { %v7282_v61 = vor.u32 %v9365_v51, %v7279_v52  ;;  %v9189_v12 = vld [vmem:[#allocation8 + $0x4c] sm:$0xf]  ;;  %v7029_v55 = vld [vmem:[#allocation8 + $0x3d0] sm:$0xf] }
 0x294   : > { %2773 = vmatpush.bf16.msrb.mxu1 %v6862_v57  ;;  %2795 = vmatpush.bf16.msrb.mxu3 %v7502_v58  ;;  %v7054_v57 = vor.u32 %v9313_v47, %v7053_v46  ;;  %v9277_v58 = vld [vmem:[#allocation8 + $0x30c] sm:$0xf]  ;;  %v6741_v47 = vld [vmem:[#allocation8 + $0x190] sm:$0xf] }
 0x295   : > { %2784 = vmatpush.bf16.msrb.mxu2 %v7182_v62  ;;  %v9197_v62 = vld [vmem:[#allocation8 + $0x8c] sm:$0xf]  ;;  %v9306_v56 = vld [vmem:[#allocation8 + $0x3ec] sm:$0xf0] }
 0x296   : > { %2762 = vmatpush.bf16.msrb.mxu0 %v6542_v2  ;;  %v7247_v2 = vld [vmem:[#allocation8 + $0x5a8] sm:$0xf0]  ;;  %v6610_v10 = vor.u32 %v9197_v62, %v6607_v0  ;;  %v6709_v62 = vld [vmem:[#allocation8 + $0x150] sm:$0xf]  ;;  %v7030_v0 = vor.u32 %v9306_v56, %v7029_v55 }
 0x297   : > { %v7250_v11 = vor.u32 %v9357_v1, %v7247_v2  ;;  %v9349_v15 = vld [vmem:[#allocation8 + $0x54c] sm:$0xf]  ;;  %v6997_v4 = vld [vmem:[#allocation8 + $0x390] sm:$0xf] }
 0x298   : > { %2774 = vmatpush.bf16.msrb.mxu1 %v6830_v6  ;;  %2796 = vmatpush.bf16.msrb.mxu3 %v7470_v7  ;;  %v9269_v6 = vld [vmem:[#allocation8 + $0x2cc] sm:$0xf]  ;;  %v9298_v5 = vld [vmem:[#allocation8 + $0x3ac] sm:$0xf0] }
 0x299   : > { %2737 = vmatmul.bf16.vlgmr.msra.gmra.mxu2 %v10423_v16  ;;  %2763 = vmatmul.bf16.vlgmr.msrb.gmra.mxu0 %v10415_v39  ;;  %v6895_v7 = vld [vmem:[#allocation8 + $0x2e8] sm:$0xf0] }
 0x29a   : > { %2807 = vmatpush.bf16.msra.mxu0 %v6770_v3  ;;  %2785 = vmatpush.bf16.msrb.mxu2 %v7150_v14  ;;  %v6930_v3 = vor.u32 %v9277_v58, %v6927_v59  ;;  %v6575_v14 = vld [vmem:[#allocation8 + $0x68] sm:$0xf0] }
 0x29b   : > { %v7215_v17 = vld [vmem:[#allocation8 + $0x568] sm:$0xf0]  ;;  %v6578_v25 = vor.u32 %v9189_v12, %v6575_v14  ;;  %v6998_v12 = vor.u32 %v9298_v5, %v6997_v4  ;;  %v9346_v4 = vld [vmem:[#allocation8 + $0x52c] sm:$0xf0] }
 0x29c   : > { %2775 = vmatpush.bf16.msrb.mxu1 %v6798_v21  ;;  %2797 = vmatpush.bf16.msrb.mxu3 %v7438_v23  ;;  %v9261_v20 = vld [vmem:[#allocation8 + $0x28c] sm:$0xf] }
 0x29d   : > { %v6863_v21 = vld [vmem:[#allocation8 + $0x2a8] sm:$0xf0] }
 0x29e   : > { %2808 = vmatpush.bf16.msra.mxu0 %v6738_v18  ;;  %2786 = vmatpush.bf16.msrb.mxu2 %v7118_v28  ;;  %v6898_v18 = vor.u32 %v9269_v6, %v6895_v7  ;;  %v9421_v23 = vld [vmem:[#allocation8 + $0x78c] sm:$0xf]  ;;  %v6866_v32 = vor.u32 %v9261_v20, %v6863_v21 }
 0x29f   : > { %2750 = vmatmul.bf16.vlgmr.msra.gmra.mxu3 %v10427_v44  ;;  %2776 = vmatmul.bf16.vlgmr.msrb.gmra.mxu1 %v10419_v54  ;;  %v7503_v24 = vld [vmem:[#allocation8 + $0x7a8] sm:$0xf0] }
 0x2a0   : > { %2820 = vmatpush.bf16.msra.mxu1 %v7026_v22  ;;  %2798 = vmatpush.bf16.msrb.mxu3 %v7406_v36  ;;  %v7218_v22 = vor.u32 %v9349_v15, %v7215_v17  ;;  %v9181_v26 = vld [vmem:[#allocation8 + $0xc] sm:$0xf]  ;;  %v6965_v17 = vld [vmem:[#allocation8 + $0x350] sm:$0xf] }
 0x2a1   : > { %v6543_v27 = vld [vmem:[#allocation8 + $0x28] sm:$0xf0] }
 0x2a2   : > { %2809 = vmatpush.bf16.msra.mxu0 %v6706_v33  ;;  %2787 = vmatpush.bf16.msrb.mxu2 %v7086_v43  ;;  %v9341_v28 = vld [vmem:[#allocation8 + $0x50c] sm:$0xf]  ;;  %v7506_v33 = vor.u32 %v9421_v23, %v7503_v24  ;;  %v6546_v41 = vor.u32 %v9181_v26, %v6543_v27  ;;  %v6774_v43 = vor.u32 %v9242_v35, %v6773_v34  ;;  %v6645_v23 = vld [vmem:[#allocation8 + $0xd0] sm:$0xf] }
 0x2a3   : > { %v7183_v29 = vld [vmem:[#allocation8 + $0x528] sm:$0xf0]  ;;  %v9370_v26 = vld [vmem:[#allocation8 + $0x5ec] sm:$0xf0] }
 0x2a4   : > { %2821 = vmatpush.bf16.msra.mxu1 %v6994_v40  ;;  %2799 = vmatpush.bf16.msrb.mxu3 %v7374_v49  ;;  %v9253_v36 = vld [vmem:[#allocation8 + $0x24c] sm:$0xf]  ;;  %v7186_v42 = vor.u32 %v9341_v28, %v7183_v29  ;;  %v9282_v34 = vld [vmem:[#allocation8 + $0x32c] sm:$0xf0] }
 0x2a5   : > { %v6831_v37 = vld [vmem:[#allocation8 + $0x268] sm:$0xf0] }
 0x2a6   : > { %2810 = vmatpush.bf16.msra.mxu0 %v6674_v45  ;;  %2788 = vmatpush.bf16.msrb.mxu2 %v7054_v57  ;;  %v9413_v38 = vld [vmem:[#allocation8 + $0x74c] sm:$0xf]  ;;  %v6834_v45 = vor.u32 %v9253_v36, %v6831_v37  ;;  %v6742_v57 = vor.u32 %v9234_v48, %v6741_v47  ;;  %v6613_v37 = vld [vmem:[#allocation8 + $0x90] sm:$0xf] }
 0x2a7   : > { %v7471_v40 = vld [vmem:[#allocation8 + $0x768] sm:$0xf0]  ;;  %v7541_v47 = vld [vmem:[#allocation8 + $0x7d0] sm:$0xf] }
 0x2a8   : > { %2822 = vmatpush.bf16.msra.mxu1 %v6962_v53  ;;  %2800 = vmatpush.bf16.msrb.mxu3 %v7342_v63  ;;  %v9333_v30 = vld [vmem:[#allocation8 + $0x4cc] sm:$0xf]  ;;  %v7474_v46 = vor.u32 %v9413_v38, %v7471_v40  ;;  %v9226_v63 = vld [vmem:[#allocation8 + $0x16c] sm:$0xf0] }
 0x2a9   : > { %2789 = vmatmul.bf16.vlgmr.msrb.gmra.mxu2 %v10423_v16  ;;  %v7151_v31 = vld [vmem:[#allocation8 + $0x4e8] sm:$0xf0]  ;;  %v6710_v6 = vor.u32 %v9226_v63, %v6709_v62  ;;  %v9202_v40 = vld [vmem:[#allocation8 + $0xac] sm:$0xf0] }
 0x2aa   : > { %2811 = vmatpush.bf16.msra.mxu0 %v6642_v60  ;;  %2833 = vmatpush.bf16.msra.mxu2 %v7282_v61  ;;  %v9245_v49 = vld [vmem:[#allocation8 + $0x20c] sm:$0xf]  ;;  %v7154_v53 = vor.u32 %v9333_v30, %v7151_v31  ;;  %v9434_v48 = vld [vmem:[#allocation8 + $0x7ec] sm:$0xf0] }
 0x2ab   : > { %v6799_v50 = vld [vmem:[#allocation8 + $0x228] sm:$0xf0]  ;;  %v7542_v56 = vor.u32 %v9434_v48, %v7541_v47  ;;  %v9426_v62 = vld [vmem:[#allocation8 + $0x7ac] sm:$0xf0] }
 0x2ac   : > { %2823 = vmatpush.bf16.msra.mxu1 %v6930_v3  ;;  %2801 = vmatpush.bf16.msrb.mxu3 %v7310_v13  ;;  %v9405_v51 = vld [vmem:[#allocation8 + $0x70c] sm:$0xf]  ;;  %v6802_v60 = vor.u32 %v9245_v49, %v6799_v50  ;;  %v6614_v49 = vor.u32 %v9202_v40, %v6613_v37  ;;  %v9222_v37 = vld [vmem:[#allocation8 + $0x154] sm:$0xf]  ;;  %v7093_v47 = vld [vmem:[#allocation8 + $0x450] sm:$0xf] }
 0x2ad   : > { %v7439_v52 = vld [vmem:[#allocation8 + $0x728] sm:$0xf0]  ;;  %v6711_v40 = vld [vmem:[#allocation8 + $0x170] sm:$0xf0]  ;;  %v9322_v48 = vld [vmem:[#allocation8 + $0x46c] sm:$0xf0] }
 0x2ae   : > { %2812 = vmatpush.bf16.msra.mxu0 %v6610_v10  ;;  %2834 = vmatpush.bf16.msra.mxu2 %v7250_v11  ;;  %v9325_v58 = vld [vmem:[#allocation8 + $0x48c] sm:$0xf]  ;;  %v7442_v61 = vor.u32 %v9405_v51, %v7439_v52  ;;  %v6677_v10 = vld [vmem:[#allocation8 + $0x110] sm:$0xf] }
 0x2af   : > { %2802 = vmatmul.bf16.vlgmr.msrb.gmra.mxu3 %v10427_v44  ;;  %v7119_v59 = vld [vmem:[#allocation8 + $0x4a8] sm:$0xf0]  ;;  %v9218_v11 = vld [vmem:[#allocation8 + $0x12c] sm:$0xf0] }
 0x2b0   : > { %2824 = vmatpush.bf16.msra.mxu1 %v6898_v18  ;;  %2846 = vmatpush.bf16.msra.mxu3 %v7538_v19  ;;  %v9397_v1 = vld [vmem:[#allocation8 + $0x6cc] sm:$0xf]  ;;  %v7122_v3 = vor.u32 %v9325_v58, %v7119_v59  ;;  %v9290_v18 = vld [vmem:[#allocation8 + $0x36c] sm:$0xf0]  ;;  %v6678_v19 = vor.u32 %v9218_v11, %v6677_v10 }
 0x2b1   : > { %v7407_v2 = vld [vmem:[#allocation8 + $0x6e8] sm:$0xf0]  ;;  %v6966_v27 = vor.u32 %v9290_v18, %v6965_v17  ;;  %v6581_v52 = vld [vmem:[#allocation8 + $0x50] sm:$0xf] }
 0x2b2   : > { %2813 = vmatpush.bf16.msra.mxu0 %v6578_v25  ;;  %2835 = vmatpush.bf16.msra.mxu2 %v7218_v22  ;;  %v9317_v7 = vld [vmem:[#allocation8 + $0x44c] sm:$0xf]  ;;  %v7410_v9 = vor.u32 %v9397_v1, %v7407_v2  ;;  %v9210_v25 = vld [vmem:[#allocation8 + $0xec] sm:$0xf0] }
 0x2b3   : > { %v7087_v8 = vld [vmem:[#allocation8 + $0x468] sm:$0xf0]  ;;  %v7285_v22 = vld [vmem:[#allocation8 + $0x5d0] sm:$0xf]  ;;  %v6646_v35 = vor.u32 %v9210_v25, %v6645_v23  ;;  %v6743_v23 = vld [vmem:[#allocation8 + $0x1b0] sm:$0xf0] }
 0x2b4   : > { %2825 = vmatpush.bf16.msra.mxu1 %v6866_v32  ;;  %2847 = vmatpush.bf16.msra.mxu3 %v7506_v33  ;;  %v9389_v13 = vld [vmem:[#allocation8 + $0x68c] sm:$0xf]  ;;  %v7090_v15 = vor.u32 %v9317_v7, %v7087_v8  ;;  %v6933_v33 = vld [vmem:[#allocation8 + $0x310] sm:$0xf]  ;;  %v7286_v36 = vor.u32 %v9370_v26, %v7285_v22  ;;  %v9238_v7 = vld [vmem:[#allocation8 + $0x1d4] sm:$0xf] }
 0x2b5   : > { %v7375_v14 = vld [vmem:[#allocation8 + $0x6a8] sm:$0xf0]  ;;  %v9354_v58 = vld [vmem:[#allocation8 + $0x56c] sm:$0xf0]  ;;  %v6775_v8 = vld [vmem:[#allocation8 + $0x1f0] sm:$0xf0] }
 0x2b6   : > { %2814 = vmatpush.bf16.msra.mxu0 %v6546_v41  ;;  %2836 = vmatpush.bf16.msra.mxu2 %v7186_v42  ;;  %v9309_v20 = vld [vmem:[#allocation8 + $0x40c] sm:$0xf]  ;;  %v7378_v24 = vor.u32 %v9389_v13, %v7375_v14  ;;  %v7253_v41 = vld [vmem:[#allocation8 + $0x590] sm:$0xf] }
 0x2b7   : > { %v7055_v21 = vld [vmem:[#allocation8 + $0x428] sm:$0xf0]  ;;  %v9362_v42 = vld [vmem:[#allocation8 + $0x5ac] sm:$0xf0] }
 0x2b8   : > { %2826 = vmatpush.bf16.msra.mxu1 %v6834_v45  ;;  %2848 = vmatpush.bf16.msra.mxu3 %v7474_v46  ;;  %v9381_v28 = vld [vmem:[#allocation8 + $0x64c] sm:$0xf]  ;;  %v7058_v32 = vor.u32 %v9309_v20, %v7055_v21  ;;  %v6901_v45 = vld [vmem:[#allocation8 + $0x2d0] sm:$0xf]  ;;  %v7254_v50 = vor.u32 %v9362_v42, %v7253_v41  ;;  %v9230_v21 = vld [vmem:[#allocation8 + $0x194] sm:$0xf] }
 0x2b9   : > { %2815 = vmatmul.bf16.vlgmr.msra.gmra.mxu0 %v10415_v39  ;;  %v7343_v29 = vld [vmem:[#allocation8 + $0x668] sm:$0xf0]  ;;  %v9274_v46 = vld [vmem:[#allocation8 + $0x2ec] sm:$0xf0] }
 0x2ba   : > { %2859 = vmatpush.bf16.msrb.mxu0 %v6774_v43  ;;  %2837 = vmatpush.bf16.msra.mxu2 %v7154_v53  ;;  %v7346_v38 = vor.u32 %v9381_v28, %v7343_v29  ;;  %v6934_v43 = vor.u32 %v9282_v34, %v6933_v33  ;;  %v9373_v30 = vld [vmem:[#allocation8 + $0x60c] sm:$0xf]  ;;  %v9194_v53 = vld [vmem:[#allocation8 + $0x6c] sm:$0xf0]  ;;  %v6902_v55 = vor.u32 %v9274_v46, %v6901_v45  ;;  %v7031_v28 = vld [vmem:[#allocation8 + $0x3f0] sm:$0xf0] }
 0x2bb   : > { %v7311_v31 = vld [vmem:[#allocation8 + $0x628] sm:$0xf0]  ;;  %v6869_v59 = vld [vmem:[#allocation8 + $0x290] sm:$0xf]  ;;  %v6582_v63 = vor.u32 %v9194_v53, %v6581_v52  ;;  %v6714_v45 = vor.u32 %v9222_v37, %v6711_v40  ;;  %v7511_v37 = vld [vmem:[#allocation8 + $0x7b0] sm:$0xf0] }
 0x2bc   : > { %2827 = vmatpush.bf16.msra.mxu1 %v6802_v60  ;;  %2849 = vmatpush.bf16.msra.mxu3 %v7442_v61  ;;  %v7314_v51 = vor.u32 %v9373_v30, %v7311_v31  ;;  %v9266_v60 = vld [vmem:[#allocation8 + $0x2ac] sm:$0xf0]  ;;  %v6999_v30 = vld [vmem:[#allocation8 + $0x3b0] sm:$0xf0] }
 0x2bd   : > { %v7509_v61 = vld [vmem:[#allocation8 + $0x790] sm:$0xf]  ;;  %v6870_v5 = vor.u32 %v9266_v60, %v6869_v59  ;;  %v9182_v40 = vld [vmem:[#allocation8 + $0x14] sm:$0xf] }
 0x2be   : > { %2860 = vmatpush.bf16.msrb.mxu0 %v6742_v57  ;;  %2838 = vmatpush.bf16.msra.mxu2 %v7122_v3  ;;  %v7221_v57 = vld [vmem:[#allocation8 + $0x550] sm:$0xf] }
 0x2bf   : > { %2828 = vmatmul.bf16.vlgmr.msra.gmra.mxu1 %v10419_v54  ;;  %v7222_v1 = vor.u32 %v9354_v58, %v7221_v57  ;;  %v9186_v2 = vld [vmem:[#allocation8 + $0x2c] sm:$0xf0]  ;;  %v7094_v57 = vor.u32 %v9322_v48, %v7093_v47  ;;  %v9243_v47 = vld [vmem:[#allocation8 + $0x1f4] sm:$0xf0]  ;;  %v9254_v48 = vld [vmem:[#allocation8 + $0x254] sm:$0xf] }
 0x2c0   : > { %2872 = vmatpush.bf16.msrb.mxu1 %v7030_v0  ;;  %2850 = vmatpush.bf16.msra.mxu3 %v7410_v9  ;;  %v6549_v0 = vld [vmem:[#allocation8 + $0x10] sm:$0xf] }
 0x2c1   : > { %v7189_v3 = vld [vmem:[#allocation8 + $0x510] sm:$0xf]  ;;  %v6550_v13 = vor.u32 %v9186_v2, %v6549_v0  ;;  %v7287_v2 = vld [vmem:[#allocation8 + $0x5f0] sm:$0xf0] }
 0x2c2   : > { %2861 = vmatpush.bf16.msrb.mxu0 %v6710_v6  ;;  %2839 = vmatpush.bf16.msra.mxu2 %v7090_v15  ;;  %v7510_v6 = vor.u32 %v9426_v62, %v7509_v61  ;;  %v6837_v9 = vld [vmem:[#allocation8 + $0x250] sm:$0xf]  ;;  %v7190_v14 = vor.u32 %v9346_v4, %v7189_v3  ;;  %v6778_v15 = vor.u32 %v9238_v7, %v6775_v8  ;;  %v9206_v62 = vld [vmem:[#allocation8 + $0xd4] sm:$0xf] }
 0x2c3   : > { %v9258_v10 = vld [vmem:[#allocation8 + $0x26c] sm:$0xf0] }
 0x2c4   : > { %2873 = vmatpush.bf16.msrb.mxu1 %v6998_v12  ;;  %2851 = vmatpush.bf16.msra.mxu3 %v7378_v24  ;;  %v7477_v11 = vld [vmem:[#allocation8 + $0x750] sm:$0xf] }
 0x2c5   : > { %v9418_v12 = vld [vmem:[#allocation8 + $0x76c] sm:$0xf0] }
 0x2c6   : > { %2862 = vmatpush.bf16.msrb.mxu0 %v6678_v19  ;;  %2840 = vmatpush.bf16.msra.mxu2 %v7058_v32  ;;  %v7157_v17 = vld [vmem:[#allocation8 + $0x4d0] sm:$0xf]  ;;  %v6838_v19 = vor.u32 %v9258_v10, %v6837_v9  ;;  %v7478_v20 = vor.u32 %v9418_v12, %v7477_v11  ;;  %v6746_v32 = vor.u32 %v9230_v21, %v6743_v23  ;;  %v9198_v10 = vld [vmem:[#allocation8 + $0x94] sm:$0xf] }
 0x2c7   : > { %v9338_v18 = vld [vmem:[#allocation8 + $0x4ec] sm:$0xf0]  ;;  %v6615_v11 = vld [vmem:[#allocation8 + $0xb0] sm:$0xf0] }
 0x2c8   : > { %2874 = vmatpush.bf16.msrb.mxu1 %v6966_v27  ;;  %2852 = vmatpush.bf16.msra.mxu3 %v7346_v38  ;;  %v6805_v24 = vld [vmem:[#allocation8 + $0x210] sm:$0xf]  ;;  %v9302_v27 = vld [vmem:[#allocation8 + $0x3d4] sm:$0xf]  ;;  %v7158_v29 = vor.u32 %v9338_v18, %v7157_v17 }
 0x2c9   : > { %2841 = vmatmul.bf16.vlgmr.msra.gmra.mxu2 %v10423_v16  ;;  %v9250_v25 = vld [vmem:[#allocation8 + $0x22c] sm:$0xf0]  ;;  %v7034_v38 = vor.u32 %v9302_v27, %v7031_v28  ;;  %v9430_v21 = vld [vmem:[#allocation8 + $0x7d4] sm:$0xf] }
 0x2ca   : > { %2863 = vmatpush.bf16.msrb.mxu0 %v6646_v35  ;;  %2885 = vmatpush.bf16.msrb.mxu2 %v7286_v36  ;;  %v7445_v22 = vld [vmem:[#allocation8 + $0x710] sm:$0xf]  ;;  %v6806_v33 = vor.u32 %v9250_v25, %v6805_v24  ;;  %v7543_v23 = vld [vmem:[#allocation8 + $0x7f0] sm:$0xf0]  ;;  %v6618_v24 = vor.u32 %v9198_v10, %v6615_v11 }
 0x2cb   : > { %v9410_v26 = vld [vmem:[#allocation8 + $0x72c] sm:$0xf0]  ;;  %v9190_v27 = vld [vmem:[#allocation8 + $0x54] sm:$0xf] }
 0x2cc   : > { %2875 = vmatpush.bf16.msrb.mxu1 %v6934_v43  ;;  %2853 = vmatpush.bf16.msra.mxu3 %v7314_v51  ;;  %v7446_v34 = vor.u32 %v9410_v26, %v7445_v22  ;;  %v7125_v35 = vld [vmem:[#allocation8 + $0x490] sm:$0xf]  ;;  %v9294_v43 = vld [vmem:[#allocation8 + $0x394] sm:$0xf] }
 0x2cd   : > { %v9330_v36 = vld [vmem:[#allocation8 + $0x4ac] sm:$0xf0]  ;;  %v6679_v51 = vld [vmem:[#allocation8 + $0x130] sm:$0xf0] }
 0x2ce   : > { %2864 = vmatpush.bf16.msrb.mxu0 %v6614_v49  ;;  %2886 = vmatpush.bf16.msrb.mxu2 %v7254_v50  ;;  %v7413_v41 = vld [vmem:[#allocation8 + $0x6d0] sm:$0xf]  ;;  %v7126_v31 = vor.u32 %v9330_v36, %v7125_v35  ;;  %v9214_v49 = vld [vmem:[#allocation8 + $0x114] sm:$0xf]  ;;  %v7002_v50 = vor.u32 %v9294_v43, %v6999_v30 }
 0x2cf   : > { %2854 = vmatmul.bf16.vlgmr.msra.gmra.mxu3 %v10427_v44  ;;  %v9402_v42 = vld [vmem:[#allocation8 + $0x6ec] sm:$0xf0]  ;;  %v6682_v59 = vor.u32 %v9214_v49, %v6679_v51  ;;  %v6583_v28 = vld [vmem:[#allocation8 + $0x70] sm:$0xf0] }
 0x2d0   : > { %2876 = vmatpush.bf16.msrb.mxu1 %v6902_v55  ;;  %2898 = vmatpush.bf16.msrb.mxu3 %v7542_v56  ;;  %v7414_v46 = vor.u32 %v9402_v42, %v7413_v41  ;;  %v7381_v52 = vld [vmem:[#allocation8 + $0x690] sm:$0xf]  ;;  %v9286_v55 = vld [vmem:[#allocation8 + $0x354] sm:$0xf] }
 0x2d1   : > { %v9394_v53 = vld [vmem:[#allocation8 + $0x6ac] sm:$0xf0]  ;;  %v6967_v56 = vld [vmem:[#allocation8 + $0x370] sm:$0xf0] }
 0x2d2   : > { %2865 = vmatpush.bf16.msrb.mxu0 %v6582_v63  ;;  %2887 = vmatpush.bf16.msrb.mxu2 %v7222_v1  ;;  %v7061_v58 = vld [vmem:[#allocation8 + $0x410] sm:$0xf]  ;;  %v7382_v60 = vor.u32 %v9394_v53, %v7381_v52  ;;  %v6647_v63 = vld [vmem:[#allocation8 + $0xf0] sm:$0xf0]  ;;  %v6970_v0 = vor.u32 %v9286_v55, %v6967_v56 }
 0x2d3   : > { %v9314_v61 = vld [vmem:[#allocation8 + $0x42c] sm:$0xf0]  ;;  %v9366_v1 = vld [vmem:[#allocation8 + $0x5d4] sm:$0xf]  ;;  %v6650_v8 = vor.u32 %v9206_v62, %v6647_v63 }
 0x2d4   : > { %2877 = vmatpush.bf16.msrb.mxu1 %v6870_v5  ;;  %2899 = vmatpush.bf16.msrb.mxu3 %v7510_v6  ;;  %v7349_v3 = vld [vmem:[#allocation8 + $0x650] sm:$0xf]  ;;  %v9278_v5 = vld [vmem:[#allocation8 + $0x314] sm:$0xf]  ;;  %v7062_v7 = vor.u32 %v9314_v61, %v7061_v58  ;;  %v7290_v9 = vor.u32 %v9366_v1, %v7287_v2  ;;  %v9235_v61 = vld [vmem:[#allocation8 + $0x1b4] sm:$0xf0] }
 0x2d5   : > { %v9386_v4 = vld [vmem:[#allocation8 + $0x66c] sm:$0xf0]  ;;  %v6935_v6 = vld [vmem:[#allocation8 + $0x330] sm:$0xf0]  ;;  %v7037_v2 = vld [vmem:[#allocation8 + $0x3d8] sm:$0xf] }
 0x2d6   : > { %2866 = vmatpush.bf16.msrb.mxu0 %v6550_v13  ;;  %2888 = vmatpush.bf16.msrb.mxu2 %v7190_v14  ;;  %v7350_v12 = vor.u32 %v9386_v4, %v7349_v3  ;;  %v6938_v13 = vor.u32 %v9278_v5, %v6935_v6  ;;  %v9358_v14 = vld [vmem:[#allocation8 + $0x594] sm:$0xf]  ;;  %v7317_v17 = vld [vmem:[#allocation8 + $0x610] sm:$0xf]  ;;  %v9307_v3 = vld [vmem:[#allocation8 + $0x3f4] sm:$0xf0] }
 0x2d7   : > { %v9378_v18 = vld [vmem:[#allocation8 + $0x62c] sm:$0xf0]  ;;  %v6871_v35 = vld [vmem:[#allocation8 + $0x2b0] sm:$0xf0] }
 0x2d8   : > { %2878 = vmatpush.bf16.msrb.mxu1 %v6838_v19  ;;  %2900 = vmatpush.bf16.msrb.mxu3 %v7478_v20  ;;  %v9270_v19 = vld [vmem:[#allocation8 + $0x2d4] sm:$0xf]  ;;  %v7318_v22 = vor.u32 %v9378_v18, %v7317_v17  ;;  %v7005_v18 = vld [vmem:[#allocation8 + $0x398] sm:$0xf] }
 0x2d9   : > { %2867 = vmatmul.bf16.vlgmr.msrb.gmra.mxu0 %v10415_v39  ;;  %v6903_v20 = vld [vmem:[#allocation8 + $0x2f0] sm:$0xf0] }
 0x2da   : > { %2911 = vmatpush.bf16.msra.mxu0 %v6778_v15  ;;  %2889 = vmatpush.bf16.msrb.mxu2 %v7158_v29  ;;  %v7255_v15 = vld [vmem:[#allocation8 + $0x5b0] sm:$0xf0]  ;;  %v6906_v26 = vor.u32 %v9270_v19, %v6903_v20  ;;  %v9299_v19 = vld [vmem:[#allocation8 + $0x3b4] sm:$0xf0] }
 0x2db   : > { %v7258_v25 = vor.u32 %v9358_v14, %v7255_v15  ;;  %v9350_v29 = vld [vmem:[#allocation8 + $0x554] sm:$0xf]  ;;  %v9227_v14 = vld [vmem:[#allocation8 + $0x174] sm:$0xf0] }
 0x2dc   : > { %2879 = vmatpush.bf16.msrb.mxu1 %v6806_v33  ;;  %2901 = vmatpush.bf16.msrb.mxu3 %v7446_v34  ;;  %v7223_v33 = vld [vmem:[#allocation8 + $0x570] sm:$0xf0] }
 0x2dd   : > { %v9262_v34 = vld [vmem:[#allocation8 + $0x294] sm:$0xf]  ;;  %v7226_v41 = vor.u32 %v9350_v29, %v7223_v33  ;;  %v9219_v29 = vld [vmem:[#allocation8 + $0x134] sm:$0xf0] }
 0x2de   : > { %2912 = vmatpush.bf16.msra.mxu0 %v6746_v32  ;;  %2890 = vmatpush.bf16.msrb.mxu2 %v7126_v31  ;;  %v7546_v32 = vor.u32 %v9430_v21, %v7543_v23  ;;  %v9422_v36 = vld [vmem:[#allocation8 + $0x794] sm:$0xf]  ;;  %v6874_v42 = vor.u32 %v9262_v34, %v6871_v35  ;;  %v6973_v34 = vld [vmem:[#allocation8 + $0x358] sm:$0xf] }
 0x2df   : > { %2880 = vmatmul.bf16.vlgmr.msrb.gmra.mxu1 %v10419_v54  ;;  %v6551_v43 = vld [vmem:[#allocation8 + $0x30] sm:$0xf0]  ;;  %v9291_v35 = vld [vmem:[#allocation8 + $0x374] sm:$0xf0] }
 0x2e0   : > { %2924 = vmatpush.bf16.msra.mxu1 %v7034_v38  ;;  %2902 = vmatpush.bf16.msrb.mxu3 %v7414_v46  ;;  %v6586_v38 = vor.u32 %v9190_v27, %v6583_v28  ;;  %v9342_v30 = vld [vmem:[#allocation8 + $0x514] sm:$0xf]  ;;  %v6781_v46 = vld [vmem:[#allocation8 + $0x1d8] sm:$0xf]  ;;  %v6554_v52 = vor.u32 %v9182_v40, %v6551_v43  ;;  %v7006_v28 = vor.u32 %v9299_v19, %v7005_v18 }
 0x2e1   : > { %v7191_v31 = vld [vmem:[#allocation8 + $0x530] sm:$0xf0]  ;;  %v6782_v55 = vor.u32 %v9243_v47, %v6781_v46  ;;  %v6653_v43 = vld [vmem:[#allocation8 + $0xd8] sm:$0xf] }
 0x2e2   : > { %2913 = vmatpush.bf16.msra.mxu0 %v6714_v45  ;;  %2891 = vmatpush.bf16.msrb.mxu2 %v7094_v57  ;;  %v7514_v45 = vor.u32 %v9422_v36, %v7511_v37  ;;  %v6839_v49 = vld [vmem:[#allocation8 + $0x270] sm:$0xf0]  ;;  %v7194_v53 = vor.u32 %v9342_v30, %v7191_v31  ;;  %v9211_v30 = vld [vmem:[#allocation8 + $0xf4] sm:$0xf0]  ;;  %v6974_v31 = vor.u32 %v9291_v35, %v6973_v34  ;;  %v9239_v34 = vld [vmem:[#allocation8 + $0x1dc] sm:$0xf] }
 0x2e3   : > { %v7479_v51 = vld [vmem:[#allocation8 + $0x770] sm:$0xf0]  ;;  %v6842_v58 = vor.u32 %v9254_v48, %v6839_v49  ;;  %v9371_v46 = vld [vmem:[#allocation8 + $0x5f4] sm:$0xf0]  ;;  %v6783_v35 = vld [vmem:[#allocation8 + $0x1f8] sm:$0xf0] }
 0x2e4   : > { %2925 = vmatpush.bf16.msra.mxu1 %v7002_v50  ;;  %2903 = vmatpush.bf16.msrb.mxu3 %v7382_v60  ;;  %v9414_v50 = vld [vmem:[#allocation8 + $0x754] sm:$0xf]  ;;  %v6749_v60 = vld [vmem:[#allocation8 + $0x198] sm:$0xf] }
 0x2e5   : > { %v9334_v56 = vld [vmem:[#allocation8 + $0x4d4] sm:$0xf]  ;;  %v6750_v5 = vor.u32 %v9235_v61, %v6749_v60  ;;  %v6941_v49 = vld [vmem:[#allocation8 + $0x318] sm:$0xf] }
 0x2e6   : > { %2914 = vmatpush.bf16.msra.mxu0 %v6682_v59  ;;  %2892 = vmatpush.bf16.msrb.mxu2 %v7062_v7  ;;  %v7159_v57 = vld [vmem:[#allocation8 + $0x4f0] sm:$0xf0]  ;;  %v7482_v59 = vor.u32 %v9414_v50, %v7479_v51  ;;  %v9283_v50 = vld [vmem:[#allocation8 + $0x334] sm:$0xf0] }
 0x2e7   : > { %v9246_v62 = vld [vmem:[#allocation8 + $0x214] sm:$0xf]  ;;  %v7162_v4 = vor.u32 %v9334_v56, %v7159_v57  ;;  %v6621_v57 = vld [vmem:[#allocation8 + $0x98] sm:$0xf] }
 0x2e8   : > { %2926 = vmatpush.bf16.msra.mxu1 %v6970_v0  ;;  %2904 = vmatpush.bf16.msrb.mxu3 %v7350_v12  ;;  %v6807_v63 = vld [vmem:[#allocation8 + $0x230] sm:$0xf0]  ;;  %v9267_v18 = vld [vmem:[#allocation8 + $0x2b4] sm:$0xf0] }
 0x2e9   : > { %2893 = vmatmul.bf16.vlgmr.msrb.gmra.mxu2 %v10423_v16  ;;  %v9406_v0 = vld [vmem:[#allocation8 + $0x714] sm:$0xf]  ;;  %v7517_v19 = vld [vmem:[#allocation8 + $0x798] sm:$0xf] }
 0x2ea   : > { %2915 = vmatpush.bf16.msra.mxu0 %v6650_v8  ;;  %2937 = vmatpush.bf16.msra.mxu2 %v7290_v9  ;;  %v7447_v1 = vld [vmem:[#allocation8 + $0x730] sm:$0xf0]  ;;  %v6717_v8 = vld [vmem:[#allocation8 + $0x158] sm:$0xf]  ;;  %v6810_v9 = vor.u32 %v9246_v62, %v6807_v63  ;;  %v6942_v62 = vor.u32 %v9283_v50, %v6941_v49 }
 0x2eb   : > { %v9326_v6 = vld [vmem:[#allocation8 + $0x494] sm:$0xf]  ;;  %v7450_v10 = vor.u32 %v9406_v0, %v7447_v1  ;;  %v6718_v23 = vor.u32 %v9227_v14, %v6717_v8  ;;  %v7261_v63 = vld [vmem:[#allocation8 + $0x598] sm:$0xf] }
 0x2ec   : > { %2927 = vmatpush.bf16.msra.mxu1 %v6938_v13  ;;  %2905 = vmatpush.bf16.msrb.mxu3 %v7318_v22  ;;  %v7127_v7 = vld [vmem:[#allocation8 + $0x4b0] sm:$0xf0]  ;;  %v7038_v13 = vor.u32 %v9307_v3, %v7037_v2  ;;  %v9363_v0 = vld [vmem:[#allocation8 + $0x5b4] sm:$0xf0] }
 0x2ed   : > { %v1347_v11 = vld [vmem:[#allocation7 + $0x4] ss:$8 sm:$0xf]  ;;  %v7130_v20 = vor.u32 %v9326_v6, %v7127_v7  ;;  %v6909_v3 = vld [vmem:[#allocation8 + $0x2d8] sm:$0xf]  ;;  %v7262_v8 = vor.u32 %v9363_v0, %v7261_v63 }
 0x2ee   : > { %2916 = vmatpush.bf16.msra.mxu0 %v6618_v24  ;;  %2938 = vmatpush.bf16.msra.mxu2 %v7258_v25  ;;  %v1348_v12 = vld [vmem:[#allocation7 + $0x4] ss:$8 sm:$0xf0]  ;;  %v9435_v6 = vld [vmem:[#allocation8 + $0x7f4] sm:$0xf0] }
 0x2ef   : > { %2906 = vmatmul.bf16.vlgmr.msrb.gmra.mxu3 %v10427_v44  ;;  %v9398_v15 = vld [vmem:[#allocation8 + $0x6d4] sm:$0xf]  ;;  %v10446_v21 = vor.u32 %v1348_v12, %v1347_v11  ;;  %v6589_v11 = vld [vmem:[#allocation8 + $0x58] sm:$0xf] }
 0x2f0   : > { %2928 = vmatpush.bf16.msra.mxu1 %v6906_v26  ;;  %2950 = vmatpush.bf16.msra.mxu3 %v7546_v32  ;;  %v7415_v17 = vld [vmem:[#allocation8 + $0x6f0] sm:$0xf0]  ;;  %v6685_v26 = vld [vmem:[#allocation8 + $0x118] sm:$0xf] }
 0x2f1   : > { %v7418_v24 = vor.u32 %v9398_v15, %v7415_v17  ;;  %v9318_v25 = vld [vmem:[#allocation8 + $0x454] sm:$0xf]  ;;  %v1355_v36 = vperm.slane %v10446_v21, 0  ;;  %v6686_v40 = vor.u32 %v9219_v29, %v6685_v26  ;;  %v9195_v12 = vld [vmem:[#allocation8 + $0x74] sm:$0xf0] }
 0x2f2   : > { %2917 = vmatpush.bf16.msra.mxu0 %v6586_v38  ;;  %2939 = vmatpush.bf16.msra.mxu2 %v7226_v41  ;;  %v7095_v22 = vld [vmem:[#allocation8 + $0x470] sm:$0xf0]  ;;  %v9355_v15 = vld [vmem:[#allocation8 + $0x574] sm:$0xf0] }
 0x2f3   : > { %v9390_v32 = vld [vmem:[#allocation8 + $0x694] sm:$0xf]  ;;  %v7098_v37 = vor.u32 %v9318_v25, %v7095_v22  ;;  %v6877_v17 = vld [vmem:[#allocation8 + $0x298] sm:$0xf] }
 0x2f4   : > { %2929 = vmatpush.bf16.msra.mxu1 %v6874_v42  ;;  %2951 = vmatpush.bf16.msra.mxu3 %v7514_v45  ;;  %v7383_v33 = vld [vmem:[#allocation8 + $0x6b0] sm:$0xf0]  ;;  %v7293_v45 = vld [vmem:[#allocation8 + $0x5d8] sm:$0xf]  ;;  %v6878_v26 = vor.u32 %v9267_v18, %v6877_v17 }
 0x2f5   : > { %v2660_v27 = vpop.f32.mrf.mxu0  ;;  %v9310_v38 = vld [vmem:[#allocation8 + $0x414] sm:$0xf]  ;;  %v7386_v41 = vor.u32 %v9390_v32, %v7383_v33  ;;  %v7294_v56 = vor.u32 %v9371_v46, %v7293_v45  ;;  %v6557_v25 = vld [vmem:[#allocation8 + $0x18] sm:$0xf] }
 0x2f6   : > { %2918 = vmatpush.bf16.msra.mxu0 %v6554_v52  ;;  %2940 = vmatpush.bf16.msra.mxu2 %v7194_v53  ;;  %v7063_v42 = vld [vmem:[#allocation8 + $0x430] sm:$0xf0]  ;;  %v2661_v51 = vadd.f32 %v2660_v27, %v1355_v36  ;;  %v9187_v27 = vld [vmem:[#allocation8 + $0x34] sm:$0xf0] }
 0x2f7   : > { %v9382_v47 = vld [vmem:[#allocation8 + $0x654] sm:$0xf]  ;;  %v7066_v52 = vor.u32 %v9310_v38, %v7063_v42  ;;  %v9347_v29 = vld [vmem:[#allocation8 + $0x534] sm:$0xf0] }
 0x2f8   : > { %2930 = vmatpush.bf16.msra.mxu1 %v6842_v58  ;;  %2952 = vmatpush.bf16.msra.mxu3 %v7482_v59  ;;  %v7351_v48 = vld [vmem:[#allocation8 + $0x670] sm:$0xf0]  ;;  %v9203_v58 = vld [vmem:[#allocation8 + $0xb4] sm:$0xf0] }
 0x2f9   : > { %2919 = vmatmul.bf16.vlgmr.msra.gmra.mxu0 %v10415_v39  ;;  %v7354_v61 = vor.u32 %v9382_v47, %v7351_v48  ;;  %v9374_v1 = vld [vmem:[#allocation8 + $0x614] sm:$0xf]  ;;  %v6622_v7 = vor.u32 %v9203_v58, %v6621_v57  ;;  %v6845_v36 = vld [vmem:[#allocation8 + $0x258] sm:$0xf]  ;;  %v9231_v47 = vld [vmem:[#allocation8 + $0x19c] sm:$0xf] }
 0x2fa   : > { %2963 = vmatpush.bf16.msrb.mxu0 %v6782_v55  ;;  %2941 = vmatpush.bf16.msra.mxu2 %v7162_v4  ;;  %v6654_v55 = vor.u32 %v9211_v30, %v6653_v43  ;;  %v7319_v2 = vld [vmem:[#allocation8 + $0x630] sm:$0xf0]  ;;  %v9275_v4 = vld [vmem:[#allocation8 + $0x2f4] sm:$0xf0]  ;;  %v6786_v43 = vor.u32 %v9239_v34, %v6783_v35  ;;  %v6751_v48 = vld [vmem:[#allocation8 + $0x1b8] sm:$0xf0] }
 0x2fb   : > { %v7485_v38 = vld [vmem:[#allocation8 + $0x758] sm:$0xf]  ;;  %v7039_v57 = vld [vmem:[#allocation8 + $0x3f8] sm:$0xf0] }
 0x2fc   : > { %2931 = vmatpush.bf16.msra.mxu1 %v6810_v9  ;;  %2953 = vmatpush.bf16.msra.mxu3 %v7450_v10  ;;  %v2673_v53 = vpop.f32.mrf.mxu1  ;;  %v7322_v9 = vor.u32 %v9374_v1, %v7319_v2  ;;  %v6910_v10 = vor.u32 %v9275_v4, %v6909_v3  ;;  %v7165_v30 = vld [vmem:[#allocation8 + $0x4d8] sm:$0xf]  ;;  %v9223_v2 = vld [vmem:[#allocation8 + $0x15c] sm:$0xf] }
 0x2fd   : > { %v10450_v59 = vadd.f32 %v2673_v53, %v2661_v51  ;;  %v2662_v60 = vpop.f32.mrf.mxu0  ;;  %v6813_v49 = vld [vmem:[#allocation8 + $0x218] sm:$0xf]  ;;  %v6719_v4 = vld [vmem:[#allocation8 + $0x178] sm:$0xf0] }
 0x2fe   : > { %2964 = vmatpush.bf16.msrb.mxu0 %v6750_v5  ;;  %2942 = vmatpush.bf16.msra.mxu2 %v7130_v20  ;;  %v7549_v5 = vld [vmem:[#allocation8 + $0x7d8] sm:$0xf]  ;;  %v6754_v60 = vor.u32 %v9231_v47, %v6751_v48  ;;  %v9207_v35 = vld [vmem:[#allocation8 + $0xdc] sm:$0xf] }
 0x2ff   : > { %2932 = vmatmul.bf16.vlgmr.msra.gmra.mxu1 %v10419_v54  ;;  %v7550_v14 = vor.u32 %v9435_v6, %v7549_v5  ;;  %v9427_v20 = vld [vmem:[#allocation8 + $0x7b4] sm:$0xf0]  ;;  %v9199_v48 = vld [vmem:[#allocation8 + $0x9c] sm:$0xf] }
 0x300   : > { %2976 = vmatpush.bf16.msrb.mxu1 %v7038_v13  ;;  %2954 = vmatpush.bf16.msra.mxu3 %v7418_v24  ;;  %v7229_v13 = vld [vmem:[#allocation8 + $0x558] sm:$0xf]  ;;  %v6590_v24 = vor.u32 %v9195_v12, %v6589_v11  ;;  %v7518_v33 = vor.u32 %v9427_v20, %v7517_v19  ;;  %v6722_v11 = vor.u32 %v9223_v2, %v6719_v4  ;;  %v6687_v19 = vld [vmem:[#allocation8 + $0x138] sm:$0xf0] }
 0x301   : > { %v7230_v22 = vor.u32 %v9355_v15, %v7229_v13  ;;  %v9251_v51 = vld [vmem:[#allocation8 + $0x234] sm:$0xf0]  ;;  %v9215_v15 = vld [vmem:[#allocation8 + $0x11c] sm:$0xf] }
 0x302   : > { %2965 = vmatpush.bf16.msrb.mxu0 %v6718_v23  ;;  %2943 = vmatpush.bf16.msra.mxu2 %v7098_v37  ;;  %v9259_v37 = vld [vmem:[#allocation8 + $0x274] sm:$0xf0] }
 0x303   : > { %v6846_v45 = vor.u32 %v9259_v37, %v6845_v36  ;;  %v9411_v53 = vld [vmem:[#allocation8 + $0x734] sm:$0xf0]  ;;  %v6655_v36 = vld [vmem:[#allocation8 + $0xf8] sm:$0xf0] }
 0x304   : > { %2977 = vmatpush.bf16.msrb.mxu1 %v7006_v28  ;;  %2955 = vmatpush.bf16.msra.mxu3 %v7386_v41  ;;  %v2675_v23 = vpop.f32.mrf.mxu1  ;;  %v7197_v28 = vld [vmem:[#allocation8 + $0x518] sm:$0xf]  ;;  %v6558_v41 = vor.u32 %v9187_v27, %v6557_v25  ;;  %v9287_v25 = vld [vmem:[#allocation8 + $0x35c] sm:$0xf] }
 0x305   : > { %v7198_v42 = vor.u32 %v9347_v29, %v7197_v28  ;;  %v7133_v0 = vld [vmem:[#allocation8 + $0x498] sm:$0xf]  ;;  %v6690_v29 = vor.u32 %v9215_v15, %v6687_v19  ;;  %v9423_v15 = vld [vmem:[#allocation8 + $0x79c] sm:$0xf] }
 0x306   : > { %2966 = vmatpush.bf16.msrb.mxu0 %v6686_v40  ;;  %2944 = vmatpush.bf16.msra.mxu2 %v7066_v52  ;;  %v10453_v32 = vpop.f32.mrf.mxu0  ;;  %v9419_v40 = vld [vmem:[#allocation8 + $0x774] sm:$0xf0] }
 0x307   : > { %v7486_v46 = vor.u32 %v9419_v40, %v7485_v38  ;;  %v7453_v52 = vld [vmem:[#allocation8 + $0x718] sm:$0xf]  ;;  %v9367_v38 = vld [vmem:[#allocation8 + $0x5dc] sm:$0xf] }
 0x308   : > { %2978 = vmatpush.bf16.msrb.mxu1 %v6974_v31  ;;  %2956 = vmatpush.bf16.msra.mxu3 %v7354_v61  ;;  %v9339_v31 = vld [vmem:[#allocation8 + $0x4f4] sm:$0xf0]  ;;  %v7454_v63 = vor.u32 %v9411_v53, %v7453_v52  ;;  %v7295_v40 = vld [vmem:[#allocation8 + $0x5f8] sm:$0xf0] }
 0x309   : > { %2945 = vmatmul.bf16.vlgmr.msra.gmra.mxu2 %v10423_v16  ;;  %v7166_v58 = vor.u32 %v9339_v31, %v7165_v30  ;;  %v9331_v1 = vld [vmem:[#allocation8 + $0x4b4] sm:$0xf0]  ;;  %v6943_v30 = vld [vmem:[#allocation8 + $0x338] sm:$0xf0]  ;;  %v7298_v47 = vor.u32 %v9367_v38, %v7295_v40 }
 0x30a   : > { %2967 = vmatpush.bf16.msrb.mxu0 %v6654_v55  ;;  %2989 = vmatpush.bf16.msrb.mxu2 %v7294_v56  ;;  %v9303_v56 = vld [vmem:[#allocation8 + $0x3dc] sm:$0xf]  ;;  %v7421_v5 = vld [vmem:[#allocation8 + $0x6d8] sm:$0xf] }
 0x30b   : > { %v10456_v50 = vpop.f32.mrf.mxu2  ;;  %v7042_v3 = vor.u32 %v9303_v56, %v7039_v57  ;;  %v9403_v6 = vld [vmem:[#allocation8 + $0x6f4] sm:$0xf0]  ;;  %v9359_v53 = vld [vmem:[#allocation8 + $0x59c] sm:$0xf] }
 0x30c   : > { %2979 = vmatpush.bf16.msrb.mxu1 %v6942_v62  ;;  %2957 = vmatpush.bf16.msra.mxu3 %v7322_v9  ;;  %v10458_v55 = vpop.f32.mrf.mxu1  ;;  %v6814_v62 = vor.u32 %v9251_v51, %v6813_v49  ;;  %v7134_v9 = vor.u32 %v9331_v1, %v7133_v0  ;;  %v7422_v12 = vor.u32 %v9403_v6, %v7421_v5  ;;  %v7101_v13 = vld [vmem:[#allocation8 + $0x458] sm:$0xf]  ;;  %v6623_v49 = vld [vmem:[#allocation8 + $0xb8] sm:$0xf0] }
 0x30d   : > { %v7389_v20 = vld [vmem:[#allocation8 + $0x698] sm:$0xf]  ;;  %v7263_v56 = vld [vmem:[#allocation8 + $0x5b8] sm:$0xf0] }
 0x30e   : > { %2968 = vmatpush.bf16.msrb.mxu0 %v6622_v7  ;;  %2990 = vmatpush.bf16.msrb.mxu2 %v7262_v8  ;;  %v2714_v61 = vpop.f32.mrf.mxu0  ;;  %v9295_v7 = vld [vmem:[#allocation8 + $0x39c] sm:$0xf]  ;;  %v9395_v23 = vld [vmem:[#allocation8 + $0x6b4] sm:$0xf0]  ;;  %v7266_v4 = vor.u32 %v9359_v53, %v7263_v56 }
 0x30f   : > { %2958 = vmatmul.bf16.vlgmr.msra.gmra.mxu3 %v10427_v44  ;;  %v7007_v8 = vld [vmem:[#allocation8 + $0x3b8] sm:$0xf0]  ;;  %v7069_v27 = vld [vmem:[#allocation8 + $0x418] sm:$0xf] }
 0x310   : > { %2980 = vmatpush.bf16.msrb.mxu1 %v6910_v10  ;;  %3002 = vmatpush.bf16.msrb.mxu3 %v7550_v14  ;;  %v9323_v14 = vld [vmem:[#allocation8 + $0x474] sm:$0xf0]  ;;  %v7010_v18 = vor.u32 %v9295_v7, %v7007_v8  ;;  %v9271_v61 = vld [vmem:[#allocation8 + $0x2dc] sm:$0xf] }
 0x311   : > { %v9315_v34 = vld [vmem:[#allocation8 + $0x434] sm:$0xf0]  ;;  %v9431_v0 = vld [vmem:[#allocation8 + $0x7dc] sm:$0xf] }
 0x312   : > { %2969 = vmatpush.bf16.msrb.mxu0 %v6590_v24  ;;  %2991 = vmatpush.bf16.msrb.mxu2 %v7230_v22  ;;  %v10461_v10 = vpop.f32.mrf.mxu3  ;;  %v6975_v22 = vld [vmem:[#allocation8 + $0x378] sm:$0xf0]  ;;  %v7070_v31 = vor.u32 %v9315_v34, %v7069_v27  ;;  %v7325_v57 = vld [vmem:[#allocation8 + $0x618] sm:$0xf]  ;;  %v9481_v34 = vld [vmem:[%s10393_s18 + $0x164] sm:$0xf0] }
 0x313   : > { %v2688_v17 = vpop.f32.mrf.mxu2  ;;  %v6978_v37 = vor.u32 %v9287_v25, %v6975_v22  ;;  %v7551_v1 = vld [vmem:[#allocation8 + $0x7f8] sm:$0xf0] }
 0x314   : > { %2981 = vmatpush.bf16.msrb.mxu1 %v6878_v26  ;;  %3003 = vmatpush.bf16.msrb.mxu3 %v7518_v33  ;;  %v2727_v24 = vpop.f32.mrf.mxu1  ;;  %v7102_v26 = vor.u32 %v9323_v14, %v7101_v13  ;;  %v7390_v33 = vor.u32 %v9395_v23, %v7389_v20  ;;  %v9191_v7 = vld [vmem:[#allocation8 + $0x5c] sm:$0xf] }
 0x315   : > { %v6591_v8 = vld [vmem:[#allocation8 + $0x78] sm:$0xf0] }
 0x316   : > { %2970 = vmatpush.bf16.msrb.mxu0 %v6558_v41  ;;  %2992 = vmatpush.bf16.msrb.mxu2 %v7198_v42  ;;  %v10464_v28 = vpop.f32.mrf.mxu0  ;;  %v7357_v41 = vld [vmem:[#allocation8 + $0x658] sm:$0xf]  ;;  %v9263_v13 = vld [vmem:[#allocation8 + $0x29c] sm:$0xf]  ;;  %v6594_v19 = vor.u32 %v9191_v7, %v6591_v8  ;;  %v9469_v7 = vld [vmem:[%s10393_s18 + $0x104] sm:$0xf0] }
 0x317   : > { %v9387_v42 = vld [vmem:[#allocation8 + $0x674] sm:$0xf0]  ;;  %v6879_v14 = vld [vmem:[#allocation8 + $0x2b8] sm:$0xf0] }
 0x318   : > { %2982 = vmatpush.bf16.msrb.mxu1 %v6846_v45  ;;  %3004 = vmatpush.bf16.msrb.mxu3 %v7486_v46  ;;  %v6658_v46 = vor.u32 %v9207_v35, %v6655_v36  ;;  %v7358_v51 = vor.u32 %v9387_v42, %v7357_v41  ;;  %v7519_v17 = vld [vmem:[#allocation8 + $0x7b8] sm:$0xf0]  ;;  %v6882_v24 = vor.u32 %v9263_v13, %v6879_v14 }
 0x319   : > { %2971 = vmatmul.bf16.vlgmr.msrb.gmra.mxu0 %v10415_v39  ;;  %v9183_v20 = vld [vmem:[#allocation8 + $0x1c] sm:$0xf] }
 0x31a   : > { %3015 = vmatpush.bf16.msra.mxu0 %v6786_v43  ;;  %2993 = vmatpush.bf16.msrb.mxu2 %v7166_v58  ;;  %v9279_v43 = vld [vmem:[#allocation8 + $0x31c] sm:$0xf]  ;;  %v2701_v45 = vpop.f32.mrf.mxu3 }
 0x31b   : > { %v6946_v52 = vor.u32 %v9279_v43, %v6943_v30  ;;  %v6559_v25 = vld [vmem:[#allocation8 + $0x38] sm:$0xf0] }
 0x31c   : > { %2983 = vmatpush.bf16.msrb.mxu1 %v6814_v62  ;;  %3005 = vmatpush.bf16.msrb.mxu3 %v7454_v63  ;;  %v10466_v58 = vpop.f32.mrf.mxu2  ;;  %v6911_v62 = vld [vmem:[#allocation8 + $0x2f8] sm:$0xf0]  ;;  %v10468_v63 = vpop.f32.mrf.mxu1  ;;  %v6562_v41 = vor.u32 %v9183_v20, %v6559_v25 }
 0x31d   : > { %v6914_v6 = vor.u32 %v9271_v61, %v6911_v62  ;;  %v9343_v22 = vld [vmem:[#allocation8 + $0x51c] sm:$0xf] }
 0x31e   : > { %3016 = vmatpush.bf16.msra.mxu0 %v6754_v60  ;;  %2994 = vmatpush.bf16.msrb.mxu2 %v7134_v9  ;;  %v9379_v60 = vld [vmem:[#allocation8 + $0x634] sm:$0xf0]  ;;  %v2766_v2 = vpop.f32.mrf.mxu0  ;;  %v9351_v9 = vld [vmem:[#allocation8 + $0x55c] sm:$0xf] }
 0x31f   : > { %2984 = vmatmul.bf16.vlgmr.msrb.gmra.mxu1 %v10419_v54  ;;  %v7326_v5 = vor.u32 %v9379_v60, %v7325_v57  ;;  %v9255_v35 = vld [vmem:[#allocation8 + $0x25c] sm:$0xf]  ;;  %v7917_v57 = vld [vmem:[%s10393_s18 + $0x2d0] sm:$0xf]  ;;  %v9529_v60 = vld [vmem:[%s10393_s18 + $0x2e4] sm:$0xf0] }
 0x320   : > { %3028 = vmatpush.bf16.msra.mxu1 %v7042_v3  ;;  %3006 = vmatpush.bf16.msrb.mxu3 %v7422_v12  ;;  %v6626_v3 = vor.u32 %v9199_v48, %v6623_v49  ;;  %v7231_v12 = vld [vmem:[#allocation8 + $0x578] sm:$0xf0]  ;;  %v9475_v48 = vld [vmem:[%s10393_s18 + $0x134] sm:$0xf0] }
 0x321   : > { %v7234_v23 = vor.u32 %v9351_v9, %v7231_v12  ;;  %v9415_v38 = vld [vmem:[#allocation8 + $0x75c] sm:$0xf]  ;;  %v9523_v12 = vld [vmem:[%s10393_s18 + $0x2b4] sm:$0xf0] }
 0x322   : > { %3017 = vmatpush.bf16.msra.mxu0 %v6722_v11  ;;  %2995 = vmatpush.bf16.msrb.mxu2 %v7102_v26  ;;  %v7554_v11 = vor.u32 %v9431_v0, %v7551_v1  ;;  %v7199_v26 = vld [vmem:[#allocation8 + $0x538] sm:$0xf0] }
 0x323   : > { %v7487_v40 = vld [vmem:[#allocation8 + $0x778] sm:$0xf0]  ;;  %v7202_v42 = vor.u32 %v9343_v22, %v7199_v26  ;;  %v7869_v22 = vld [vmem:[%s10393_s18 + $0x270] sm:$0xf]  ;;  %v9517_v26 = vld [vmem:[%s10393_s18 + $0x284] sm:$0xf0] }
 0x324   : > { %3029 = vmatpush.bf16.msra.mxu1 %v7010_v18  ;;  %3007 = vmatpush.bf16.msrb.mxu3 %v7390_v33  ;;  %v10471_v18 = vpop.f32.mrf.mxu3  ;;  %v2740_v27 = vpop.f32.mrf.mxu2  ;;  %v7725_v33 = vld [vmem:[%s10393_s18 + $0x150] sm:$0xf]  ;;  %v9335_v30 = vld [vmem:[#allocation8 + $0x4dc] sm:$0xf] }
 0x325   : > { %v2779_v36 = vpop.f32.mrf.mxu1  ;;  %v7726_v43 = vor.u32 %v9481_v34, %v7725_v33  ;;  %v9247_v49 = vld [vmem:[#allocation8 + $0x21c] sm:$0xf] }
 0x326   : > { %3018 = vmatpush.bf16.msra.mxu0 %v6690_v29  ;;  %2996 = vmatpush.bf16.msrb.mxu2 %v7070_v31  ;;  %v7522_v29 = vor.u32 %v9423_v15, %v7519_v17  ;;  %v7167_v31 = vld [vmem:[#allocation8 + $0x4f8] sm:$0xf0] }
 0x327   : > { %v7455_v53 = vld [vmem:[#allocation8 + $0x738] sm:$0xf0]  ;;  %v7170_v61 = vor.u32 %v9335_v30, %v7167_v31 }
 0x328   : > { %3030 = vmatpush.bf16.msra.mxu1 %v6978_v37  ;;  %3008 = vmatpush.bf16.msrb.mxu3 %v7358_v51  ;;  %v6847_v37 = vld [vmem:[#allocation8 + $0x278] sm:$0xf0] }
 0x329   : > { %2997 = vmatmul.bf16.vlgmr.msrb.gmra.mxu2 %v10423_v16  ;;  %v6850_v45 = vor.u32 %v9255_v35, %v6847_v37  ;;  %v6815_v51 = vld [vmem:[#allocation8 + $0x238] sm:$0xf0] }
 0x32a   : > { %3019 = vmatpush.bf16.msra.mxu0 %v6658_v46  ;;  %3041 = vmatpush.bf16.msra.mxu2 %v7298_v47  ;;  %v7490_v46 = vor.u32 %v9415_v38, %v7487_v40  ;;  %v7701_v47 = vld [vmem:[%s10393_s18 + $0x120] sm:$0xf]  ;;  %v6818_v1 = vor.u32 %v9247_v49, %v6815_v51  ;;  %v9399_v8 = vld [vmem:[#allocation8 + $0x6dc] sm:$0xf]  ;;  %v7629_v40 = vld [vmem:[%s10393_s18 + $0x90] sm:$0xf] }
 0x32b   : > { %v7702_v62 = vor.u32 %v9475_v48, %v7701_v47  ;;  %v7423_v9 = vld [vmem:[#allocation8 + $0x6f8] sm:$0xf0]  ;;  %v1356_v48 = vperm.slane %v10446_v21, 1 }
 0x32c   : > { %3031 = vmatpush.bf16.msra.mxu1 %v6946_v52  ;;  %3009 = vmatpush.bf16.msrb.mxu3 %v7326_v5  ;;  %v9407_v52 = vld [vmem:[#allocation8 + $0x71c] sm:$0xf]  ;;  %v2753_v56 = vpop.f32.mrf.mxu3  ;;  %v10480_v0 = vpop.f32.mrf.mxu2  ;;  %v7677_v5 = vld [vmem:[%s10393_s18 + $0xf0] sm:$0xf]  ;;  %v7426_v15 = vor.u32 %v9399_v8, %v7423_v9  ;;  %v9625_v8 = vld [vmem:[%s10393_s18 + $0x5e4] sm:$0xf0] }
 0x32d   : > { %v7458_v2 = vor.u32 %v9407_v52, %v7455_v53  ;;  %v7678_v14 = vor.u32 %v9469_v7, %v7677_v5  ;;  %v9319_v17 = vld [vmem:[#allocation8 + $0x45c] sm:$0xf]  ;;  %v7605_v52 = vld [vmem:[%s10393_s18 + $0x60] sm:$0xf]  ;;  %v9451_v53 = vld [vmem:[%s10393_s18 + $0x74] sm:$0xf0] }
 0x32e   : > { %3020 = vmatpush.bf16.msra.mxu0 %v6626_v3  ;;  %3042 = vmatpush.bf16.msra.mxu2 %v7266_v4  ;;  %v9327_v3 = vld [vmem:[#allocation8 + $0x49c] sm:$0xf]  ;;  %v8301_v7 = vld [vmem:[%s10393_s18 + $0x5d0] sm:$0xf]  ;;  %v7606_v9 = vor.u32 %v9451_v53, %v7605_v52  ;;  %v8469_v52 = vld [vmem:[%s10393_s18 + $0x720] sm:$0xf] }
 0x32f   : > { %3010 = vmatmul.bf16.vlgmr.msrb.gmra.mxu3 %v10427_v44  ;;  %v7135_v4 = vld [vmem:[#allocation8 + $0x4b8] sm:$0xf0]  ;;  %v9667_v53 = vld [vmem:[%s10393_s18 + $0x734] sm:$0xf0] }
 0x330   : > { %3032 = vmatpush.bf16.msra.mxu1 %v6914_v6  ;;  %3054 = vmatpush.bf16.msra.mxu3 %v7554_v11  ;;  %v7918_v6 = vor.u32 %v9529_v60, %v7917_v57  ;;  %v7893_v11 = vld [vmem:[%s10393_s18 + $0x2a0] sm:$0xf]  ;;  %v7138_v13 = vor.u32 %v9327_v3, %v7135_v4  ;;  %v7391_v25 = vld [vmem:[#allocation8 + $0x6b8] sm:$0xf0]  ;;  %v7821_v3 = vld [vmem:[%s10393_s18 + $0x210] sm:$0xf] }
 0x331   : > { %v7894_v20 = vor.u32 %v9523_v12, %v7893_v11  ;;  %v9311_v34 = vld [vmem:[#allocation8 + $0x41c] sm:$0xf]  ;;  %v9505_v4 = vld [vmem:[%s10393_s18 + $0x224] sm:$0xf0] }
 0x332   : > { %3021 = vmatpush.bf16.msra.mxu0 %v6594_v19  ;;  %3043 = vmatpush.bf16.msra.mxu2 %v7234_v23  ;;  %v7103_v19 = vld [vmem:[#allocation8 + $0x478] sm:$0xf0]  ;;  %v9463_v23 = vld [vmem:[%s10393_s18 + $0xd4] sm:$0xf0] }
 0x333   : > { %v7106_v33 = vor.u32 %v9319_v17, %v7103_v19  ;;  %v7071_v38 = vld [vmem:[#allocation8 + $0x438] sm:$0xf0]  ;;  %v8061_v17 = vld [vmem:[%s10393_s18 + $0x3f0] sm:$0xf]  ;;  %v2713_v19 = vadd.f32 %v10453_v32, %v1356_v48  ;;  %v7557_v32 = vld [vmem:[%s10393_s18] sm:$0xf] }
 0x334   : > { %3033 = vmatpush.bf16.msra.mxu1 %v6882_v24  ;;  %3055 = vmatpush.bf16.msra.mxu3 %v7522_v29  ;;  %v9391_v24 = vld [vmem:[#allocation8 + $0x69c] sm:$0xf]  ;;  %v10492_v27 = vpop.f32.mrf.mxu3  ;;  %v2792_v36 = vpop.f32.mrf.mxu2  ;;  %v7074_v47 = vor.u32 %v9311_v34, %v7071_v38  ;;  %v8013_v48 = vld [vmem:[%s10393_s18 + $0x390] sm:$0xf] }
 0x335   : > { %v7394_v37 = vor.u32 %v9391_v24, %v7391_v25  ;;  %v9383_v30 = vld [vmem:[#allocation8 + $0x65c] sm:$0xf]  ;;  %v9499_v24 = vld [vmem:[%s10393_s18 + $0x1f4] sm:$0xf0]  ;;  %v2687_v25 = vadd.f32 %v10456_v50, %v10450_v59 }
 0x336   : > { %3022 = vmatpush.bf16.msra.mxu0 %v6562_v41  ;;  %3044 = vmatpush.bf16.msra.mxu2 %v7202_v42  ;;  %v10494_v29 = vpop.f32.mrf.mxu0  ;;  %v9457_v41 = vld [vmem:[%s10393_s18 + $0xa4] sm:$0xf0]  ;;  %v8109_v42 = vld [vmem:[%s10393_s18 + $0x450] sm:$0xf]  ;;  %v7359_v31 = vld [vmem:[#allocation8 + $0x678] sm:$0xf0] }
 0x337   : > { %v7630_v49 = vor.u32 %v9457_v41, %v7629_v40  ;;  %v7362_v57 = vor.u32 %v9383_v30, %v7359_v31  ;;  %v2700_v34 = vadd.f32 %v10461_v10, %v2687_v25  ;;  %v9439_v36 = vld [vmem:[%s10393_s18 + $0x14] sm:$0xf0]  ;;  %v8493_v40 = vld [vmem:[%s10393_s18 + $0x750] sm:$0xf]  ;;  %v9673_v41 = vld [vmem:[%s10393_s18 + $0x764] sm:$0xf0] }
 0x338   : > { %3034 = vmatpush.bf16.msra.mxu1 %v6850_v45  ;;  %3056 = vmatpush.bf16.msra.mxu3 %v7490_v46  ;;  %v7845_v45 = vld [vmem:[%s10393_s18 + $0x240] sm:$0xf]  ;;  %v9511_v46 = vld [vmem:[%s10393_s18 + $0x254] sm:$0xf0]  ;;  %v9493_v10 = vld [vmem:[%s10393_s18 + $0x1c4] sm:$0xf0]  ;;  %v7558_v31 = vor.u32 %v9439_v36, %v7557_v32 }
 0x339   : > { %3023 = vmatmul.bf16.vlgmr.msra.gmra.mxu0 %v10415_v39  ;;  %v7653_v39 = vld [vmem:[%s10393_s18 + $0xc0] sm:$0xf]  ;;  %v7846_v60 = vor.u32 %v9511_v46, %v7845_v45  ;;  %v9613_v30 = vld [vmem:[%s10393_s18 + $0x584] sm:$0xf0]  ;;  %v3067_v45 = vmax.f32 %v2700_v34, 0.0 }
 0x33a   : > { %5401 = vmatpush.bf16.msrb.mxu0 %v7726_v43  ;;  %3045 = vmatpush.bf16.msra.mxu2 %v7170_v61  ;;  %v7654_v35 = vor.u32 %v9463_v23, %v7653_v39  ;;  %v9577_v43 = vld [vmem:[%s10393_s18 + $0x464] sm:$0xf0]  ;;  %v8085_v61 = vld [vmem:[%s10393_s18 + $0x420] sm:$0xf]  ;;  %v8302_v39 = vor.u32 %v9625_v8, %v8301_v7  ;;  %v8470_v7 = vor.u32 %v9667_v53, %v8469_v52  ;;  %v9595_v36 = vld [vmem:[%s10393_s18 + $0x4f4] sm:$0xf0] }
 0x33b   : > { %v8110_v51 = vor.u32 %v9577_v43, %v8109_v42  ;;  %v7797_v23 = vld [vmem:[%s10393_s18 + $0x1e0] sm:$0xf]  ;;  %v8253_v43 = vld [vmem:[%s10393_s18 + $0x570] sm:$0xf]  ;;  %v9769_v53 = vld [vmem:[%s10393_s18 + $0xa64] sm:$0xf0] }
 0x33c   : > { %3035 = vmatpush.bf16.msra.mxu1 %v6818_v1  ;;  %3057 = vmatpush.bf16.msra.mxu3 %v7458_v2  ;;  %v10505_v56 = vpop.f32.mrf.mxu1  ;;  %v9375_v1 = vld [vmem:[#allocation8 + $0x61c] sm:$0xf]  ;;  %v2805_v5 = vpop.f32.mrf.mxu3  ;;  %v8421_v32 = vld [vmem:[%s10393_s18 + $0x6c0] sm:$0xf]  ;;  %v8877_v52 = vld [vmem:[%s10393_s18 + $0xa50] sm:$0xf] }
 0x33d   : > { %v7327_v2 = vld [vmem:[#allocation8 + $0x638] sm:$0xf0] }
 0x33e   : > { %5402 = vmatpush.bf16.msrb.mxu0 %v7702_v62  ;;  %3046 = vmatpush.bf16.msra.mxu2 %v7138_v13  ;;  %v9571_v62 = vld [vmem:[%s10393_s18 + $0x434] sm:$0xf0]  ;;  %v7330_v12 = vor.u32 %v9375_v1, %v7327_v2  ;;  %v7822_v13 = vor.u32 %v9505_v4, %v7821_v3  ;;  %v8685_v1 = vld [vmem:[%s10393_s18 + $0x8d0] sm:$0xf]  ;;  %v9721_v2 = vld [vmem:[%s10393_s18 + $0x8e4] sm:$0xf0]  ;;  %v10551_v3 = vpack.c.bf16 %v3067_v45, %v3067_v45 }
 0x33f   : > { %3036 = vmatmul.bf16.vlgmr.msra.gmra.mxu1 %v10419_v54  ;;  %v7870_v54 = vor.u32 %v9517_v26, %v7869_v22  ;;  %v8086_v11 = vor.u32 %v9571_v62, %v8085_v61  ;;  %v8277_v22 = vld [vmem:[%s10393_s18 + $0x5a0] sm:$0xf]  ;;  %v9619_v26 = vld [vmem:[%s10393_s18 + $0x5b4] sm:$0xf0]  ;;  %v8397_v45 = vld [vmem:[%s10393_s18 + $0x690] sm:$0xf] }
 0x340   : > { %5414 = vmatpush.bf16.msrb.mxu1 %v7918_v6  ;;  %3058 = vmatpush.bf16.msra.mxu3 %v7426_v15  ;;  %v2818_v6 = vpop.f32.mrf.mxu0  ;;  %v9445_v15 = vld [vmem:[%s10393_s18 + $0x44] sm:$0xf0]  ;;  %v8278_v38 = vor.u32 %v9619_v26, %v8277_v22  ;;  %v8229_v61 = vld [vmem:[%s10393_s18 + $0x540] sm:$0xf]  ;;  %v9607_v62 = vld [vmem:[%s10393_s18 + $0x554] sm:$0xf0] }
 0x342   : > { %5403 = vmatpush.bf16.msrb.mxu0 %v7678_v14  ;;  %3047 = vmatpush.bf16.msra.mxu2 %v7106_v33  ;;  %v7581_v14 = vld [vmem:[%s10393_s18 + $0x30] sm:$0xf]  ;;  %v2726_v33 = vadd.f32 %v10458_v55, %v2713_v19  ;;  %v9559_v55 = vld [vmem:[%s10393_s18 + $0x3d4] sm:$0xf0]  ;;  %v8686_v19 = vor.u32 %v9721_v2, %v8685_v1 }
 0x343   : > { %v9643_v2 = vld [vmem:[%s10393_s18 + $0x674] sm:$0xf0] }
 0x344   : > { %5415 = vmatpush.bf16.msrb.mxu1 %v7894_v20  ;;  %3059 = vmatpush.bf16.msra.mxu3 %v7394_v37  ;;  %v9565_v20 = vld [vmem:[%s10393_s18 + $0x404] sm:$0xf0]  ;;  %v2831_v50 = vpop.f32.mrf.mxu1  ;;  %v8037_v37 = vld [vmem:[%s10393_s18 + $0x3c0] sm:$0xf]  ;;  %v2739_v42 = vadd.f32 %v10466_v58, %v2726_v33 }
 0x345   : > { %v8062_v59 = vor.u32 %v9565_v20, %v8061_v17  ;;  %v8038_v58 = vor.u32 %v9559_v55, %v8037_v37  ;;  %v9601_v17 = vld [vmem:[%s10393_s18 + $0x524] sm:$0xf0]  ;;  %v8661_v20 = vld [vmem:[%s10393_s18 + $0x8a0] sm:$0xf]  ;;  %v9655_v50 = vld [vmem:[%s10393_s18 + $0x6d4] sm:$0xf0] }
 0x346   : > { %5404 = vmatpush.bf16.msrb.mxu0 %v7654_v35  ;;  %3048 = vmatpush.bf16.msra.mxu2 %v7074_v47  ;;  %v7798_v35 = vor.u32 %v9499_v24, %v7797_v23  ;;  %v2752_v46 = vadd.f32 %v10471_v18, %v2739_v42  ;;  %v8494_v47 = vor.u32 %v9673_v41, %v8493_v40  ;;  %v1357_v18 = vperm.slane %v10446_v21, 2  ;;  %v9715_v23 = vld [vmem:[%s10393_s18 + $0x8b4] sm:$0xf0]  ;;  %v9709_v40 = vld [vmem:[%s10393_s18 + $0x884] sm:$0xf0] }
 0x347   : > { %v1358_v24 = vperm.slane %v10446_v21, 3  ;;  %v8662_v37 = vor.u32 %v9715_v23, %v8661_v20  ;;  %v9637_v20 = vld [vmem:[%s10393_s18 + $0x644] sm:$0xf0] }
 0x348   : > { %5416 = vmatpush.bf16.msrb.mxu1 %v7870_v54  ;;  %3060 = vmatpush.bf16.msra.mxu3 %v7362_v57  ;;  %v7773_v54 = vld [vmem:[%s10393_s18 + $0x1b0] sm:$0xf]  ;;  %v7749_v57 = vld [vmem:[%s10393_s18 + $0x180] sm:$0xf]  ;;  %v3068_v4 = vmax.f32 %v2752_v46, 0.0 }
 0x349   : > { %3049 = vmatmul.bf16.vlgmr.msra.gmra.mxu2 %v10423_v16  ;;  %v7582_v16 = vor.u32 %v9445_v15, %v7581_v14  ;;  %v9661_v14 = vld [vmem:[%s10393_s18 + $0x704] sm:$0xf0]  ;;  %v8205_v15 = vld [vmem:[%s10393_s18 + $0x510] sm:$0xf]  ;;  %v2817_v41 = vadd.f32 %v10494_v29, %v1358_v24 }
 0x34a   : > { %5405 = vmatpush.bf16.msrb.mxu0 %v7630_v49  ;;  %5427 = vmatpush.bf16.msrb.mxu2 %v8110_v51  ;;  %v9553_v49 = vld [vmem:[%s10393_s18 + $0x3a4] sm:$0xf0]  ;;  %v7774_v51 = vor.u32 %v9493_v10, %v7773_v54  ;;  %v8206_v33 = vor.u32 %v9601_v17, %v8205_v15  ;;  %v10568_v34 = vpack.c.bf16 %v3068_v4, %v3068_v4  ;;  %v8133_v4 = vld [vmem:[%s10393_s18 + $0x480] sm:$0xf] }
 0x34b   : > { %v8014_v5 = vor.u32 %v9553_v49, %v8013_v48  ;;  %v2830_v29 = vadd.f32 %v10505_v56, %v2817_v41  ;;  %v9649_v46 = vld [vmem:[%s10393_s18 + $0x6a4] sm:$0xf0]  ;;  %v8613_v49 = vld [vmem:[%s10393_s18 + $0x840] sm:$0xf] }
 0x34c   : > { %5417 = vmatpush.bf16.msrb.mxu1 %v7846_v60  ;;  %3061 = vmatpush.bf16.msra.mxu3 %v7330_v12  ;;  %v9487_v60 = vld [vmem:[%s10393_s18 + $0x194] sm:$0xf0]  ;;  %v2842_v6 = vpop.f32.mrf.mxu2  ;;  %v8398_v56 = vor.u32 %v9649_v46, %v8397_v45  ;;  %v8805_v41 = vld [vmem:[%s10393_s18 + $0x9c0] sm:$0xf]  ;;  %v9526_v46 = vld [vmem:[%s10393_s18 + $0x2d4] sm:$0xf] }
 0x34d   : > { %v7750_v8 = vor.u32 %v9487_v60, %v7749_v57  ;;  %v9547_v12 = vld [vmem:[%s10393_s18 + $0x374] sm:$0xf0]  ;;  %v8517_v45 = vld [vmem:[%s10393_s18 + $0x780] sm:$0xf] }
 0x34e   : > { %5406 = vmatpush.bf16.msrb.mxu0 %v7606_v9  ;;  %5428 = vmatpush.bf16.msrb.mxu2 %v8086_v11  ;;  %v8230_v9 = vor.u32 %v9607_v62, %v8229_v61  ;;  %v7989_v11 = vld [vmem:[%s10393_s18 + $0x360] sm:$0xf] }
 0x34f   : > { %3062 = vmatmul.bf16.vlgmr.msra.gmra.mxu3 %v10427_v44  ;;  %v8254_v44 = vor.u32 %v9613_v30, %v8253_v43  ;;  %v7990_v25 = vor.u32 %v9547_v12, %v7989_v11  ;;  %v7941_v30 = vld [vmem:[%s10393_s18 + $0x300] sm:$0xf]  ;;  %v9697_v11 = vld [vmem:[%s10393_s18 + $0x824] sm:$0xf0] }
 0x350   : > { %5418 = vmatpush.bf16.msrb.mxu1 %v7822_v13  ;;  %5440 = vmatpush.bf16.msrb.mxu3 %v8302_v39  ;;  %v8445_v13 = vld [vmem:[%s10393_s18 + $0x6f0] sm:$0xf]  ;;  %v2765_v39 = vadd.f32 %v10464_v28, %v1357_v18  ;;  %v9541_v28 = vld [vmem:[%s10393_s18 + $0x344] sm:$0xf0]  ;;  %v8373_v62 = vld [vmem:[%s10393_s18 + $0x660] sm:$0xf] }
 0x351   : > { %v8446_v26 = vor.u32 %v9661_v14, %v8445_v13  ;;  %v8853_v12 = vld [vmem:[%s10393_s18 + $0xa20] sm:$0xf]  ;;  %v9763_v13 = vld [vmem:[%s10393_s18 + $0xa34] sm:$0xf0]  ;;  %v8374_v15 = vor.u32 %v9643_v2, %v8373_v62 }
 0x352   : > { %5407 = vmatpush.bf16.msrb.mxu0 %v7582_v16  ;;  %5429 = vmatpush.bf16.msrb.mxu2 %v8062_v59  ;;  %v2778_v22 = vadd.f32 %v10468_v63, %v2765_v39  ;;  %v7965_v16 = vld [vmem:[%s10393_s18 + $0x330] sm:$0xf]  ;;  %v2855_v59 = vpop.f32.mrf.mxu3  ;;  %v8854_v24 = vor.u32 %v9763_v13, %v8853_v12  ;;  %v9739_v2 = vld [vmem:[%s10393_s18 + $0x974] sm:$0xf0]  ;;  %v9514_v12 = vld [vmem:[%s10393_s18 + $0x274] sm:$0xf] }
 0x353   : > { %v7966_v54 = vor.u32 %v9541_v28, %v7965_v16  ;;  %v8349_v39 = vld [vmem:[%s10393_s18 + $0x630] sm:$0xf]  ;;  %v7871_v13 = vld [vmem:[%s10393_s18 + $0x288] sm:$0xf0] }
 0x354   : > { %5419 = vmatpush.bf16.msrb.mxu1 %v7798_v35  ;;  %5441 = vmatpush.bf16.msrb.mxu3 %v8278_v38  ;;  %v8181_v35 = vld [vmem:[%s10393_s18 + $0x4e0] sm:$0xf]  ;;  %v2791_v63 = vadd.f32 %v10480_v0, %v2778_v22  ;;  %v8637_v38 = vld [vmem:[%s10393_s18 + $0x870] sm:$0xf]  ;;  %v2844_v42 = vpop.f32.mrf.mxu2  ;;  %v8422_v0 = vor.u32 %v9655_v50, %v8421_v32  ;;  %v9691_v22 = vld [vmem:[%s10393_s18 + $0x7f4] sm:$0xf0]  ;;  %v8350_v16 = vor.u32 %v9637_v20, %v8349_v39 }
 0x355   : > { %v8182_v43 = vor.u32 %v9595_v36, %v8181_v35  ;;  %v8638_v48 = vor.u32 %v9709_v40, %v8637_v38  ;;  %v9631_v50 = vld [vmem:[%s10393_s18 + $0x614] sm:$0xf0]  ;;  %v9478_v35 = vld [vmem:[%s10393_s18 + $0x154] sm:$0xf]  ;;  %v8541_v38 = vld [vmem:[%s10393_s18 + $0x7b0] sm:$0xf] }
 0x356   : > { %5408 = vmatpush.bf16.msrb.mxu0 %v7558_v31  ;;  %5430 = vmatpush.bf16.msrb.mxu2 %v8038_v58  ;;  %v10574_v55 = vpop.f32.mrf.mxu0  ;;  %v2804_v10 = vadd.f32 %v10492_v27, %v2791_v63  ;;  %v9535_v31 = vld [vmem:[%s10393_s18 + $0x314] sm:$0xf0]  ;;  %v8157_v58 = vld [vmem:[%s10393_s18 + $0x4b0] sm:$0xf]  ;;  %v7727_v63 = vld [vmem:[%s10393_s18 + $0x168] sm:$0xf0] }
 0x357   : > { %v9703_v27 = vld [vmem:[%s10393_s18 + $0x854] sm:$0xf0]  ;;  %v9685_v40 = vld [vmem:[%s10393_s18 + $0x7c4] sm:$0xf0] }
 0x358   : > { %5420 = vmatpush.bf16.msrb.mxu1 %v7774_v51  ;;  %5442 = vmatpush.bf16.msrb.mxu3 %v8254_v44  ;;  %v2843_v51 = vadd.f32 %v2842_v6, %v2830_v29  ;;  %v7942_v44 = vor.u32 %v9535_v31, %v7941_v30  ;;  %v3069_v57 = vmax.f32 %v2804_v10, 0.0  ;;  %v8614_v6 = vor.u32 %v9703_v27, %v8613_v49  ;;  %v7703_v30 = vld [vmem:[%s10393_s18 + $0x138] sm:$0xf0]  ;;  %v9679_v29 = vld [vmem:[%s10393_s18 + $0x794] sm:$0xf0] }
 0x359   : > { %5409 = vmatmul.bf16.vlgmr.msrb.gmra.mxu0 %v10551_v3  ;;  %v1359_v10 = vperm.slane %v10446_v21, 4  ;;  %v8542_v31 = vor.u32 %v9685_v40, %v8541_v38  ;;  %v9745_v49 = vld [vmem:[%s10393_s18 + $0x9a4] sm:$0xf0]  ;;  %v9574_v38 = vld [vmem:[%s10393_s18 + $0x454] sm:$0xf] }
 0x35a   : > { %5453 = vmatpush.bf16.msra.mxu0 %v8494_v47  ;;  %5431 = vmatpush.bf16.msrb.mxu2 %v8014_v5  ;;  %v9589_v47 = vld [vmem:[%s10393_s18 + $0x4c4] sm:$0xf0]  ;;  %v2856_v18 = vadd.f32 %v2855_v59, %v2843_v51  ;;  %v2857_v1 = vpop.f32.mrf.mxu3  ;;  %v9583_v5 = vld [vmem:[%s10393_s18 + $0x494] sm:$0xf0]  ;;  %v10602_v14 = vpack.c.bf16 %v3069_v57, %v3069_v57  ;;  %v8325_v59 = vld [vmem:[%s10393_s18 + $0x600] sm:$0xf] }
 0x35b   : > { %v8158_v61 = vor.u32 %v9589_v47, %v8157_v58  ;;  %v8134_v17 = vor.u32 %v9583_v5, %v8133_v4  ;;  %v8326_v42 = vor.u32 %v9631_v50, %v8325_v59  ;;  %v7919_v47 = vld [vmem:[%s10393_s18 + $0x2e8] sm:$0xf0]  ;;  %v8757_v1 = vld [vmem:[%s10393_s18 + $0x960] sm:$0xf]  ;;  %v9727_v50 = vld [vmem:[%s10393_s18 + $0x914] sm:$0xf0] }
 0x35c   : > { %5421 = vmatpush.bf16.msrb.mxu1 %v7750_v8  ;;  %5443 = vmatpush.bf16.msrb.mxu3 %v8230_v9  ;;  %v10592_v60 = vpop.f32.mrf.mxu1  ;;  %v8589_v9 = vld [vmem:[%s10393_s18 + $0x810] sm:$0xf]  ;;  %v7679_v57 = vld [vmem:[%s10393_s18 + $0x108] sm:$0xf0] }
 0x35d   : > { %v8590_v23 = vor.u32 %v9697_v11, %v8589_v9  ;;  %v8758_v9 = vor.u32 %v9739_v2, %v8757_v1  ;;  %v8111_v40 = vld [vmem:[%s10393_s18 + $0x468] sm:$0xf0]  ;;  %v9562_v2 = vld [vmem:[%s10393_s18 + $0x3f4] sm:$0xf] }
 0x35e   : > { %5454 = vmatpush.bf16.msra.mxu0 %v8470_v7  ;;  %5432 = vmatpush.bf16.msrb.mxu2 %v7990_v25  ;;  %v8878_v7 = vor.u32 %v9769_v53, %v8877_v52  ;;  %v2870_v8 = vpop.f32.mrf.mxu0  ;;  %v8565_v25 = vld [vmem:[%s10393_s18 + $0x7e0] sm:$0xf]  ;;  %v2869_v52 = vadd.f32 %v10574_v55, %v1359_v10  ;;  %v9466_v53 = vld [vmem:[%s10393_s18 + $0xf4] sm:$0xf] }
 0x35f   : > { %5422 = vmatmul.bf16.vlgmr.msrb.gmra.mxu1 %v10568_v34  ;;  %v8566_v36 = vor.u32 %v9691_v22, %v8565_v25  ;;  %v7682_v5 = vor.u32 %v9466_v53, %v7679_v57  ;;  %v7631_v25 = vld [vmem:[%s10393_s18 + $0xa8] sm:$0xf0]  ;;  %v7874_v22 = vor.u32 %v9514_v12, %v7871_v13  ;;  %v9496_v53 = vld [vmem:[%s10393_s18 + $0x1e4] sm:$0xf]  ;;  %v7799_v57 = vld [vmem:[%s10393_s18 + $0x1f8] sm:$0xf0] }
 0x360   : > { %5466 = vmatpush.bf16.msra.mxu1 %v8686_v19  ;;  %5444 = vmatpush.bf16.msrb.mxu3 %v8206_v33  ;;  %v3070_v19 = vmax.f32 %v2856_v18, 0.0  ;;  %v9757_v33 = vld [vmem:[%s10393_s18 + $0xa04] sm:$0xf0]  ;;  %v7895_v18 = vld [vmem:[%s10393_s18 + $0x2b8] sm:$0xf0]  ;;  %v2882_v4 = vadd.f32 %v10592_v60, %v2869_v52 }
 0x361   : > { %v7775_v12 = vld [vmem:[%s10393_s18 + $0x1c8] sm:$0xf0] }
 0x362   : > { %5455 = vmatpush.bf16.msra.mxu0 %v8446_v26  ;;  %5433 = vmatpush.bf16.msrb.mxu2 %v7966_v54  ;;  %v8829_v26 = vld [vmem:[%s10393_s18 + $0x9f0] sm:$0xf]  ;;  %v10611_v32 = vpack.c.bf16 %v3070_v19, %v3070_v19  ;;  %v9751_v54 = vld [vmem:[%s10393_s18 + $0x9d4] sm:$0xf0]  ;;  %v9733_v19 = vld [vmem:[%s10393_s18 + $0x944] sm:$0xf0] }
 0x363   : > { %v8806_v58 = vor.u32 %v9751_v54, %v8805_v41  ;;  %v9448_v54 = vld [vmem:[%s10393_s18 + $0x64] sm:$0xf] }
 0x364   : > { %5467 = vmatpush.bf16.msra.mxu1 %v8662_v37  ;;  %5445 = vmatpush.bf16.msrb.mxu3 %v8182_v43  ;;  %v2883_v28 = vpop.f32.mrf.mxu1  ;;  %v8830_v37 = vor.u32 %v9757_v33, %v8829_v26  ;;  %v9472_v43 = vld [vmem:[%s10393_s18 + $0x124] sm:$0xf]  ;;  %v7847_v33 = vld [vmem:[%s10393_s18 + $0x258] sm:$0xf0] }
 0x365   : > { %v7706_v51 = vor.u32 %v9472_v43, %v7703_v30  ;;  %v9508_v26 = vld [vmem:[%s10393_s18 + $0x244] sm:$0xf]  ;;  %v8709_v28 = vld [vmem:[%s10393_s18 + $0x900] sm:$0xf]  ;;  %v9502_v43 = vld [vmem:[%s10393_s18 + $0x214] sm:$0xf] }
 0x366   : > { %5456 = vmatpush.bf16.msra.mxu0 %v8422_v0  ;;  %5434 = vmatpush.bf16.msrb.mxu2 %v7942_v44  ;;  %v7730_v0 = vor.u32 %v9478_v35, %v7727_v63  ;;  %v8518_v44 = vor.u32 %v9679_v29, %v8517_v45  ;;  %v9069_v35 = vld [vmem:[%s10393_s18 + $0xbd0] sm:$0xf]  ;;  %v7850_v10 = vor.u32 %v9508_v26, %v7847_v33  ;;  %v7823_v30 = vld [vmem:[%s10393_s18 + $0x228] sm:$0xf0]  ;;  %v8471_v26 = vld [vmem:[%s10393_s18 + $0x738] sm:$0xf0] }
 0x367   : > { %v8114_v29 = vor.u32 %v9574_v38, %v8111_v40  ;;  %v7826_v52 = vor.u32 %v9502_v43, %v7823_v30  ;;  %v9484_v33 = vld [vmem:[%s10393_s18 + $0x184] sm:$0xf]  ;;  %v8015_v38 = vld [vmem:[%s10393_s18 + $0x3a8] sm:$0xf0]  ;;  %v8949_v43 = vld [vmem:[%s10393_s18 + $0xae0] sm:$0xf] }
 0x368   : > { %5468 = vmatpush.bf16.msra.mxu1 %v8638_v48  ;;  %5446 = vmatpush.bf16.msrb.mxu3 %v8158_v61  ;;  %v8781_v48 = vld [vmem:[%s10393_s18 + $0x990] sm:$0xf]  ;;  %v9520_v61 = vld [vmem:[%s10393_s18 + $0x2a4] sm:$0xf]  ;;  %v9787_v30 = vld [vmem:[%s10393_s18 + $0xaf4] sm:$0xf0] }
 0x369   : > { %5435 = vmatmul.bf16.vlgmr.msrb.gmra.mxu2 %v10602_v14  ;;  %v8782_v62 = vor.u32 %v9745_v49, %v8781_v48  ;;  %v7898_v8 = vor.u32 %v9520_v61, %v7895_v18  ;;  %v9568_v49 = vld [vmem:[%s10393_s18 + $0x424] sm:$0xf]  ;;  %v9021_v61 = vld [vmem:[%s10393_s18 + $0xb70] sm:$0xf] }
 0x36a   : > { %5457 = vmatpush.bf16.msra.mxu0 %v8398_v56  ;;  %5479 = vmatpush.bf16.msra.mxu2 %v8878_v7  ;;  %v7922_v56 = vor.u32 %v9526_v46, %v7919_v47  ;;  %v7655_v7 = vld [vmem:[%s10393_s18 + $0xd8] sm:$0xf0]  ;;  %v9045_v46 = vld [vmem:[%s10393_s18 + $0xba0] sm:$0xf] }
 0x36c   : > { %5469 = vmatpush.bf16.msra.mxu1 %v8614_v6  ;;  %5447 = vmatpush.bf16.msrb.mxu3 %v8134_v17  ;;  %v2894_v27 = vpop.f32.mrf.mxu2  ;;  %v9460_v6 = vld [vmem:[%s10393_s18 + $0xc4] sm:$0xf]  ;;  %v8733_v17 = vld [vmem:[%s10393_s18 + $0x930] sm:$0xf] }
 0x36d   : > { %v2895_v55 = vadd.f32 %v2894_v27, %v2882_v4  ;;  %v7658_v20 = vor.u32 %v9460_v6, %v7655_v7  ;;  %v8087_v27 = vld [vmem:[%s10393_s18 + $0x438] sm:$0xf0]  ;;  %v8063_v4 = vld [vmem:[%s10393_s18 + $0x408] sm:$0xf0]  ;;  %v9670_v7 = vld [vmem:[%s10393_s18 + $0x754] sm:$0xf] }
 0x36e   : > { %5458 = vmatpush.bf16.msra.mxu0 %v8374_v15  ;;  %5480 = vmatpush.bf16.msra.mxu2 %v8854_v24  ;;  %v9454_v24 = vld [vmem:[%s10393_s18 + $0x94] sm:$0xf]  ;;  %v7559_v6 = vld [vmem:[%s10393_s18 + $0x18] sm:$0xf0]  ;;  %v8066_v13 = vor.u32 %v9562_v2, %v8063_v4  ;;  %v8687_v2 = vld [vmem:[%s10393_s18 + $0x8e8] sm:$0xf0] }
 0x36f   : > { %5448 = vmatmul.bf16.vlgmr.msrb.gmra.mxu3 %v10611_v32 }
 0x370   : > { %5470 = vmatpush.bf16.msra.mxu1 %v8590_v23 }
 0x372   : > { %5459 = vmatpush.bf16.msra.mxu0 %v8350_v16  ;;  %5481 = vmatpush.bf16.msra.mxu2 %v8830_v37  ;;  %v2907_v11 = vpop.f32.mrf.mxu3  ;;  %v8734_v16 = vor.u32 %v9733_v19, %v8733_v17  ;;  %v7634_v37 = vor.u32 %v9454_v24, %v7631_v25  ;;  %v9799_v17 = vld [vmem:[%s10393_s18 + $0xb54] sm:$0xf0]  ;;  %v9664_v25 = vld [vmem:[%s10393_s18 + $0x724] sm:$0xf] }
 0x373   : > { %v2908_v60 = vadd.f32 %v2907_v11, %v2895_v55  ;;  %v9436_v55 = vld [vmem:[%s10393_s18 + $0x4] sm:$0xf]  ;;  %v9490_v11 = vld [vmem:[%s10393_s18 + $0x1b4] sm:$0xf]  ;;  %v8474_v40 = vor.u32 %v9664_v25, %v8471_v26 }
 0x374   : > { %5471 = vmatpush.bf16.msra.mxu1 %v8566_v36  ;;  %v2896_v39 = vpop.f32.mrf.mxu2  ;;  %v9817_v36 = vld [vmem:[%s10393_s18 + $0xbe4] sm:$0xf0]  ;;  %v7562_v19 = vor.u32 %v9436_v55, %v7559_v6  ;;  %v8399_v55 = vld [vmem:[%s10393_s18 + $0x6a8] sm:$0xf0]  ;;  %v9622_v25 = vld [vmem:[%s10393_s18 + $0x5d4] sm:$0xf] }
 0x375   : > { %v3071_v23 = vmax.f32 %v2908_v60, 0.0  ;;  %v9070_v63 = vor.u32 %v9817_v36, %v9069_v35  ;;  %v8997_v60 = vld [vmem:[%s10393_s18 + $0xb40] sm:$0xf]  ;;  %v8973_v35 = vld [vmem:[%s10393_s18 + $0xb10] sm:$0xf] }
 0x376   : > { %5460 = vmatpush.bf16.msra.mxu0 %v8326_v42  ;;  %5482 = vmatpush.bf16.msra.mxu2 %v8806_v58  ;;  %v10643_v15 = vpop.f32.mrf.mxu0  ;;  %v7607_v42 = vld [vmem:[%s10393_s18 + $0x78] sm:$0xf0]  ;;  %v9811_v58 = vld [vmem:[%s10393_s18 + $0xbb4] sm:$0xf0]  ;;  %v8998_v39 = vor.u32 %v9799_v17, %v8997_v60  ;;  %v9793_v36 = vld [vmem:[%s10393_s18 + $0xb24] sm:$0xf0] }
 0x377   : > { %v10652_v59 = vpack.c.bf16 %v3071_v23, %v3071_v23  ;;  %5492 = vmatpush.bf16.msra.mxu3 %v9070_v63  ;;  %v7610_v47 = vor.u32 %v9448_v54, %v7607_v42  ;;  %v9046_v48 = vor.u32 %v9811_v58, %v9045_v46  ;;  %v8039_v23 = vld [vmem:[%s10393_s18 + $0x3d8] sm:$0xf0]  ;;  %v9550_v63 = vld [vmem:[%s10393_s18 + $0x394] sm:$0xf]  ;;  %v9544_v46 = vld [vmem:[%s10393_s18 + $0x364] sm:$0xf] }
 0x378   : > { %5472 = vmatpush.bf16.msra.mxu1 %v8542_v31  ;;  %v8710_v31 = vor.u32 %v9727_v50, %v8709_v28  ;;  %v1360_v28 = vperm.slane %v10446_v21, 5  ;;  %v9658_v54 = vld [vmem:[%s10393_s18 + $0x6f4] sm:$0xf]  ;;  %v7991_v58 = vld [vmem:[%s10393_s18 + $0x378] sm:$0xf0] }
 0x379   : > { %5461 = vmatmul.bf16.vlgmr.msra.gmra.mxu0 %v10652_v59  ;;  %v7943_v60 = vld [vmem:[%s10393_s18 + $0x318] sm:$0xf0] }
 0x37a   : > { %5505 = vmatpush.bf16.msrb.mxu0 %v7730_v0  ;;  %5483 = vmatpush.bf16.msra.mxu2 %v8782_v62  ;;  %v2909_v0 = vpop.f32.mrf.mxu3  ;;  %v9805_v62 = vld [vmem:[%s10393_s18 + $0xb84] sm:$0xf0] }
 0x37b   : > { %5493 = vmatpush.bf16.msra.mxu3 %v9046_v48  ;;  %v9022_v1 = vor.u32 %v9805_v62, %v9021_v61  ;;  %v8447_v0 = vld [vmem:[%s10393_s18 + $0x708] sm:$0xf0] }
 0x37c   : > { %5473 = vmatpush.bf16.msra.mxu1 %v8518_v44  ;;  %v10659_v41 = vpop.f32.mrf.mxu1  ;;  %v7583_v44 = vld [vmem:[%s10393_s18 + $0x48] sm:$0xf0]  ;;  %v8450_v48 = vor.u32 %v9658_v54, %v8447_v0  ;;  %v9634_v54 = vld [vmem:[%s10393_s18 + $0x634] sm:$0xf] }
 0x37e   : > { %5506 = vmatpush.bf16.msrb.mxu0 %v7706_v51  ;;  %5484 = vmatpush.bf16.msra.mxu2 %v8758_v9  ;;  %v2922_v45 = vpop.f32.mrf.mxu0  ;;  %v9442_v51 = vld [vmem:[%s10393_s18 + $0x34] sm:$0xf]  ;;  %v8495_v9 = vld [vmem:[%s10393_s18 + $0x768] sm:$0xf0] }
 0x37f   : > { %v7586_v18 = vor.u32 %v9442_v51, %v7583_v44  ;;  %5494 = vmatpush.bf16.msra.mxu3 %v9022_v1  ;;  %v8498_v24 = vor.u32 %v9670_v7, %v8495_v9  ;;  %v8018_v45 = vor.u32 %v9550_v63, %v8015_v38  ;;  %v7994_v51 = vor.u32 %v9544_v46, %v7991_v58  ;;  %v8925_v44 = vld [vmem:[%s10393_s18 + $0xab0] sm:$0xf]  ;;  %v9718_v1 = vld [vmem:[%s10393_s18 + $0x8d4] sm:$0xf]  ;;  %v9775_v9 = vld [vmem:[%s10393_s18 + $0xa94] sm:$0xf0] }
 0x380   : > { %5518 = vmatpush.bf16.msrb.mxu1 %v7922_v56  ;;  %v8090_v56 = vor.u32 %v9568_v49, %v8087_v27  ;;  %v9652_v49 = vld [vmem:[%s10393_s18 + $0x6c4] sm:$0xf]  ;;  %v8423_v27 = vld [vmem:[%s10393_s18 + $0x6d8] sm:$0xf0]  ;;  %v9706_v63 = vld [vmem:[%s10393_s18 + $0x874] sm:$0xf] }
 0x381   : > { %v8639_v38 = vld [vmem:[%s10393_s18 + $0x888] sm:$0xf0]  ;;  %v9628_v58 = vld [vmem:[%s10393_s18 + $0x604] sm:$0xf] }
 0x382   : > { %5507 = vmatpush.bf16.msrb.mxu0 %v7682_v5  ;;  %5485 = vmatpush.bf16.msra.mxu2 %v8734_v16  ;;  %v7751_v16 = vld [vmem:[%s10393_s18 + $0x198] sm:$0xf0]  ;;  %v8642_v0 = vor.u32 %v9706_v63, %v8639_v38 }
 0x383   : > { %5495 = vmatpush.bf16.msra.mxu3 %v8998_v39  ;;  %v7754_v42 = vor.u32 %v9484_v33, %v7751_v16  ;;  %v9640_v39 = vld [vmem:[%s10393_s18 + $0x664] sm:$0xf] }
 0x384   : > { %5519 = vmatpush.bf16.msrb.mxu1 %v7898_v8  ;;  %v2935_v5 = vpop.f32.mrf.mxu1  ;;  %v7802_v8 = vor.u32 %v9496_v53, %v7799_v57 }
 0x385   : > { %v9646_v5 = vld [vmem:[%s10393_s18 + $0x694] sm:$0xf] }
 0x386   : > { %5508 = vmatpush.bf16.msrb.mxu0 %v7658_v20  ;;  %5486 = vmatpush.bf16.msra.mxu2 %v8710_v31  ;;  %v9556_v20 = vld [vmem:[%s10393_s18 + $0x3c4] sm:$0xf]  ;;  %v2921_v31 = vadd.f32 %v10643_v15, %v1360_v28 }
 0x387   : > { %v8042_v50 = vor.u32 %v9556_v20, %v8039_v23  ;;  %v9712_v20 = vld [vmem:[%s10393_s18 + $0x8a4] sm:$0xf]  ;;  %v8663_v23 = vld [vmem:[%s10393_s18 + $0x8b8] sm:$0xf0] }
 0x388   : > { %5520 = vmatpush.bf16.msrb.mxu1 %v7874_v22  ;;  %v7778_v22 = vor.u32 %v9490_v11, %v7775_v12  ;;  %v8690_v11 = vor.u32 %v9718_v1, %v8687_v2  ;;  %v9598_v2 = vld [vmem:[%s10393_s18 + $0x514] sm:$0xf] }
 0x38a   : > { %5509 = vmatpush.bf16.msrb.mxu0 %v7634_v37  ;;  %5531 = vmatpush.bf16.msrb.mxu2 %v8114_v29  ;;  %v8974_v37 = vor.u32 %v9793_v36, %v8973_v35  ;;  %v8950_v29 = vor.u32 %v9787_v30, %v8949_v43  ;;  %v9616_v35 = vld [vmem:[%s10393_s18 + $0x5a4] sm:$0xf]  ;;  %v9610_v43 = vld [vmem:[%s10393_s18 + $0x574] sm:$0xf]  ;;  %v8255_v30 = vld [vmem:[%s10393_s18 + $0x588] sm:$0xf0] }
 0x38b   : > { %v8258_v46 = vor.u32 %v9610_v43, %v8255_v30  ;;  %v9458_v43 = vld [vmem:[%s10393_s18 + $0xac] sm:$0xf0]  ;;  %v9766_v30 = vld [vmem:[%s10393_s18 + $0xa54] sm:$0xf] }
 0x38c   : > { %5521 = vmatpush.bf16.msrb.mxu1 %v7850_v10  ;;  %v2946_v10 = vpop.f32.mrf.mxu2  ;;  %5496 = vmatpush.bf16.msra.mxu3 %v8974_v37 }
 0x38e   : > { %5510 = vmatpush.bf16.msrb.mxu0 %v7610_v47  ;;  %5532 = vmatpush.bf16.msrb.mxu2 %v8090_v56  ;;  %v2934_v47 = vadd.f32 %v10659_v41, %v2921_v31  ;;  %v9538_v56 = vld [vmem:[%s10393_s18 + $0x334] sm:$0xf]  ;;  %v7967_v41 = vld [vmem:[%s10393_s18 + $0x348] sm:$0xf0] }
 0x38f   : > { %v7970_v7 = vor.u32 %v9538_v56, %v7967_v41 }
 0x390   : > { %5522 = vmatpush.bf16.msrb.mxu1 %v7826_v52  ;;  %5497 = vmatpush.bf16.msra.mxu3 %v8950_v29  ;;  %v2947_v15 = vadd.f32 %v2946_v10, %v2934_v47  ;;  %v9781_v52 = vld [vmem:[%s10393_s18 + $0xac4] sm:$0xf0]  ;;  %v8615_v29 = vld [vmem:[%s10393_s18 + $0x858] sm:$0xf0] }
 0x391   : > { %v8926_v57 = vor.u32 %v9781_v52, %v8925_v44  ;;  %v8327_v47 = vld [vmem:[%s10393_s18 + $0x618] sm:$0xf0] }
 0x392   : > { %5511 = vmatpush.bf16.msrb.mxu0 %v7586_v18  ;;  %5533 = vmatpush.bf16.msrb.mxu2 %v8066_v13  ;;  %v2959_v53 = vpop.f32.mrf.mxu3  ;;  %v8426_v18 = vor.u32 %v9652_v49, %v8423_v27  ;;  %v9532_v13 = vld [vmem:[%s10393_s18 + $0x304] sm:$0xf]  ;;  %v7733_v49 = vld [vmem:[%s10393_s18 + $0x158] sm:$0xf]  ;;  %v9482_v27 = vld [vmem:[%s10393_s18 + $0x16c] sm:$0xf0]  ;;  %v8330_v52 = vor.u32 %v9628_v58, %v8327_v47 }
 0x393   : > { %v2960_v61 = vadd.f32 %v2959_v53, %v2947_v15  ;;  %v7946_v33 = vor.u32 %v9532_v13, %v7943_v60  ;;  %v8231_v44 = vld [vmem:[%s10393_s18 + $0x558] sm:$0xf0]  ;;  %v9694_v53 = vld [vmem:[%s10393_s18 + $0x814] sm:$0xf]  ;;  %v7734_v41 = vor.u32 %v9482_v27, %v7733_v49 }
 0x394   : > { %5523 = vmatpush.bf16.msrb.mxu1 %v7802_v8  ;;  %v2948_v4 = vpop.f32.mrf.mxu2  ;;  %5498 = vmatpush.bf16.msra.mxu3 %v8926_v57  ;;  %v8901_v8 = vld [vmem:[%s10393_s18 + $0xa80] sm:$0xf]  ;;  %v8591_v57 = vld [vmem:[%s10393_s18 + $0x828] sm:$0xf0]  ;;  %v8183_v13 = vld [vmem:[%s10393_s18 + $0x4f8] sm:$0xf0] }
 0x395   : > { %v3072_v6 = vmax.f32 %v2960_v61, 0.0  ;;  %v8902_v12 = vor.u32 %v9775_v9, %v8901_v8  ;;  %v7709_v61 = vld [vmem:[%s10393_s18 + $0x128] sm:$0xf]  ;;  %v8594_v1 = vor.u32 %v9694_v53, %v8591_v57  ;;  %v8207_v4 = vld [vmem:[%s10393_s18 + $0x528] sm:$0xf0] }
 0x396   : > { %5512 = vmatpush.bf16.msrb.mxu0 %v7562_v19  ;;  %5534 = vmatpush.bf16.msrb.mxu2 %v8042_v50  ;;  %v10712_v62 = vpop.f32.mrf.mxu0  ;;  %v8402_v19 = vor.u32 %v9646_v5, %v8399_v55  ;;  %v8666_v50 = vor.u32 %v9712_v20, %v8663_v23  ;;  %v1361_v5 = vperm.slane %v10446_v21, 6  ;;  %v9688_v55 = vld [vmem:[%s10393_s18 + $0x7e4] sm:$0xf]  ;;  %v7685_v9 = vld [vmem:[%s10393_s18 + $0xf8] sm:$0xf] }
 0x397   : > { %v10722_v17 = vpack.c.bf16 %v3072_v6, %v3072_v6  ;;  %v8567_v6 = vld [vmem:[%s10393_s18 + $0x7f8] sm:$0xf0]  ;;  %v9682_v20 = vld [vmem:[%s10393_s18 + $0x7b4] sm:$0xf]  ;;  %v8543_v23 = vld [vmem:[%s10393_s18 + $0x7c8] sm:$0xf0] }
 0x398   : > { %5524 = vmatpush.bf16.msrb.mxu1 %v7778_v22  ;;  %5499 = vmatpush.bf16.msra.mxu3 %v8902_v12  ;;  %v8303_v22 = vld [vmem:[%s10393_s18 + $0x5e8] sm:$0xf0]  ;;  %v9592_v12 = vld [vmem:[%s10393_s18 + $0x4e4] sm:$0xf]  ;;  %v8135_v58 = vld [vmem:[%s10393_s18 + $0x498] sm:$0xf0] }
 0x399   : > { %5513 = vmatmul.bf16.vlgmr.msrb.gmra.mxu0 %v10551_v3  ;;  %5474 = vmatmul.bf16.vlgmr.msra.gmra.mxu1 %v10722_v17  ;;  %v8306_v16 = vor.u32 %v9622_v25, %v8303_v22  ;;  %v9452_v53 = vld [vmem:[%s10393_s18 + $0x7c] sm:$0xf0]  ;;  %v9760_v57 = vld [vmem:[%s10393_s18 + $0xa24] sm:$0xf] }
 0x39a   : > { %5557 = vmatpush.bf16.msra.mxu0 %v8498_v24  ;;  %5535 = vmatpush.bf16.msrb.mxu2 %v8018_v45  ;;  %v8375_v24 = vld [vmem:[%s10393_s18 + $0x678] sm:$0xf0]  ;;  %v2961_v28 = vpop.f32.mrf.mxu3  ;;  %v9700_v45 = vld [vmem:[%s10393_s18 + $0x844] sm:$0xf] }
 0x39b   : > { %v8378_v37 = vor.u32 %v9640_v39, %v8375_v24  ;;  %v8618_v15 = vor.u32 %v9700_v45, %v8615_v29  ;;  %v2973_v39 = vadd.f32 %v10712_v62, %v1361_v5  ;;  %v8186_v24 = vor.u32 %v9592_v12, %v8183_v13  ;;  %v8159_v62 = vld [vmem:[%s10393_s18 + $0x4c8] sm:$0xf0]  ;;  %v7589_v5 = vld [vmem:[%s10393_s18 + $0x38] sm:$0xf] }
 0x39c   : > { %5525 = vmatpush.bf16.msrb.mxu1 %v7754_v42  ;;  %v10730_v26 = vpop.f32.mrf.mxu1  ;;  %5544 = vmatpush.bf16.msrb.mxu3 %v8306_v16  ;;  %v8351_v42 = vld [vmem:[%s10393_s18 + $0x648] sm:$0xf0]  ;;  %v9464_v16 = vld [vmem:[%s10393_s18 + $0xdc] sm:$0xf0]  ;;  %v8546_v28 = vor.u32 %v9682_v20, %v8543_v23 }
 0x39d   : > { %v8354_v31 = vor.u32 %v9634_v54, %v8351_v42  ;;  %v2986_v22 = vadd.f32 %v10730_v26, %v2973_v39  ;;  %v7925_v54 = vld [vmem:[%s10393_s18 + $0x2d8] sm:$0xf]  ;;  %v9530_v42 = vld [vmem:[%s10393_s18 + $0x2ec] sm:$0xf0]  ;;  %v7853_v39 = vld [vmem:[%s10393_s18 + $0x248] sm:$0xf] }
 0x39e   : > { %5558 = vmatpush.bf16.msra.mxu0 %v8474_v40  ;;  %5536 = vmatpush.bf16.msrb.mxu2 %v7994_v51  ;;  %v2974_v36 = vpop.f32.mrf.mxu0  ;;  %v8279_v40 = vld [vmem:[%s10393_s18 + $0x5b8] sm:$0xf0]  ;;  %v9604_v51 = vld [vmem:[%s10393_s18 + $0x544] sm:$0xf]  ;;  %v9512_v20 = vld [vmem:[%s10393_s18 + $0x25c] sm:$0xf0] }
 0x39f   : > { %v8282_v10 = vor.u32 %v9616_v35, %v8279_v40  ;;  %v8234_v56 = vor.u32 %v9604_v51, %v8231_v44  ;;  %v9676_v36 = vld [vmem:[%s10393_s18 + $0x784] sm:$0xf]  ;;  %v7637_v40 = vld [vmem:[%s10393_s18 + $0x98] sm:$0xf]  ;;  %v7901_v51 = vld [vmem:[%s10393_s18 + $0x2a8] sm:$0xf] }
 0x3a0   : > { %5570 = vmatpush.bf16.msra.mxu1 %v8690_v11  ;;  %v9470_v11 = vld [vmem:[%s10393_s18 + $0x10c] sm:$0xf0]  ;;  %v7638_v49 = vor.u32 %v9458_v43, %v7637_v40  ;;  %v9524_v44 = vld [vmem:[%s10393_s18 + $0x2bc] sm:$0xf0]  ;;  %v9736_v43 = vld [vmem:[%s10393_s18 + $0x964] sm:$0xf] }
 0x3a1   : > { %5545 = vmatpush.bf16.msrb.mxu3 %v8282_v10  ;;  %v7686_v25 = vor.u32 %v9470_v11, %v7685_v9  ;;  %v9754_v9 = vld [vmem:[%s10393_s18 + $0x9f4] sm:$0xf]  ;;  %v8831_v11 = vld [vmem:[%s10393_s18 + $0xa08] sm:$0xf0]  ;;  %v9440_v23 = vld [vmem:[%s10393_s18 + $0x1c] sm:$0xf0] }
 0x3a2   : > { %5559 = vmatpush.bf16.msra.mxu0 %v8450_v48  ;;  %5537 = vmatpush.bf16.msrb.mxu2 %v7970_v7  ;;  %v8210_v7 = vor.u32 %v9598_v2, %v8207_v4  ;;  %v9668_v40 = vld [vmem:[%s10393_s18 + $0x73c] sm:$0xf0] }
 0x3a4   : > { %5571 = vmatpush.bf16.msra.mxu1 %v8666_v50  ;;  %v2987_v48 = vpop.f32.mrf.mxu1  ;;  %v9586_v50 = vld [vmem:[%s10393_s18 + $0x4b4] sm:$0xf] }
 0x3a5   : > { %5546 = vmatpush.bf16.msrb.mxu3 %v8258_v46  ;;  %v8162_v63 = vor.u32 %v9586_v50, %v8159_v62  ;;  %v9580_v46 = vld [vmem:[%s10393_s18 + $0x484] sm:$0xf]  ;;  %v7926_v48 = vor.u32 %v9530_v42, %v7925_v54  ;;  %v1362_v54 = vperm.slane %v10446_v21, 7 }
 0x3a6   : > { %5560 = vmatpush.bf16.msra.mxu0 %v8426_v18  ;;  %5538 = vmatpush.bf16.msrb.mxu2 %v7946_v33  ;;  %v9476_v18 = vld [vmem:[%s10393_s18 + $0x13c] sm:$0xf0]  ;;  %v7661_v33 = vld [vmem:[%s10393_s18 + $0xc8] sm:$0xf] }
 0x3a7   : > { %v7710_v8 = vor.u32 %v9476_v18, %v7709_v61  ;;  %v7662_v38 = vor.u32 %v9464_v16, %v7661_v33  ;;  %v7902_v18 = vor.u32 %v9524_v44, %v7901_v51  ;;  %v9674_v33 = vld [vmem:[%s10393_s18 + $0x76c] sm:$0xf0]  ;;  %v8735_v51 = vld [vmem:[%s10393_s18 + $0x948] sm:$0xf0]  ;;  %v7781_v44 = vld [vmem:[%s10393_s18 + $0x1b8] sm:$0xf] }
 0x3a8   : > { %5572 = vmatpush.bf16.msra.mxu1 %v8642_v0 }
 0x3a9   : > { %5547 = vmatpush.bf16.msrb.mxu3 %v8234_v56  ;;  %5526 = vmatmul.bf16.vlgmr.msrb.gmra.mxu1 %v10568_v34  ;;  %v8855_v56 = vld [vmem:[%s10393_s18 + $0xa38] sm:$0xf0] }
 0x3aa   : > { %5561 = vmatpush.bf16.msra.mxu0 %v8402_v19  ;;  %v8570_v19 = vor.u32 %v9688_v55, %v8567_v6  ;;  %v8858_v4 = vor.u32 %v9760_v57, %v8855_v56  ;;  %v7877_v55 = vld [vmem:[%s10393_s18 + $0x278] sm:$0xf]  ;;  %v9518_v6 = vld [vmem:[%s10393_s18 + $0x28c] sm:$0xf0]  ;;  %v8429_v57 = vld [vmem:[%s10393_s18 + $0x6c8] sm:$0xf] }
 0x3ab   : > { %v7878_v12 = vor.u32 %v9518_v6, %v7877_v55  ;;  %v9656_v56 = vld [vmem:[%s10393_s18 + $0x6dc] sm:$0xf0]  ;;  %v8711_v55 = vld [vmem:[%s10393_s18 + $0x918] sm:$0xf0] }
 0x3ac   : > { %5573 = vmatpush.bf16.msra.mxu1 %v8618_v15  ;;  %v2998_v60 = vpop.f32.mrf.mxu2  ;;  %v7613_v15 = vld [vmem:[%s10393_s18 + $0x68] sm:$0xf]  ;;  %v9488_v6 = vld [vmem:[%s10393_s18 + $0x19c] sm:$0xf0] }
 0x3ad   : > { %5548 = vmatpush.bf16.msrb.mxu3 %v8210_v7  ;;  %v2999_v35 = vadd.f32 %v2998_v60, %v2986_v22  ;;  %v7614_v2 = vor.u32 %v9452_v53, %v7613_v15  ;;  %v8834_v60 = vor.u32 %v9754_v9, %v8831_v11  ;;  %v8501_v22 = vld [vmem:[%s10393_s18 + $0x758] sm:$0xf]  ;;  %v9494_v53 = vld [vmem:[%s10393_s18 + $0x1cc] sm:$0xf0]  ;;  %v9814_v11 = vld [vmem:[%s10393_s18 + $0xbd4] sm:$0xf] }
 0x3ae   : > { %5562 = vmatpush.bf16.msra.mxu0 %v8378_v37  ;;  %v8519_v37 = vld [vmem:[%s10393_s18 + $0x798] sm:$0xf0]  ;;  %v9650_v9 = vld [vmem:[%s10393_s18 + $0x6ac] sm:$0xf0] }
 0x3af   : > { %v8522_v29 = vor.u32 %v9676_v36, %v8519_v37  ;;  %v8502_v36 = vor.u32 %v9674_v33, %v8501_v22  ;;  %v8783_v37 = vld [vmem:[%s10393_s18 + $0x9a8] sm:$0xf0]  ;;  %v8693_v22 = vld [vmem:[%s10393_s18 + $0x8d8] sm:$0xf]  ;;  %v9722_v33 = vld [vmem:[%s10393_s18 + $0x8ec] sm:$0xf0] }
 0x3b0   : > { %5574 = vmatpush.bf16.msra.mxu1 %v8594_v1 }
 0x3b1   : > { %5549 = vmatpush.bf16.msrb.mxu3 %v8186_v24  ;;  %v9748_v24 = vld [vmem:[%s10393_s18 + $0x9c4] sm:$0xf] }
 0x3b2   : > { %5563 = vmatpush.bf16.msra.mxu0 %v8354_v31  ;;  %v3011_v26 = vpop.f32.mrf.mxu3  ;;  %v8879_v31 = vld [vmem:[%s10393_s18 + $0xa68] sm:$0xf0] }
 0x3b3   : > { %v3012_v10 = vadd.f32 %v3011_v26, %v2999_v35  ;;  %v8882_v27 = vor.u32 %v9766_v30, %v8879_v31  ;;  %v9742_v35 = vld [vmem:[%s10393_s18 + $0x994] sm:$0xf]  ;;  %v9506_v26 = vld [vmem:[%s10393_s18 + $0x22c] sm:$0xf0]  ;;  %v8759_v31 = vld [vmem:[%s10393_s18 + $0x978] sm:$0xf0] }
 0x3b4   : > { %5575 = vmatpush.bf16.msra.mxu1 %v8570_v19  ;;  %v3000_v45 = vpop.f32.mrf.mxu2  ;;  %v7565_v19 = vld [vmem:[%s10393_s18 + $0x8] sm:$0xf]  ;;  %v8786_v42 = vor.u32 %v9742_v35, %v8783_v37  ;;  %v9808_v37 = vld [vmem:[%s10393_s18 + $0xba4] sm:$0xf] }
 0x3b5   : > { %v3073_v47 = vmax.f32 %v3012_v10, 0.0  ;;  %5550 = vmatpush.bf16.msrb.mxu3 %v8162_v63  ;;  %v7566_v50 = vor.u32 %v9440_v23, %v7565_v19  ;;  %v7829_v63 = vld [vmem:[%s10393_s18 + $0x218] sm:$0xf]  ;;  %v7805_v45 = vld [vmem:[%s10393_s18 + $0x1e8] sm:$0xf] }
 0x3b6   : > { %5564 = vmatpush.bf16.msra.mxu0 %v8330_v52  ;;  %v10777_v0 = vpop.f32.mrf.mxu0  ;;  %v7830_v10 = vor.u32 %v9506_v26, %v7829_v63  ;;  %v8117_v19 = vld [vmem:[%s10393_s18 + $0x458] sm:$0xf]  ;;  %v8381_v35 = vld [vmem:[%s10393_s18 + $0x668] sm:$0xf]  ;;  %v8694_v26 = vor.u32 %v9722_v33, %v8693_v22  ;;  %v9554_v22 = vld [vmem:[%s10393_s18 + $0x3ac] sm:$0xf0] }
 0x3b7   : > { %v10787_v52 = vpack.c.bf16 %v3073_v47, %v3073_v47  ;;  %v8762_v47 = vor.u32 %v9736_v43, %v8759_v31  ;;  %v9716_v43 = vld [vmem:[%s10393_s18 + $0x8bc] sm:$0xf0]  ;;  %v8597_v33 = vld [vmem:[%s10393_s18 + $0x818] sm:$0xf] }
 0x3b8   : > { %5576 = vmatpush.bf16.msra.mxu1 %v8546_v28  ;;  %v7854_v28 = vor.u32 %v9512_v20, %v7853_v39  ;;  %v9578_v39 = vld [vmem:[%s10393_s18 + $0x46c] sm:$0xf0] }
 0x3b9   : > { %5565 = vmatmul.bf16.vlgmr.msra.gmra.mxu0 %v10652_v59  ;;  %5487 = vmatmul.bf16.vlgmr.msra.gmra.mxu2 %v10787_v52 }
 0x3ba   : > { %5609 = vmatpush.bf16.msrb.mxu0 %v7734_v41  ;;  %v8138_v41 = vor.u32 %v9580_v46, %v8135_v58  ;;  %5583 = vmatpush.bf16.msra.mxu2 %v8882_v27  ;;  %v3013_v1 = vpop.f32.mrf.mxu3  ;;  %v8453_v46 = vld [vmem:[%s10393_s18 + $0x6f8] sm:$0xf]  ;;  %v9662_v58 = vld [vmem:[%s10393_s18 + $0x70c] sm:$0xf0]  ;;  %v3025_v27 = vadd.f32 %v10777_v0, %v1362_v54  ;;  %v10837_v0 = vld [vmem:[%s10834_s19] sm:$0x3f] }
 0x3bb   : > { %v8454_v15 = vor.u32 %v9662_v58, %v8453_v46  ;;  %v7782_v1 = vor.u32 %v9494_v53, %v7781_v44  ;;  %v3469_v20 = vperm.slane %v10837_v0, 0  ;;  %v9572_v54 = vld [vmem:[%s10393_s18 + $0x43c] sm:$0xf0]  ;;  %v9566_v44 = vld [vmem:[%s10393_s18 + $0x40c] sm:$0xf0] }
 0x3bc   : > { %5577 = vmatpush.bf16.msra.mxu1 %v8522_v29  ;;  %v10792_v61 = vpop.f32.mrf.mxu1  ;;  %5551 = vmatpush.bf16.msrb.mxu3 %v8138_v41  ;;  %v9500_v29 = vld [vmem:[%s10393_s18 + $0x1fc] sm:$0xf0]  ;;  %v8645_v53 = vld [vmem:[%s10393_s18 + $0x878] sm:$0xf] }
 0x3bd   : > { %v3038_v41 = vadd.f32 %v10792_v61, %v3025_v27  ;;  %v7757_v61 = vld [vmem:[%s10393_s18 + $0x188] sm:$0xf] }
 0x3be   : > { %5610 = vmatpush.bf16.msrb.mxu0 %v7710_v8  ;;  %v3026_v7 = vpop.f32.mrf.mxu0  ;;  %v9446_v8 = vld [vmem:[%s10393_s18 + $0x4c] sm:$0xf0]  ;;  %5584 = vmatpush.bf16.msra.mxu2 %v8858_v4 }
 0x3bf   : > { %5578 = vmatmul.bf16.vlgmr.msra.gmra.mxu1 %v10722_v17  ;;  %v7590_v13 = vor.u32 %v9446_v8, %v7589_v5  ;;  %v8430_v5 = vor.u32 %v9656_v56, %v8429_v57  ;;  %v8405_v8 = vld [vmem:[%s10393_s18 + $0x698] sm:$0xf]  ;;  %v9710_v57 = vld [vmem:[%s10393_s18 + $0x88c] sm:$0xf0] }
 0x3c0   : > { %5622 = vmatpush.bf16.msrb.mxu1 %v7926_v48  ;;  %v7806_v48 = vor.u32 %v9500_v29, %v7805_v45 }
 0x3c2   : > { %5611 = vmatpush.bf16.msrb.mxu0 %v7686_v25  ;;  %v8807_v25 = vld [vmem:[%s10393_s18 + $0x9d8] sm:$0xf0]  ;;  %5585 = vmatpush.bf16.msra.mxu2 %v8834_v60  ;;  %v9071_v60 = vld [vmem:[%s10393_s18 + $0xbe8] sm:$0xf0] }
 0x3c3   : > { %v8810_v62 = vor.u32 %v9748_v24, %v8807_v25  ;;  %v7758_v25 = vor.u32 %v9488_v6, %v7757_v61  ;;  %v8045_v61 = vld [vmem:[%s10393_s18 + $0x3c8] sm:$0xf]  ;;  %v9560_v6 = vld [vmem:[%s10393_s18 + $0x3dc] sm:$0xf0] }
 0x3c4   : > { %5623 = vmatpush.bf16.msrb.mxu1 %v7902_v18  ;;  %v3039_v16 = vpop.f32.mrf.mxu1 }
 0x3c6   : > { %5612 = vmatpush.bf16.msrb.mxu0 %v7662_v38  ;;  %v8477_v38 = vld [vmem:[%s10393_s18 + $0x728] sm:$0xf]  ;;  %5586 = vmatpush.bf16.msra.mxu2 %v8810_v62  ;;  %v8118_v62 = vor.u32 %v9578_v39, %v8117_v19  ;;  %v8046_v19 = vor.u32 %v9560_v6, %v8045_v61  ;;  %v9790_v39 = vld [vmem:[%s10393_s18 + $0xb14] sm:$0xf]  ;;  %v9680_v6 = vld [vmem:[%s10393_s18 + $0x79c] sm:$0xf0] }
 0x3c7   : > { %v8478_v30 = vor.u32 %v9668_v40, %v8477_v38  ;;  %v9047_v38 = vld [vmem:[%s10393_s18 + $0xbb8] sm:$0xf0]  ;;  %v8093_v40 = vld [vmem:[%s10393_s18 + $0x428] sm:$0xf] }
 0x3c8   : > { %5624 = vmatpush.bf16.msrb.mxu1 %v7878_v12  ;;  %v9050_v46 = vor.u32 %v9808_v37, %v9047_v38  ;;  %v8094_v58 = vor.u32 %v9572_v54, %v8093_v40  ;;  %v8951_v37 = vld [vmem:[%s10393_s18 + $0xaf8] sm:$0xf0]  ;;  %v7997_v40 = vld [vmem:[%s10393_s18 + $0x368] sm:$0xf]  ;;  %v9548_v54 = vld [vmem:[%s10393_s18 + $0x37c] sm:$0xf0] }
 0x3c9   : > { %5539 = vmatmul.bf16.vlgmr.msrb.gmra.mxu2 %v10602_v14  ;;  %v8525_v61 = vld [vmem:[%s10393_s18 + $0x788] sm:$0xf] }
 0x3ca   : > { %5613 = vmatpush.bf16.msrb.mxu0 %v7638_v49  ;;  %5587 = vmatpush.bf16.msra.mxu2 %v8786_v42  ;;  %v9730_v49 = vld [vmem:[%s10393_s18 + $0x934] sm:$0xf] }
 0x3cb   : > { %v8738_v18 = vor.u32 %v9730_v49, %v8735_v51  ;;  %v8069_v51 = vld [vmem:[%s10393_s18 + $0x3f8] sm:$0xf] }
 0x3cc   : > { %5625 = vmatpush.bf16.msrb.mxu1 %v7854_v28  ;;  %v3050_v21 = vpop.f32.mrf.mxu2  ;;  %v8406_v28 = vor.u32 %v9650_v9, %v8405_v8  ;;  %v9704_v8 = vld [vmem:[%s10393_s18 + $0x85c] sm:$0xf0]  ;;  %v9479_v9 = vld [vmem:[%s10393_s18 + $0x15c] sm:$0xf] }
 0x3cd   : > { %v3051_v4 = vadd.f32 %v3050_v21, %v3038_v41  ;;  %v8357_v21 = vld [vmem:[%s10393_s18 + $0x638] sm:$0xf]  ;;  %v8333_v41 = vld [vmem:[%s10393_s18 + $0x608] sm:$0xf] }
 0x3ce   : > { %5614 = vmatpush.bf16.msrb.mxu0 %v7614_v2  ;;  %5588 = vmatpush.bf16.msra.mxu2 %v8762_v47  ;;  %v9724_v2 = vld [vmem:[%s10393_s18 + $0x904] sm:$0xf]  ;;  %v9638_v47 = vld [vmem:[%s10393_s18 + $0x64c] sm:$0xf0] }
 0x3cf   : > { %v8714_v24 = vor.u32 %v9724_v2, %v8711_v55  ;;  %v8358_v56 = vor.u32 %v9638_v47, %v8357_v21  ;;  %v9632_v2 = vld [vmem:[%s10393_s18 + $0x61c] sm:$0xf0]  ;;  %v8646_v55 = vor.u32 %v9710_v57, %v8645_v53  ;;  %v8927_v21 = vld [vmem:[%s10393_s18 + $0xac8] sm:$0xf0]  ;;  %v7663_v57 = vld [vmem:[%s10393_s18 + $0xe0] sm:$0xf0] }
 0x3d0   : > { %5626 = vmatpush.bf16.msrb.mxu1 %v7830_v10  ;;  %v8669_v10 = vld [vmem:[%s10393_s18 + $0x8a8] sm:$0xf]  ;;  %v9461_v53 = vld [vmem:[%s10393_s18 + $0xcc] sm:$0xf] }
 0x3d1   : > { %v8670_v27 = vor.u32 %v9716_v43, %v8669_v10  ;;  %v9692_v10 = vld [vmem:[%s10393_s18 + $0x7fc] sm:$0xf0]  ;;  %v9467_v43 = vld [vmem:[%s10393_s18 + $0xfc] sm:$0xf] }
 0x3d2   : > { %5615 = vmatpush.bf16.msrb.mxu0 %v7590_v13  ;;  %v3063_v7 = vpop.f32.mrf.mxu3  ;;  %5589 = vmatpush.bf16.msra.mxu2 %v8738_v18 }
 0x3d3   : > { %v3064_v12 = vadd.f32 %v3063_v7, %v3051_v4  ;;  %v9796_v4 = vld [vmem:[%s10393_s18 + $0xb44] sm:$0xf]  ;;  %v8621_v7 = vld [vmem:[%s10393_s18 + $0x848] sm:$0xf] }
 0x3d4   : > { %5627 = vmatpush.bf16.msrb.mxu1 %v7806_v48  ;;  %v3052_v23 = vpop.f32.mrf.mxu2  ;;  %v9802_v48 = vld [vmem:[%s10393_s18 + $0xb74] sm:$0xf] }
 0x3d5   : > { %v3074_v16 = vmax.f32 %v3064_v12, 0.0  ;;  %v8622_v23 = vor.u32 %v9704_v8, %v8621_v7  ;;  %v9455_v8 = vld [vmem:[%s10393_s18 + $0x9c] sm:$0xf] }
 0x3d6   : > { %5616 = vmatpush.bf16.msrb.mxu0 %v7566_v50  ;;  %v5410_v13 = vpop.f32.mrf.mxu0  ;;  %v9074_v50 = vor.u32 %v9814_v11, %v9071_v60  ;;  %5590 = vmatpush.bf16.msra.mxu2 %v8714_v24  ;;  %v7735_v11 = vld [vmem:[%s10393_s18 + $0x170] sm:$0xf0] }
 0x3d7   : > { %v10855_v63 = vpack.c.bf16 %v3074_v16, %v3074_v16  ;;  %v5411_v42 = vadd.f32 %v5410_v13, %v3469_v20  ;;  %v8334_v13 = vor.u32 %v9632_v2, %v8333_v41  ;;  %v8975_v20 = vld [vmem:[%s10393_s18 + $0xb28] sm:$0xf0]  ;;  %v7738_v24 = vor.u32 %v9479_v9, %v7735_v11  ;;  %v9698_v16 = vld [vmem:[%s10393_s18 + $0x82c] sm:$0xf0]  ;;  %v9772_v41 = vld [vmem:[%s10393_s18 + $0xa84] sm:$0xf] }
 0x3d8   : > { %5628 = vmatpush.bf16.msrb.mxu1 %v7782_v1  ;;  %v8070_v1 = vor.u32 %v9566_v44, %v8069_v51  ;;  %v8549_v51 = vld [vmem:[%s10393_s18 + $0x7b8] sm:$0xf]  ;;  %v9686_v44 = vld [vmem:[%s10393_s18 + $0x7cc] sm:$0xf0]  ;;  %v7639_v9 = vld [vmem:[%s10393_s18 + $0xb0] sm:$0xf0] }
 0x3d9   : > { %5617 = vmatmul.bf16.vlgmr.msrb.gmra.mxu0 %v10551_v3  ;;  %5500 = vmatmul.bf16.vlgmr.msra.gmra.mxu3 %v10855_v63  ;;  %v8309_v11 = vld [vmem:[%s10393_s18 + $0x5d8] sm:$0xf] }
 0x3da   : > { %5661 = vmatpush.bf16.msra.mxu0 %v8502_v36  ;;  %v9644_v36 = vld [vmem:[%s10393_s18 + $0x67c] sm:$0xf0]  ;;  %5596 = vmatpush.bf16.msra.mxu3 %v9074_v50  ;;  %v3065_v29 = vpop.f32.mrf.mxu3  ;;  %v7711_v50 = vld [vmem:[%s10393_s18 + $0x140] sm:$0xf0] }
 0x3db   : > { %v8382_v31 = vor.u32 %v9644_v36, %v8381_v35  ;;  %5635 = vmatpush.bf16.msrb.mxu2 %v8118_v62  ;;  %v8978_v62 = vor.u32 %v9790_v39, %v8975_v20  ;;  %v9784_v36 = vld [vmem:[%s10393_s18 + $0xae4] sm:$0xf] }
 0x3dc   : > { %5629 = vmatpush.bf16.msrb.mxu1 %v7758_v25  ;;  %5591 = vmatmul.bf16.vlgmr.msra.gmra.mxu2 %v10787_v52  ;;  %v8021_v25 = vld [vmem:[%s10393_s18 + $0x398] sm:$0xf]  ;;  %v8954_v29 = vor.u32 %v9784_v36, %v8951_v37  ;;  %v9620_v36 = vld [vmem:[%s10393_s18 + $0x5bc] sm:$0xf0]  ;;  %v8861_v37 = vld [vmem:[%s10393_s18 + $0xa28] sm:$0xf] }
 0x3dd   : > { %v8022_v35 = vor.u32 %v9554_v22, %v8021_v25  ;;  %v8526_v25 = vor.u32 %v9680_v6, %v8525_v61  ;;  %v7642_v22 = vor.u32 %v9455_v8, %v7639_v9  ;;  %v8503_v61 = vld [vmem:[%s10393_s18 + $0x770] sm:$0xf0] }
 0x3de   : > { %5662 = vmatpush.bf16.msra.mxu0 %v8478_v30  ;;  %v5423_v30 = vpop.f32.mrf.mxu1  ;;  %v5412_v49 = vpop.f32.mrf.mxu0  ;;  %5597 = vmatpush.bf16.msra.mxu3 %v9050_v46  ;;  %v7998_v46 = vor.u32 %v9548_v54, %v7997_v40  ;;  %v7903_v40 = vld [vmem:[%s10393_s18 + $0x2c0] sm:$0xf0] }
 0x3df   : > { %v10863_v45 = vadd.f32 %v5423_v30, %v5411_v42  ;;  %5630 = vmatmul.bf16.vlgmr.msrb.gmra.mxu1 %v10568_v34  ;;  %5636 = vmatpush.bf16.msrb.mxu2 %v8094_v58  ;;  %v8573_v42 = vld [vmem:[%s10393_s18 + $0x7e8] sm:$0xf]  ;;  %v7687_v30 = vld [vmem:[%s10393_s18 + $0x110] sm:$0xf0] }
 0x3e0   : > { %5674 = vmatpush.bf16.msra.mxu1 %v8694_v26  ;;  %v8598_v26 = vor.u32 %v9698_v16, %v8597_v33  ;;  %v9778_v58 = vld [vmem:[%s10393_s18 + $0xab4] sm:$0xf]  ;;  %v7690_v49 = vor.u32 %v9467_v43, %v7687_v30  ;;  %v9443_v30 = vld [vmem:[%s10393_s18 + $0x3c] sm:$0xf] }
 0x3e2   : > { %5663 = vmatpush.bf16.msra.mxu0 %v8454_v15  ;;  %v9023_v15 = vld [vmem:[%s10393_s18 + $0xb88] sm:$0xf0] }
 0x3e3   : > { %v9026_v18 = vor.u32 %v9802_v48, %v9023_v15  ;;  %5637 = vmatpush.bf16.msrb.mxu2 %v8070_v1  ;;  %v8574_v48 = vor.u32 %v9692_v10, %v8573_v42  ;;  %v9542_v15 = vld [vmem:[%s10393_s18 + $0x34c] sm:$0xf0]  ;;  %v7949_v1 = vld [vmem:[%s10393_s18 + $0x308] sm:$0xf] }
 0x3e4   : > { %5675 = vmatpush.bf16.msra.mxu1 %v8670_v27  ;;  %v7973_v27 = vld [vmem:[%s10393_s18 + $0x338] sm:$0xf] }
 0x3e5   : > { %5598 = vmatpush.bf16.msra.mxu3 %v9026_v18  ;;  %v8903_v18 = vld [vmem:[%s10393_s18 + $0xa98] sm:$0xf0] }
 0x3e6   : > { %5664 = vmatpush.bf16.msra.mxu0 %v8430_v5  ;;  %v8999_v5 = vld [vmem:[%s10393_s18 + $0xb58] sm:$0xf0]  ;;  %v5425_v12 = vpop.f32.mrf.mxu1  ;;  %v8906_v39 = vor.u32 %v9772_v41, %v8903_v18 }
 0x3e7   : > { %v9002_v60 = vor.u32 %v9796_v4, %v8999_v5  ;;  %5638 = vmatpush.bf16.msrb.mxu2 %v8046_v19  ;;  %v8550_v4 = vor.u32 %v9686_v44, %v8549_v51  ;;  %v7666_v5 = vor.u32 %v9461_v53, %v7663_v57  ;;  %v9626_v12 = vld [vmem:[%s10393_s18 + $0x5ec] sm:$0xf0]  ;;  %v7567_v57 = vld [vmem:[%s10393_s18 + $0x20] sm:$0xf0] }
 0x3e8   : > { %5676 = vmatpush.bf16.msra.mxu1 %v8646_v55  ;;  %v9536_v55 = vld [vmem:[%s10393_s18 + $0x31c] sm:$0xf0]  ;;  %v8310_v33 = vor.u32 %v9626_v12, %v8309_v11  ;;  %v9602_v11 = vld [vmem:[%s10393_s18 + $0x52c] sm:$0xf0] }
 0x3e9   : > { %5599 = vmatpush.bf16.msra.mxu3 %v9002_v60  ;;  %v9770_v60 = vld [vmem:[%s10393_s18 + $0xa6c] sm:$0xf0]  ;;  %v7950_v20 = vor.u32 %v9536_v55, %v7949_v1  ;;  %v8813_v1 = vld [vmem:[%s10393_s18 + $0x9c8] sm:$0xf]  ;;  %v9671_v55 = vld [vmem:[%s10393_s18 + $0x75c] sm:$0xf] }
 0x3ea   : > { %5665 = vmatpush.bf16.msra.mxu0 %v8406_v28  ;;  %v9473_v28 = vld [vmem:[%s10393_s18 + $0x12c] sm:$0xf]  ;;  %5552 = vmatmul.bf16.vlgmr.msrb.gmra.mxu3 %v10611_v32 }
 0x3eb   : > { %v7714_v38 = vor.u32 %v9473_v28, %v7711_v50  ;;  %5639 = vmatpush.bf16.msrb.mxu2 %v8022_v35  ;;  %v9449_v28 = vld [vmem:[%s10393_s18 + $0x6c] sm:$0xf]  ;;  %v7615_v50 = vld [vmem:[%s10393_s18 + $0x80] sm:$0xf0] }
 0x3ec   : > { %5677 = vmatpush.bf16.msra.mxu1 %v8622_v23  ;;  %v9527_v23 = vld [vmem:[%s10393_s18 + $0x2dc] sm:$0xf]  ;;  %v7618_v42 = vor.u32 %v9449_v28, %v7615_v50  ;;  %v9596_v28 = vld [vmem:[%s10393_s18 + $0x4fc] sm:$0xf0] }
 0x3ed   : > { %5600 = vmatpush.bf16.msra.mxu3 %v8978_v62  ;;  %v8285_v62 = vld [vmem:[%s10393_s18 + $0x5a8] sm:$0xf] }
 0x3ee   : > { %5666 = vmatpush.bf16.msra.mxu0 %v8382_v31  ;;  %v5436_v31 = vpop.f32.mrf.mxu2  ;;  %v8286_v10 = vor.u32 %v9620_v36, %v8285_v62  ;;  %v9740_v36 = vld [vmem:[%s10393_s18 + $0x97c] sm:$0xf0] }
 0x3ef   : > { %v5437_v47 = vadd.f32 %v5436_v31, %v10863_v45  ;;  %5640 = vmatpush.bf16.msrb.mxu2 %v7998_v46  ;;  %v8930_v45 = vor.u32 %v9778_v58, %v8927_v21  ;;  %v7591_v31 = vld [vmem:[%s10393_s18 + $0x50] sm:$0xf0]  ;;  %v9614_v58 = vld [vmem:[%s10393_s18 + $0x58c] sm:$0xf0]  ;;  %v8837_v21 = vld [vmem:[%s10393_s18 + $0x9f8] sm:$0xf] }
 0x3f0   : > { %5678 = vmatpush.bf16.msra.mxu1 %v8598_v26  ;;  %v9764_v26 = vld [vmem:[%s10393_s18 + $0xa3c] sm:$0xf0] }
 0x3f1   : > { %5601 = vmatpush.bf16.msra.mxu3 %v8954_v29  ;;  %v8862_v43 = vor.u32 %v9764_v26, %v8861_v37  ;;  %v8261_v29 = vld [vmem:[%s10393_s18 + $0x578] sm:$0xf]  ;;  %v9497_v37 = vld [vmem:[%s10393_s18 + $0x1ec] sm:$0xf]  ;;  %v7807_v26 = vld [vmem:[%s10393_s18 + $0x200] sm:$0xf0] }
 0x3f2   : > { %5667 = vmatpush.bf16.msra.mxu0 %v8358_v56  ;;  %v7974_v56 = vor.u32 %v9542_v15, %v7973_v27  ;;  %v5449_v2 = vpop.f32.mrf.mxu3  ;;  %v7594_v27 = vor.u32 %v9443_v30, %v7591_v31  ;;  %v9437_v15 = vld [vmem:[%s10393_s18 + $0xc] sm:$0xf]  ;;  %v8262_v51 = vor.u32 %v9614_v58, %v8261_v29  ;;  %v7810_v30 = vor.u32 %v9497_v37, %v7807_v26  ;;  %v8741_v29 = vld [vmem:[%s10393_s18 + $0x938] sm:$0xf]  ;;  %v9491_v58 = vld [vmem:[%s10393_s18 + $0x1bc] sm:$0xf] }
 0x3f3   : > { %v10918_v7 = vadd.f32 %v5449_v2, %v5437_v47  ;;  %v9758_v47 = vld [vmem:[%s10393_s18 + $0xa0c] sm:$0xf0]  ;;  %v9752_v2 = vld [vmem:[%s10393_s18 + $0x9dc] sm:$0xf0]  ;;  %v7570_v6 = vor.u32 %v9437_v15, %v7567_v57  ;;  %v8141_v15 = vld [vmem:[%s10393_s18 + $0x488] sm:$0xf] }
 0x3f4   : > { %5679 = vmatpush.bf16.msra.mxu1 %v8574_v48  ;;  %5641 = vmatpush.bf16.msrb.mxu2 %v7974_v56  ;;  %v9515_v48 = vld [vmem:[%s10393_s18 + $0x27c] sm:$0xf]  ;;  %v8838_v44 = vor.u32 %v9758_v47, %v8837_v21  ;;  %v9608_v56 = vld [vmem:[%s10393_s18 + $0x55c] sm:$0xf0]  ;;  %v8814_v9 = vor.u32 %v9752_v2, %v8813_v1  ;;  %v7783_v21 = vld [vmem:[%s10393_s18 + $0x1d0] sm:$0xf0] }
 0x3f5   : > { %5602 = vmatpush.bf16.msra.mxu3 %v8930_v45  ;;  %v8237_v45 = vld [vmem:[%s10393_s18 + $0x548] sm:$0xf]  ;;  %v9653_v47 = vld [vmem:[%s10393_s18 + $0x6cc] sm:$0xf]  ;;  %v9647_v2 = vld [vmem:[%s10393_s18 + $0x69c] sm:$0xf] }
 0x3f6   : > { %5668 = vmatpush.bf16.msra.mxu0 %v8334_v13  ;;  %v8885_v13 = vld [vmem:[%s10393_s18 + $0xa58] sm:$0xf]  ;;  %v5438_v19 = vpop.f32.mrf.mxu2  ;;  %v5462_v53 = vpop.f32.mrf.mxu0  ;;  %v8238_v8 = vor.u32 %v9608_v56, %v8237_v45  ;;  %v9728_v45 = vld [vmem:[%s10393_s18 + $0x91c] sm:$0xf0]  ;;  %v9485_v56 = vld [vmem:[%s10393_s18 + $0x18c] sm:$0xf] }
 0x3f7   : > { %v8886_v16 = vor.u32 %v9770_v60, %v8885_v13  ;;  %v10952_v18 = vadd.f32 %v5462_v53, %v10918_v7  ;;  %v8213_v7 = vld [vmem:[%s10393_s18 + $0x518] sm:$0xf]  ;;  %v8506_v13 = vor.u32 %v9671_v55, %v8503_v61  ;;  %v9746_v19 = vld [vmem:[%s10393_s18 + $0x9ac] sm:$0xf0]  ;;  %v7786_v53 = vor.u32 %v9491_v58, %v7783_v21  ;;  %v9575_v61 = vld [vmem:[%s10393_s18 + $0x45c] sm:$0xf] }
 0x3f8   : > { %5680 = vmatpush.bf16.msra.mxu1 %v8550_v4  ;;  %5642 = vmatpush.bf16.msrb.mxu2 %v7950_v20  ;;  %v9509_v4 = vld [vmem:[%s10393_s18 + $0x24c] sm:$0xf]  ;;  %v8789_v60 = vld [vmem:[%s10393_s18 + $0x998] sm:$0xf]  ;;  %v7831_v20 = vld [vmem:[%s10393_s18 + $0x230] sm:$0xf0] }
 0x3f9   : > { %5669 = vmatmul.bf16.vlgmr.msra.gmra.mxu0 %v10652_v59  ;;  %5603 = vmatpush.bf16.msra.mxu3 %v8906_v39  ;;  %v9503_v39 = vld [vmem:[%s10393_s18 + $0x21c] sm:$0xf]  ;;  %v9818_v55 = vld [vmem:[%s10393_s18 + $0xbec] sm:$0xf0]  ;;  %v8359_v26 = vld [vmem:[%s10393_s18 + $0x650] sm:$0xf0] }
 0x3fa   : > { %5713 = vmatpush.bf16.msrb.mxu0 %v7738_v24  ;;  %v7927_v24 = vld [vmem:[%s10393_s18 + $0x2f0] sm:$0xf0]  ;;  %v5451_v54 = vpop.f32.mrf.mxu3  ;;  %v7834_v50 = vor.u32 %v9503_v39, %v7831_v20  ;;  %v9641_v39 = vld [vmem:[%s10393_s18 + $0x66c] sm:$0xf]  ;;  %v8383_v20 = vld [vmem:[%s10393_s18 + $0x680] sm:$0xf0] }
 0x3fb   : > { %v7930_v35 = vor.u32 %v9527_v23, %v7927_v24  ;;  %5643 = vmatmul.bf16.vlgmr.msrb.gmra.mxu2 %v10602_v14  ;;  %v9665_v23 = vld [vmem:[%s10393_s18 + $0x72c] sm:$0xf]  ;;  %v8479_v24 = vld [vmem:[%s10393_s18 + $0x740] sm:$0xf0]  ;;  %v9635_v37 = vld [vmem:[%s10393_s18 + $0x63c] sm:$0xf] }
 0x3fc   : > { %5681 = vmatpush.bf16.msra.mxu1 %v8526_v25  ;;  %5687 = vmatpush.bf16.msra.mxu2 %v8886_v16  ;;  %v8214_v25 = vor.u32 %v9602_v11, %v8213_v7  ;;  %v8189_v16 = vld [vmem:[%s10393_s18 + $0x4e8] sm:$0xf]  ;;  %v8482_v62 = vor.u32 %v9665_v23, %v8479_v24  ;;  %v9719_v7 = vld [vmem:[%s10393_s18 + $0x8dc] sm:$0xf]  ;;  %v8695_v11 = vld [vmem:[%s10393_s18 + $0x8f0] sm:$0xf0] }
 0x3fd   : > { %5648 = vmatpush.bf16.msrb.mxu3 %v8310_v33  ;;  %v8190_v54 = vor.u32 %v9596_v28, %v8189_v16  ;;  %v9053_v23 = vld [vmem:[%s10393_s18 + $0xba8] sm:$0xf]  ;;  %v8698_v24 = vor.u32 %v9719_v7, %v8695_v11  ;;  %v9713_v16 = vld [vmem:[%s10393_s18 + $0x8ac] sm:$0xf]  ;;  %v8671_v28 = vld [vmem:[%s10393_s18 + $0x8c0] sm:$0xf0] }
 0x3fe   : > { %5714 = vmatpush.bf16.msrb.mxu0 %v7714_v38  ;;  %v9521_v38 = vld [vmem:[%s10393_s18 + $0x2ac] sm:$0xf]  ;;  %5604 = vmatmul.bf16.vlgmr.msra.gmra.mxu3 %v10855_v63  ;;  %v5464_v33 = vpop.f32.mrf.mxu0  ;;  %v8599_v7 = vld [vmem:[%s10393_s18 + $0x830] sm:$0xf0]  ;;  %v7717_v11 = vld [vmem:[%s10393_s18 + $0x130] sm:$0xf] }
 0x3ff   : > { %v7906_v46 = vor.u32 %v9521_v38, %v7903_v40  ;;  %5682 = vmatmul.bf16.vlgmr.msra.gmra.mxu1 %v10722_v17  ;;  %v9659_v38 = vld [vmem:[%s10393_s18 + $0x6fc] sm:$0xf]  ;;  %v8455_v40 = vld [vmem:[%s10393_s18 + $0x710] sm:$0xf0]  ;;  %v8095_v33 = vld [vmem:[%s10393_s18 + $0x440] sm:$0xf0] }
 0x400   : > { %5726 = vmatpush.bf16.msrb.mxu1 %v7930_v35  ;;  %5688 = vmatpush.bf16.msra.mxu2 %v8862_v43  ;;  %v8765_v35 = vld [vmem:[%s10393_s18 + $0x968] sm:$0xf]  ;;  %v9590_v43 = vld [vmem:[%s10393_s18 + $0x4cc] sm:$0xf0]  ;;  %v8458_v31 = vor.u32 %v9659_v38, %v8455_v40  ;;  %v9029_v38 = vld [vmem:[%s10393_s18 + $0xb78] sm:$0xf]  ;;  %v8674_v40 = vor.u32 %v9713_v16, %v8671_v28 }
 0x401   : > { %5649 = vmatpush.bf16.msrb.mxu3 %v8286_v10  ;;  %v8165_v10 = vld [vmem:[%s10393_s18 + $0x4b8] sm:$0xf]  ;;  %v8575_v16 = vld [vmem:[%s10393_s18 + $0x800] sm:$0xf0]  ;;  %v7693_v28 = vld [vmem:[%s10393_s18 + $0x100] sm:$0xf] }
 0x402   : > { %5715 = vmatpush.bf16.msrb.mxu0 %v7690_v49  ;;  %v7879_v49 = vld [vmem:[%s10393_s18 + $0x290] sm:$0xf0] }
 0x403   : > { %v7882_v41 = vor.u32 %v9515_v48, %v7879_v49  ;;  %v8431_v48 = vld [vmem:[%s10393_s18 + $0x6e0] sm:$0xf0]  ;;  %v8166_v49 = vor.u32 %v9590_v43, %v8165_v10  ;;  %v8071_v10 = vld [vmem:[%s10393_s18 + $0x410] sm:$0xf0]  ;;  %v9707_v43 = vld [vmem:[%s10393_s18 + $0x87c] sm:$0xf] }
 0x404   : > { %5727 = vmatpush.bf16.msrb.mxu1 %v7906_v46  ;;  %5689 = vmatpush.bf16.msra.mxu2 %v8838_v44  ;;  %v9734_v46 = vld [vmem:[%s10393_s18 + $0x94c] sm:$0xf0]  ;;  %v8717_v44 = vld [vmem:[%s10393_s18 + $0x908] sm:$0xf]  ;;  %v8434_v57 = vor.u32 %v9653_v47, %v8431_v48  ;;  %v8335_v47 = vld [vmem:[%s10393_s18 + $0x620] sm:$0xf0] }
 0x405   : > { %5650 = vmatpush.bf16.msrb.mxu3 %v8262_v51  ;;  %v9584_v51 = vld [vmem:[%s10393_s18 + $0x49c] sm:$0xf0]  ;;  %v9005_v48 = vld [vmem:[%s10393_s18 + $0xb48] sm:$0xf] }
 0x406   : > { %5716 = vmatpush.bf16.msrb.mxu0 %v7666_v5  ;;  %v7855_v5 = vld [vmem:[%s10393_s18 + $0x260] sm:$0xf0] }
 0x407   : > { %v7858_v12 = vor.u32 %v9509_v4, %v7855_v5  ;;  %v8407_v4 = vld [vmem:[%s10393_s18 + $0x6b0] sm:$0xf0]  ;;  %v9077_v5 = vld [vmem:[%s10393_s18 + $0xbd8] sm:$0xf] }
 0x408   : > { %5728 = vmatpush.bf16.msrb.mxu1 %v7882_v41  ;;  %5690 = vmatpush.bf16.msra.mxu2 %v8814_v9  ;;  %v7759_v41 = vld [vmem:[%s10393_s18 + $0x1a0] sm:$0xf0]  ;;  %v8718_v9 = vor.u32 %v9728_v45, %v8717_v44  ;;  %v9701_v44 = vld [vmem:[%s10393_s18 + $0x84c] sm:$0xf]  ;;  %v9483_v45 = vld [vmem:[%s10393_s18 + $0x174] sm:$0xf0] }
 0x409   : > { %5651 = vmatpush.bf16.msrb.mxu3 %v8238_v8  ;;  %v8142_v8 = vor.u32 %v9584_v51, %v8141_v15  ;;  %v9557_v15 = vld [vmem:[%s10393_s18 + $0x3cc] sm:$0xf]  ;;  %v8047_v51 = vld [vmem:[%s10393_s18 + $0x3e0] sm:$0xf0] }
 0x40a   : > { %5717 = vmatpush.bf16.msrb.mxu0 %v7642_v22  ;;  %v8790_v22 = vor.u32 %v9746_v19, %v8789_v60  ;;  %v9078_v60 = vor.u32 %v9818_v55, %v9077_v5  ;;  %v9794_v5 = vld [vmem:[%s10393_s18 + $0xb2c] sm:$0xf0] }
 0x40c   : > { %5729 = vmatpush.bf16.msrb.mxu1 %v7858_v12  ;;  %5691 = vmatpush.bf16.msra.mxu2 %v8790_v22  ;;  %v7762_v12 = vor.u32 %v9485_v56, %v7759_v41  ;;  %v9569_v22 = vld [vmem:[%s10393_s18 + $0x42c] sm:$0xf] }
 0x40d   : > { %5652 = vmatpush.bf16.msrb.mxu3 %v8214_v25  ;;  %v9812_v25 = vld [vmem:[%s10393_s18 + $0xbbc] sm:$0xf0] }
 0x40e   : > { %5718 = vmatpush.bf16.msrb.mxu0 %v7618_v42  ;;  %v8766_v42 = vor.u32 %v9740_v36, %v8765_v35  ;;  %v9054_v35 = vor.u32 %v9812_v25, %v9053_v23  ;;  %v8098_v36 = vor.u32 %v9569_v22, %v8095_v33  ;;  %v9545_v25 = vld [vmem:[%s10393_s18 + $0x36c] sm:$0xf]  ;;  %v7999_v22 = vld [vmem:[%s10393_s18 + $0x380] sm:$0xf0] }
 0x40f   : > { %v9689_v33 = vld [vmem:[%s10393_s18 + $0x7ec] sm:$0xf] }
 0x410   : > { %5730 = vmatpush.bf16.msrb.mxu1 %v7834_v50  ;;  %5692 = vmatpush.bf16.msra.mxu2 %v8766_v42  ;;  %v8386_v50 = vor.u32 %v9641_v39, %v8383_v20  ;;  %v9563_v42 = vld [vmem:[%s10393_s18 + $0x3fc] sm:$0xf]  ;;  %v8957_v39 = vld [vmem:[%s10393_s18 + $0xae8] sm:$0xf]  ;;  %v9788_v20 = vld [vmem:[%s10393_s18 + $0xafc] sm:$0xf0] }
 0x411   : > { %5653 = vmatpush.bf16.msrb.mxu3 %v8190_v54  ;;  %v9806_v54 = vld [vmem:[%s10393_s18 + $0xb8c] sm:$0xf0]  ;;  %v8074_v58 = vor.u32 %v9563_v42, %v8071_v10  ;;  %v7975_v42 = vld [vmem:[%s10393_s18 + $0x350] sm:$0xf0]  ;;  %v9683_v10 = vld [vmem:[%s10393_s18 + $0x7bc] sm:$0xf] }
 0x412   : > { %5719 = vmatpush.bf16.msrb.mxu0 %v7594_v27  ;;  %v8742_v27 = vor.u32 %v9734_v46, %v8741_v29  ;;  %v9629_v29 = vld [vmem:[%s10393_s18 + $0x60c] sm:$0xf]  ;;  %v9030_v46 = vor.u32 %v9806_v54, %v9029_v38  ;;  %v8578_v38 = vor.u32 %v9689_v33, %v8575_v16  ;;  %v9539_v54 = vld [vmem:[%s10393_s18 + $0x33c] sm:$0xf]  ;;  %v9525_v33 = vld [vmem:[%s10393_s18 + $0x2c4] sm:$0xf0] }
 0x413   : > { %v8338_v56 = vor.u32 %v9629_v29, %v8335_v47  ;;  %v8909_v47 = vld [vmem:[%s10393_s18 + $0xa88] sm:$0xf] }
 0x414   : > { %5731 = vmatpush.bf16.msrb.mxu1 %v7810_v30  ;;  %5693 = vmatpush.bf16.msra.mxu2 %v8742_v27  ;;  %v8647_v30 = vld [vmem:[%s10393_s18 + $0x890] sm:$0xf0] }
 0x415   : > { %5654 = vmatpush.bf16.msrb.mxu3 %v8166_v49  ;;  %v9800_v49 = vld [vmem:[%s10393_s18 + $0xb5c] sm:$0xf0]  ;;  %v8650_v27 = vor.u32 %v9707_v43, %v8647_v30  ;;  %v8551_v43 = vld [vmem:[%s10393_s18 + $0x7d0] sm:$0xf0]  ;;  %v7669_v30 = vld [vmem:[%s10393_s18 + $0xd0] sm:$0xf] }
 0x416   : > { %5720 = vmatpush.bf16.msrb.mxu0 %v7570_v6  ;;  %v10991_v1 = vpop.f32.mrf.mxu0  ;;  %v8119_v6 = vld [vmem:[%s10393_s18 + $0x470] sm:$0xf0]  ;;  %v11021_v21 = vpop.f32.mrf.mxu1  ;;  %v9006_v41 = vor.u32 %v9800_v49, %v9005_v48  ;;  %v9776_v48 = vld [vmem:[%s10393_s18 + $0xa9c] sm:$0xf0]  ;;  %v9533_v49 = vld [vmem:[%s10393_s18 + $0x30c] sm:$0xf] }
 0x417   : > { %v8122_v19 = vor.u32 %v9575_v61, %v8119_v6  ;;  %v9551_v6 = vld [vmem:[%s10393_s18 + $0x39c] sm:$0xf] }
 0x418   : > { %5732 = vmatpush.bf16.msrb.mxu1 %v7786_v53  ;;  %5694 = vmatpush.bf16.msra.mxu2 %v8718_v9  ;;  %v8623_v53 = vld [vmem:[%s10393_s18 + $0x860] sm:$0xf0]  ;;  %v9695_v9 = vld [vmem:[%s10393_s18 + $0x81c] sm:$0xf] }
 0x419   : > { %5721 = vmatmul.bf16.vlgmr.msrb.gmra.mxu0 %v10551_v3  ;;  %5655 = vmatpush.bf16.msrb.mxu3 %v8142_v8  ;;  %v8626_v55 = vor.u32 %v9701_v44, %v8623_v53  ;;  %v8023_v8 = vld [vmem:[%s10393_s18 + $0x3b0] sm:$0xf0]  ;;  %v8602_v23 = vor.u32 %v9695_v9, %v8599_v7  ;;  %v7951_v44 = vld [vmem:[%s10393_s18 + $0x320] sm:$0xf0]  ;;  %v9677_v53 = vld [vmem:[%s10393_s18 + $0x78c] sm:$0xf] }
 0x41a   : > { %5765 = vmatpush.bf16.msra.mxu0 %v8506_v13  ;;  %v8410_v13 = vor.u32 %v9647_v2, %v8407_v4  ;;  %v8050_v2 = vor.u32 %v9557_v15, %v8047_v51  ;;  %v8981_v4 = vld [vmem:[%s10393_s18 + $0xb18] sm:$0xf] }
 0x41b   : > { %5695 = vmatmul.bf16.vlgmr.msra.gmra.mxu2 %v10787_v52 }
 0x41c   : > { %5733 = vmatpush.bf16.msrb.mxu1 %v7762_v12  ;;  %5739 = vmatpush.bf16.msrb.mxu2 %v8122_v19  ;;  %v9477_v12 = vld [vmem:[%s10393_s18 + $0x144] sm:$0xf0] }
 0x41d   : > { %5700 = vmatpush.bf16.msra.mxu3 %v9078_v60  ;;  %v8026_v60 = vor.u32 %v9551_v6, %v8023_v8  ;;  %v7933_v6 = vld [vmem:[%s10393_s18 + $0x2e0] sm:$0xf]  ;;  %v9531_v8 = vld [vmem:[%s10393_s18 + $0x2f4] sm:$0xf0] }
 0x41e   : > { %5766 = vmatpush.bf16.msra.mxu0 %v8482_v62  ;;  %v5516_v62 = vpop.f32.mrf.mxu0  ;;  %5656 = vmatmul.bf16.vlgmr.msrb.gmra.mxu3 %v10611_v32  ;;  %v5477_v19 = vpop.f32.mrf.mxu1 }
 0x41f   : > { %5734 = vmatmul.bf16.vlgmr.msrb.gmra.mxu1 %v10568_v34  ;;  %v3470_v62 = vperm.slane %v10837_v0, 1  ;;  %v9465_v0 = vld [vmem:[%s10393_s18 + $0xe4] sm:$0xf0]  ;;  %v9617_v19 = vld [vmem:[%s10393_s18 + $0x5ac] sm:$0xf] }
 0x420   : > { %5778 = vmatpush.bf16.msra.mxu1 %v8698_v24  ;;  %5740 = vmatpush.bf16.msrb.mxu2 %v8098_v36  ;;  %v7718_v24 = vor.u32 %v9477_v12, %v7717_v11  ;;  %v8002_v36 = vor.u32 %v9545_v25, %v7999_v22  ;;  %v7670_v15 = vor.u32 %v9465_v0, %v7669_v30  ;;  %v7909_v22 = vld [vmem:[%s10393_s18 + $0x2b0] sm:$0xf] }
 0x421   : > { %5701 = vmatpush.bf16.msra.mxu3 %v9054_v35  ;;  %v8958_v35 = vor.u32 %v9788_v20, %v8957_v39  ;;  %v7934_v39 = vor.u32 %v9531_v8, %v7933_v6  ;;  %v8287_v20 = vld [vmem:[%s10393_s18 + $0x5c0] sm:$0xf0]  ;;  %v7573_v30 = vld [vmem:[%s10393_s18 + $0x10] sm:$0xf]  ;;  %v8791_v6 = vld [vmem:[%s10393_s18 + $0x9b0] sm:$0xf0] }
 0x422   : > { %5767 = vmatpush.bf16.msra.mxu0 %v8458_v31  ;;  %v8362_v31 = vor.u32 %v9635_v37, %v8359_v26  ;;  %v8933_v37 = vld [vmem:[%s10393_s18 + $0xab8] sm:$0xf]  ;;  %v9782_v26 = vld [vmem:[%s10393_s18 + $0xacc] sm:$0xf0]  ;;  %v7837_v8 = vld [vmem:[%s10393_s18 + $0x220] sm:$0xf] }
 0x423   : > { %v8934_v29 = vor.u32 %v9782_v26, %v8933_v37  ;;  %v9611_v37 = vld [vmem:[%s10393_s18 + $0x57c] sm:$0xf]  ;;  %v7910_v26 = vor.u32 %v9525_v33, %v7909_v22  ;;  %v7813_v22 = vld [vmem:[%s10393_s18 + $0x1f0] sm:$0xf] }
 0x424   : > { %5779 = vmatpush.bf16.msra.mxu1 %v8674_v40  ;;  %5741 = vmatpush.bf16.msrb.mxu2 %v8074_v58 }
 0x425   : > { %5702 = vmatpush.bf16.msra.mxu3 %v9030_v46  ;;  %v7978_v46 = vor.u32 %v9539_v54, %v7975_v42  ;;  %v8839_v54 = vld [vmem:[%s10393_s18 + $0xa10] sm:$0xf0]  ;;  %v7885_v42 = vld [vmem:[%s10393_s18 + $0x280] sm:$0xf] }
 0x426   : > { %5768 = vmatpush.bf16.msra.mxu0 %v8434_v57  ;;  %v7741_v57 = vld [vmem:[%s10393_s18 + $0x160] sm:$0xf]  ;;  %v5527_v58 = vpop.f32.mrf.mxu1 }
 0x427   : > { %v7742_v61 = vor.u32 %v9483_v45, %v7741_v57  ;;  %v8527_v57 = vld [vmem:[%s10393_s18 + $0x7a0] sm:$0xf0]  ;;  %v7645_v45 = vld [vmem:[%s10393_s18 + $0xa0] sm:$0xf] }
 0x428   : > { %5780 = vmatpush.bf16.msra.mxu1 %v8650_v27  ;;  %5742 = vmatpush.bf16.msrb.mxu2 %v8050_v2  ;;  %v8311_v2 = vld [vmem:[%s10393_s18 + $0x5f0] sm:$0xf0]  ;;  %v8530_v9 = vor.u32 %v9677_v53, %v8527_v57  ;;  %v8509_v53 = vld [vmem:[%s10393_s18 + $0x760] sm:$0xf]  ;;  %v9675_v57 = vld [vmem:[%s10393_s18 + $0x774] sm:$0xf0] }
 0x429   : > { %5703 = vmatpush.bf16.msra.mxu3 %v9006_v41  ;;  %v9623_v41 = vld [vmem:[%s10393_s18 + $0x5dc] sm:$0xf] }
 0x42a   : > { %5769 = vmatpush.bf16.msra.mxu0 %v8410_v13  ;;  %v8982_v13 = vor.u32 %v9794_v5, %v8981_v4  ;;  %v9767_v4 = vld [vmem:[%s10393_s18 + $0xa5c] sm:$0xf]  ;;  %v8887_v5 = vld [vmem:[%s10393_s18 + $0xa70] sm:$0xf0]  ;;  %v8314_v11 = vor.u32 %v9623_v41, %v8311_v2 }
 0x42b   : > { %v8890_v12 = vor.u32 %v9767_v4, %v8887_v5  ;;  %v9599_v2 = vld [vmem:[%s10393_s18 + $0x51c] sm:$0xf]  ;;  %v8215_v4 = vld [vmem:[%s10393_s18 + $0x530] sm:$0xf0] }
 0x42c   : > { %5781 = vmatpush.bf16.msra.mxu1 %v8626_v55  ;;  %5743 = vmatpush.bf16.msrb.mxu2 %v8026_v60  ;;  %v8910_v55 = vor.u32 %v9776_v48, %v8909_v47  ;;  %v9453_v60 = vld [vmem:[%s10393_s18 + $0x84] sm:$0xf0]  ;;  %v9749_v48 = vld [vmem:[%s10393_s18 + $0x9cc] sm:$0xf] }
 0x42d   : > { %5704 = vmatpush.bf16.msra.mxu3 %v8982_v13  ;;  %v7621_v13 = vld [vmem:[%s10393_s18 + $0x70] sm:$0xf] }
 0x42e   : > { %5770 = vmatpush.bf16.msra.mxu0 %v8386_v50  ;;  %v9471_v50 = vld [vmem:[%s10393_s18 + $0x114] sm:$0xf0]  ;;  %v5529_v25 = vpop.f32.mrf.mxu1 }
 0x42f   : > { %v7694_v40 = vor.u32 %v9471_v50, %v7693_v28  ;;  %v7622_v28 = vor.u32 %v9453_v60, %v7621_v13  ;;  %v8290_v50 = vor.u32 %v9617_v19, %v8287_v20  ;;  %v8218_v13 = vor.u32 %v9599_v2, %v8215_v4  ;;  %v9593_v19 = vld [vmem:[%s10393_s18 + $0x4ec] sm:$0xf]  ;;  %v8767_v25 = vld [vmem:[%s10393_s18 + $0x980] sm:$0xf0]  ;;  %v9079_v2 = vld [vmem:[%s10393_s18 + $0xbf0] sm:$0xf0] }
 0x430   : > { %5782 = vmatpush.bf16.msra.mxu1 %v8602_v23  ;;  %5744 = vmatpush.bf16.msrb.mxu2 %v8002_v36  ;;  %v9761_v23 = vld [vmem:[%s10393_s18 + $0xa2c] sm:$0xf]  ;;  %v9447_v36 = vld [vmem:[%s10393_s18 + $0x54] sm:$0xf0]  ;;  %v8125_v4 = vld [vmem:[%s10393_s18 + $0x460] sm:$0xf] }
 0x431   : > { %5705 = vmatpush.bf16.msra.mxu3 %v8958_v35  ;;  %v7597_v35 = vld [vmem:[%s10393_s18 + $0x40] sm:$0xf] }
 0x432   : > { %5771 = vmatpush.bf16.msra.mxu0 %v8362_v31  ;;  %v5515_v31 = vadd.f32 %v10991_v1, %v3470_v62  ;;  %v8554_v1 = vor.u32 %v9683_v10, %v8551_v43  ;;  %v9519_v10 = vld [vmem:[%s10393_s18 + $0x294] sm:$0xf0]  ;;  %v7598_v43 = vor.u32 %v9447_v36, %v7597_v35  ;;  %v9587_v36 = vld [vmem:[%s10393_s18 + $0x4bc] sm:$0xf] }
 0x433   : > { %v7886_v47 = vor.u32 %v9519_v10, %v7885_v42  ;;  %v7789_v42 = vld [vmem:[%s10393_s18 + $0x1c0] sm:$0xf] }
 0x434   : > { %5783 = vmatpush.bf16.msra.mxu1 %v8578_v38  ;;  %v11064_v51 = vadd.f32 %v5527_v58, %v5515_v31  ;;  %5745 = vmatpush.bf16.msrb.mxu2 %v7978_v46  ;;  %v8263_v38 = vld [vmem:[%s10393_s18 + $0x590] sm:$0xf0]  ;;  %v9605_v46 = vld [vmem:[%s10393_s18 + $0x54c] sm:$0xf]  ;;  %v8239_v58 = vld [vmem:[%s10393_s18 + $0x560] sm:$0xf0] }
 0x435   : > { %5706 = vmatpush.bf16.msra.mxu3 %v8934_v29  ;;  %v8266_v0 = vor.u32 %v9611_v37, %v8263_v38  ;;  %v9441_v29 = vld [vmem:[%s10393_s18 + $0x24] sm:$0xf0]  ;;  %v8167_v37 = vld [vmem:[%s10393_s18 + $0x4d0] sm:$0xf0] }
 0x436   : > { %5772 = vmatpush.bf16.msra.mxu0 %v8338_v56  ;;  %v11062_v27 = vpop.f32.mrf.mxu0  ;;  %v9459_v56 = vld [vmem:[%s10393_s18 + $0xb4] sm:$0xf0] }
 0x437   : > { %v7646_v7 = vor.u32 %v9459_v56, %v7645_v45  ;;  %v7574_v45 = vor.u32 %v9441_v29, %v7573_v30  ;;  %v8242_v56 = vor.u32 %v9605_v46, %v8239_v58  ;;  %v8437_v30 = vld [vmem:[%s10393_s18 + $0x6d0] sm:$0xf]  ;;  %v8170_v29 = vor.u32 %v9587_v36, %v8167_v37  ;;  %v9581_v58 = vld [vmem:[%s10393_s18 + $0x48c] sm:$0xf]  ;;  %v8365_v36 = vld [vmem:[%s10393_s18 + $0x640] sm:$0xf] }
 0x438   : > { %5784 = vmatpush.bf16.msra.mxu1 %v8554_v1  ;;  %v7861_v1 = vld [vmem:[%s10393_s18 + $0x250] sm:$0xf]  ;;  %v9639_v37 = vld [vmem:[%s10393_s18 + $0x654] sm:$0xf0] }
 0x439   : > { %5773 = vmatmul.bf16.vlgmr.msra.gmra.mxu0 %v10652_v59  ;;  %5707 = vmatpush.bf16.msra.mxu3 %v8910_v55  ;;  %v8510_v55 = vor.u32 %v9675_v57, %v8509_v53  ;;  %v7765_v53 = vld [vmem:[%s10393_s18 + $0x190] sm:$0xf]  ;;  %v9489_v57 = vld [vmem:[%s10393_s18 + $0x1a4] sm:$0xf0] }
 0x43a   : > { %5817 = vmatpush.bf16.msrb.mxu0 %v7742_v61  ;;  %v7954_v61 = vor.u32 %v9533_v49, %v7951_v44  ;;  %v8815_v49 = vld [vmem:[%s10393_s18 + $0x9e0] sm:$0xf0]  ;;  %v9513_v44 = vld [vmem:[%s10393_s18 + $0x264] sm:$0xf0] }
 0x43b   : > { %v8818_v41 = vor.u32 %v9749_v48, %v8815_v49  ;;  %v7862_v5 = vor.u32 %v9513_v44, %v7861_v1  ;;  %v9725_v48 = vld [vmem:[%s10393_s18 + $0x90c] sm:$0xf]  ;;  %v8719_v44 = vld [vmem:[%s10393_s18 + $0x920] sm:$0xf0] }
 0x43c   : > { %5746 = vmatpush.bf16.msrb.mxu2 %v7954_v61  ;;  %5785 = vmatpush.bf16.msra.mxu1 %v8530_v9  ;;  %v9743_v61 = vld [vmem:[%s10393_s18 + $0x99c] sm:$0xf]  ;;  %v11113_v9 = vpop.f32.mrf.mxu2 }
 0x43d   : > { %5752 = vmatpush.bf16.msrb.mxu3 %v8314_v11  ;;  %v8485_v11 = vld [vmem:[%s10393_s18 + $0x730] sm:$0xf]  ;;  %v8794_v60 = vor.u32 %v9743_v61, %v8791_v6  ;;  %v8722_v61 = vor.u32 %v9725_v48, %v8719_v44  ;;  %v8701_v6 = vld [vmem:[%s10393_s18 + $0x8e0] sm:$0xf]  ;;  %v9007_v44 = vld [vmem:[%s10393_s18 + $0xb60] sm:$0xf0] }
 0x43e   : > { %5818 = vmatpush.bf16.msrb.mxu0 %v7718_v24  ;;  %v8863_v24 = vld [vmem:[%s10393_s18 + $0xa40] sm:$0xf0]  ;;  %v5568_v16 = vpop.f32.mrf.mxu0  ;;  %5708 = vmatmul.bf16.vlgmr.msra.gmra.mxu3 %v10855_v63 }
 0x43f   : > { %v8866_v62 = vor.u32 %v9761_v23, %v8863_v24  ;;  %5747 = vmatmul.bf16.vlgmr.msrb.gmra.mxu2 %v10602_v14  ;;  %5786 = vmatmul.bf16.vlgmr.msra.gmra.mxu1 %v10722_v17  ;;  %v9737_v24 = vld [vmem:[%s10393_s18 + $0x96c] sm:$0xf]  ;;  %v9501_v16 = vld [vmem:[%s10393_s18 + $0x204] sm:$0xf0] }
 0x440   : > { %5791 = vmatpush.bf16.msra.mxu2 %v8890_v12  ;;  %5830 = vmatpush.bf16.msrb.mxu1 %v7934_v39  ;;  %v9669_v12 = vld [vmem:[%s10393_s18 + $0x744] sm:$0xf0]  ;;  %v8191_v39 = vld [vmem:[%s10393_s18 + $0x500] sm:$0xf0]  ;;  %v8770_v35 = vor.u32 %v9737_v24, %v8767_v25  ;;  %v8101_v25 = vld [vmem:[%s10393_s18 + $0x430] sm:$0xf] }
 0x441   : > { %5753 = vmatpush.bf16.msrb.mxu3 %v8290_v50  ;;  %v8486_v23 = vor.u32 %v9669_v12, %v8485_v11  ;;  %v9663_v50 = vld [vmem:[%s10393_s18 + $0x714] sm:$0xf0]  ;;  %v9055_v24 = vld [vmem:[%s10393_s18 + $0xbc0] sm:$0xf0] }
 0x442   : > { %5819 = vmatpush.bf16.msrb.mxu0 %v7694_v40  ;;  %v9755_v40 = vld [vmem:[%s10393_s18 + $0x9fc] sm:$0xf] }
 0x443   : > { %v8842_v31 = vor.u32 %v9755_v40, %v8839_v54  ;;  %v9731_v40 = vld [vmem:[%s10393_s18 + $0x93c] sm:$0xf]  ;;  %v8743_v54 = vld [vmem:[%s10393_s18 + $0x950] sm:$0xf0] }
 0x444   : > { %5792 = vmatpush.bf16.msra.mxu2 %v8866_v62  ;;  %5831 = vmatpush.bf16.msrb.mxu1 %v7910_v26  ;;  %v8194_v62 = vor.u32 %v9593_v19, %v8191_v39  ;;  %v7814_v26 = vor.u32 %v9501_v16, %v7813_v22  ;;  %v5490_v10 = vpop.f32.mrf.mxu2  ;;  %v8746_v46 = vor.u32 %v9731_v40, %v8743_v54  ;;  %v8389_v19 = vld [vmem:[%s10393_s18 + $0x670] sm:$0xf]  ;;  %v9645_v39 = vld [vmem:[%s10393_s18 + $0x684] sm:$0xf0]  ;;  %v9031_v40 = vld [vmem:[%s10393_s18 + $0xb90] sm:$0xf0] }
 0x445   : > { %5754 = vmatpush.bf16.msrb.mxu3 %v8266_v0  ;;  %v9657_v0 = vld [vmem:[%s10393_s18 + $0x6e4] sm:$0xf0]  ;;  %v8677_v16 = vld [vmem:[%s10393_s18 + $0x8b0] sm:$0xf]  ;;  %v8077_v54 = vld [vmem:[%s10393_s18 + $0x400] sm:$0xf] }
 0x446   : > { %5820 = vmatpush.bf16.msrb.mxu0 %v7670_v15  ;;  %v11103_v15 = vpop.f32.mrf.mxu1  ;;  %v8438_v1 = vor.u32 %v9657_v0, %v8437_v30  ;;  %v9573_v22 = vld [vmem:[%s10393_s18 + $0x444] sm:$0xf0]  ;;  %v8653_v30 = vld [vmem:[%s10393_s18 + $0x880] sm:$0xf]  ;;  %v9711_v0 = vld [vmem:[%s10393_s18 + $0x894] sm:$0xf0] }
 0x447   : > { %v11169_v10 = vld [vmem:[%s10834_s19] sm:$0x3f] }
 0x448   : > { %5793 = vmatpush.bf16.msra.mxu2 %v8842_v31  ;;  %5832 = vmatpush.bf16.msrb.mxu1 %v7886_v47  ;;  %v8143_v47 = vld [vmem:[%s10393_s18 + $0x4a0] sm:$0xf0] }
 0x449   : > { %5755 = vmatpush.bf16.msrb.mxu3 %v8242_v56  ;;  %v9651_v56 = vld [vmem:[%s10393_s18 + $0x6b4] sm:$0xf0] }
 0x44a   : > { %5821 = vmatpush.bf16.msrb.mxu0 %v7646_v7  ;;  %v9507_v7 = vld [vmem:[%s10393_s18 + $0x234] sm:$0xf0] }
 0x44b   : > { %v7838_v20 = vor.u32 %v9507_v7, %v7837_v8  ;;  %v9723_v8 = vld [vmem:[%s10393_s18 + $0x8f4] sm:$0xf0]  ;;  %v7766_v7 = vor.u32 %v9489_v57, %v7765_v53  ;;  %v8654_v53 = vor.u32 %v9711_v0, %v8653_v30  ;;  %v8053_v57 = vld [vmem:[%s10393_s18 + $0x3d0] sm:$0xf] }
 0x44c   : > { %5794 = vmatpush.bf16.msra.mxu2 %v8818_v41  ;;  %5833 = vmatpush.bf16.msrb.mxu1 %v7862_v5  ;;  %v9815_v41 = vld [vmem:[%s10393_s18 + $0xbdc] sm:$0xf]  ;;  %v9579_v5 = vld [vmem:[%s10393_s18 + $0x474] sm:$0xf0] }
 0x44d   : > { %5756 = vmatpush.bf16.msrb.mxu3 %v8218_v13  ;;  %v9082_v12 = vor.u32 %v9815_v41, %v9079_v2  ;;  %v8126_v13 = vor.u32 %v9579_v5, %v8125_v4  ;;  %v9705_v2 = vld [vmem:[%s10393_s18 + $0x864] sm:$0xf0]  ;;  %v9480_v4 = vld [vmem:[%s10393_s18 + $0x164] sm:$0xf]  ;;  %v7743_v5 = vld [vmem:[%s10393_s18 + $0x178] sm:$0xf0] }
 0x44e   : > { %5822 = vmatpush.bf16.msrb.mxu0 %v7622_v28  ;;  %v5581_v33 = vpop.f32.mrf.mxu1  ;;  %v8461_v28 = vld [vmem:[%s10393_s18 + $0x700] sm:$0xf] }
 0x44f   : > { %v8462_v38 = vor.u32 %v9663_v50, %v8461_v28  ;;  %v9717_v28 = vld [vmem:[%s10393_s18 + $0x8c4] sm:$0xf0]  ;;  %v8390_v50 = vor.u32 %v9645_v39, %v8389_v19  ;;  %v8029_v19 = vld [vmem:[%s10393_s18 + $0x3a0] sm:$0xf]  ;;  %v9555_v39 = vld [vmem:[%s10393_s18 + $0x3b4] sm:$0xf0] }
 0x450   : > { %5795 = vmatpush.bf16.msra.mxu2 %v8794_v60  ;;  %5834 = vmatpush.bf16.msrb.mxu1 %v7838_v20  ;;  %v11151_v60 = vpop.f32.mrf.mxu2  ;;  %v9809_v20 = vld [vmem:[%s10393_s18 + $0xbac] sm:$0xf] }
 0x451   : > { %5757 = vmatpush.bf16.msrb.mxu3 %v8194_v62  ;;  %v9058_v62 = vor.u32 %v9809_v20, %v9055_v24  ;;  %v8605_v20 = vld [vmem:[%s10393_s18 + $0x820] sm:$0xf]  ;;  %v9699_v24 = vld [vmem:[%s10393_s18 + $0x834] sm:$0xf0] }
 0x452   : > { %5823 = vmatpush.bf16.msrb.mxu0 %v7598_v43  ;;  %v9495_v43 = vld [vmem:[%s10393_s18 + $0x1d4] sm:$0xf0] }
 0x453   : > { %v7790_v49 = vor.u32 %v9495_v43, %v7789_v42  ;;  %v9567_v42 = vld [vmem:[%s10393_s18 + $0x414] sm:$0xf0]  ;;  %v3471_v43 = vperm.slane %v11169_v10, 2 }
 0x454   : > { %5796 = vmatpush.bf16.msra.mxu2 %v8770_v35  ;;  %5835 = vmatpush.bf16.msrb.mxu1 %v7814_v26  ;;  %v8102_v35 = vor.u32 %v9573_v22, %v8101_v25  ;;  %v9803_v26 = vld [vmem:[%s10393_s18 + $0xb7c] sm:$0xf]  ;;  %v9474_v25 = vld [vmem:[%s10393_s18 + $0x134] sm:$0xf]  ;;  %v7719_v22 = vld [vmem:[%s10393_s18 + $0x148] sm:$0xf0] }
 0x455   : > { %5758 = vmatpush.bf16.msrb.mxu3 %v8170_v29  ;;  %v8366_v29 = vor.u32 %v9639_v37, %v8365_v36  ;;  %v7722_v36 = vor.u32 %v9474_v25, %v7719_v22  ;;  %v8005_v37 = vld [vmem:[%s10393_s18 + $0x370] sm:$0xf]  ;;  %v9528_v25 = vld [vmem:[%s10393_s18 + $0x2e4] sm:$0xf]  ;;  %v7935_v22 = vld [vmem:[%s10393_s18 + $0x2f8] sm:$0xf0] }
 0x456   : > { %5824 = vmatpush.bf16.msrb.mxu0 %v7574_v45  ;;  %v11135_v31 = vpop.f32.mrf.mxu0  ;;  %v8413_v45 = vld [vmem:[%s10393_s18 + $0x6a0] sm:$0xf] }
 0x457   : > { %v8414_v11 = vor.u32 %v9651_v56, %v8413_v45  ;;  %v9561_v45 = vld [vmem:[%s10393_s18 + $0x3e4] sm:$0xf0]  ;;  %v8629_v56 = vld [vmem:[%s10393_s18 + $0x850] sm:$0xf]  ;;  %v5619_v41 = vadd.f32 %v11135_v31, %v3471_v43 }
 0x458   : > { %5797 = vmatpush.bf16.msra.mxu2 %v8746_v46  ;;  %5836 = vmatpush.bf16.msrb.mxu1 %v7790_v49  ;;  %v8341_v46 = vld [vmem:[%s10393_s18 + $0x610] sm:$0xf]  ;;  %v5542_v48 = vpop.f32.mrf.mxu2  ;;  %v9633_v49 = vld [vmem:[%s10393_s18 + $0x624] sm:$0xf0] }
 0x459   : > { %5825 = vmatmul.bf16.vlgmr.msrb.gmra.mxu0 %v10551_v3  ;;  %v7981_v48 = vld [vmem:[%s10393_s18 + $0x340] sm:$0xf] }
 0x45a   : > { %5869 = vmatpush.bf16.msra.mxu0 %v8510_v55  ;;  %v8146_v55 = vor.u32 %v9581_v58, %v8143_v47  ;;  %v9034_v58 = vor.u32 %v9803_v26, %v9031_v40  ;;  %v8078_v47 = vor.u32 %v9567_v42, %v8077_v54  ;;  %v9549_v26 = vld [vmem:[%s10393_s18 + $0x384] sm:$0xf0]  ;;  %v9468_v54 = vld [vmem:[%s10393_s18 + $0x104] sm:$0xf]  ;;  %v7695_v42 = vld [vmem:[%s10393_s18 + $0x118] sm:$0xf0] }
 0x45b   : > { %v9693_v40 = vld [vmem:[%s10393_s18 + $0x804] sm:$0xf0]  ;;  %v8006_v0 = vor.u32 %v9549_v26, %v8005_v37  ;;  %v7623_v37 = vld [vmem:[%s10393_s18 + $0x88] sm:$0xf0]  ;;  %v8293_v26 = vld [vmem:[%s10393_s18 + $0x5b0] sm:$0xf] }
 0x45c   : > { %5759 = vmatpush.bf16.msrb.mxu3 %v8146_v55  ;;  %5798 = vmatpush.bf16.msra.mxu2 %v8722_v61  ;;  %v5476_v55 = vadd.f32 %v11021_v21, %v10952_v18  ;;  %v5631_v61 = vpop.f32.mrf.mxu1  ;;  %v8630_v18 = vor.u32 %v9705_v2, %v8629_v56  ;;  %v7746_v21 = vor.u32 %v9480_v4, %v7743_v5  ;;  %v9773_v5 = vld [vmem:[%s10393_s18 + $0xa8c] sm:$0xf] }
 0x45d   : > { %5837 = vmatpush.bf16.msrb.mxu1 %v7766_v7  ;;  %v8054_v7 = vor.u32 %v9561_v45, %v8053_v57  ;;  %v9462_v57 = vld [vmem:[%s10393_s18 + $0xd4] sm:$0xf]  ;;  %v7671_v45 = vld [vmem:[%s10393_s18 + $0xe8] sm:$0xf0] }
 0x45e   : > { %5870 = vmatpush.bf16.msra.mxu0 %v8486_v23  ;;  %v8702_v23 = vor.u32 %v9723_v8, %v8701_v6  ;;  %v5620_v33 = vpop.f32.mrf.mxu0  ;;  %v8342_v6 = vor.u32 %v9633_v49, %v8341_v46  ;;  %v11190_v8 = vadd.f32 %v5631_v61, %v5619_v41  ;;  %v8935_v46 = vld [vmem:[%s10393_s18 + $0xad0] sm:$0xf0]  ;;  %v9543_v49 = vld [vmem:[%s10393_s18 + $0x354] sm:$0xf0]  ;;  %v7957_v61 = vld [vmem:[%s10393_s18 + $0x310] sm:$0xf] }
 0x45f   : > { %5760 = vmatmul.bf16.vlgmr.msrb.gmra.mxu3 %v10611_v32  ;;  %5799 = vmatmul.bf16.vlgmr.msra.gmra.mxu2 %v10787_v52  ;;  %v7982_v2 = vor.u32 %v9543_v49, %v7981_v48  ;;  %v7599_v48 = vld [vmem:[%s10393_s18 + $0x58] sm:$0xf0]  ;;  %v8269_v49 = vld [vmem:[%s10393_s18 + $0x580] sm:$0xf] }
 0x460   : > { %5804 = vmatpush.bf16.msra.mxu3 %v9082_v12  ;;  %5843 = vmatpush.bf16.msrb.mxu2 %v8126_v13  ;;  %v8983_v12 = vld [vmem:[%s10393_s18 + $0xb30] sm:$0xf0]  ;;  %v5489_v13 = vadd.f32 %v11113_v9, %v5476_v55  ;;  %v8911_v55 = vld [vmem:[%s10393_s18 + $0xaa0] sm:$0xf0] }
 0x461   : > { %5882 = vmatpush.bf16.msra.mxu1 %v8702_v23  ;;  %v5501_v23 = vpop.f32.mrf.mxu3 }
 0x462   : > { %5871 = vmatpush.bf16.msra.mxu0 %v8462_v38  ;;  %v8678_v38 = vor.u32 %v9717_v28, %v8677_v16  ;;  %5838 = vmatmul.bf16.vlgmr.msrb.gmra.mxu1 %v10568_v34  ;;  %v5502_v33 = vadd.f32 %v5501_v23, %v5489_v13  ;;  %v8030_v16 = vor.u32 %v9555_v39, %v8029_v19  ;;  %v11201_v28 = vpop.f32.mrf.mxu2  ;;  %v9456_v13 = vld [vmem:[%s10393_s18 + $0xa4] sm:$0xf]  ;;  %v9627_v19 = vld [vmem:[%s10393_s18 + $0x5f4] sm:$0xf0]  ;;  %v8893_v39 = vld [vmem:[%s10393_s18 + $0xa60] sm:$0xf] }
 0x463   : > { %v8914_v23 = vor.u32 %v9773_v5, %v8911_v55 }
 0x464   : > { %5805 = vmatpush.bf16.msra.mxu3 %v9058_v62  ;;  %5844 = vmatpush.bf16.msrb.mxu2 %v8102_v35  ;;  %v8959_v62 = vld [vmem:[%s10393_s18 + $0xb00] sm:$0xf0]  ;;  %6025 = vst [vmem:[%s11207_s27] sm:$0xff] %v5502_v33  ;;  %v8606_v35 = vor.u32 %v9699_v24, %v8605_v20  ;;  %v5633_v43 = vpop.f32.mrf.mxu1  ;;  %v9771_v20 = vld [vmem:[%s10393_s18 + $0xa74] sm:$0xf0]  ;;  %v5541_v33 = vadd.f32 %v11151_v60, %v11064_v51  ;;  %v8869_v51 = vld [vmem:[%s10393_s18 + $0xa30] sm:$0xf] }
 0x465   : > { %5883 = vmatpush.bf16.msra.mxu1 %v8678_v38  ;;  %v8581_v38 = vld [vmem:[%s10393_s18 + $0x7f0] sm:$0xf]  ;;  %v9765_v60 = vld [vmem:[%s10393_s18 + $0xa44] sm:$0xf0]  ;;  %v9522_v43 = vld [vmem:[%s10393_s18 + $0x2b4] sm:$0xf] }
 0x466   : > { %5872 = vmatpush.bf16.msra.mxu0 %v8438_v1  ;;  %v9797_v1 = vld [vmem:[%s10393_s18 + $0xb4c] sm:$0xf] }
 0x467   : > { %v9010_v31 = vor.u32 %v9797_v1, %v9007_v44  ;;  %v8557_v1 = vld [vmem:[%s10393_s18 + $0x7c0] sm:$0xf] }
 0x468   : > { %5806 = vmatpush.bf16.msra.mxu3 %v9034_v58  ;;  %5845 = vmatpush.bf16.msrb.mxu2 %v8078_v47  ;;  %v8582_v58 = vor.u32 %v9693_v40, %v8581_v38  ;;  %v7698_v47 = vor.u32 %v9468_v54, %v7695_v42  ;;  %v7938_v38 = vor.u32 %v9528_v25, %v7935_v22  ;;  %v9621_v42 = vld [vmem:[%s10393_s18 + $0x5c4] sm:$0xf0]  ;;  %v8221_v25 = vld [vmem:[%s10393_s18 + $0x520] sm:$0xf]  ;;  %v9603_v22 = vld [vmem:[%s10393_s18 + $0x534] sm:$0xf0] }
 0x469   : > { %5884 = vmatpush.bf16.msra.mxu1 %v8654_v53  ;;  %v5503_v44 = vpop.f32.mrf.mxu3  ;;  %v9687_v53 = vld [vmem:[%s10393_s18 + $0x7d4] sm:$0xf0] }
 0x46a   : > { %5873 = vmatpush.bf16.msra.mxu0 %v8414_v11  ;;  %v9791_v11 = vld [vmem:[%s10393_s18 + $0xb1c] sm:$0xf]  ;;  %v5594_v4 = vpop.f32.mrf.mxu2  ;;  %v9615_v44 = vld [vmem:[%s10393_s18 + $0x594] sm:$0xf0] }
 0x46b   : > { %v8986_v9 = vor.u32 %v9791_v11, %v8983_v12  ;;  %v8533_v11 = vld [vmem:[%s10393_s18 + $0x790] sm:$0xf]  ;;  %v9681_v12 = vld [vmem:[%s10393_s18 + $0x7a4] sm:$0xf0]  ;;  %v8270_v4 = vor.u32 %v9615_v44, %v8269_v49 }
 0x46c   : > { %5807 = vmatpush.bf16.msra.mxu3 %v9010_v31  ;;  %5846 = vmatpush.bf16.msrb.mxu2 %v8054_v7  ;;  %v7674_v31 = vor.u32 %v9462_v57, %v7671_v45  ;;  %v9537_v7 = vld [vmem:[%s10393_s18 + $0x324] sm:$0xf0]  ;;  %v9516_v57 = vld [vmem:[%s10393_s18 + $0x284] sm:$0xf]  ;;  %v7887_v45 = vld [vmem:[%s10393_s18 + $0x298] sm:$0xf0] }
 0x46d   : > { %5885 = vmatpush.bf16.msra.mxu1 %v8630_v18  ;;  %v7647_v18 = vld [vmem:[%s10393_s18 + $0xb8] sm:$0xf0]  ;;  %v7958_v24 = vor.u32 %v9537_v7, %v7957_v61  ;;  %v7575_v61 = vld [vmem:[%s10393_s18 + $0x28] sm:$0xf0]  ;;  %v7890_v7 = vor.u32 %v9516_v57, %v7887_v45  ;;  %v8749_v45 = vld [vmem:[%s10393_s18 + $0x940] sm:$0xf] }
 0x46e   : > { %5874 = vmatpush.bf16.msra.mxu0 %v8390_v50  ;;  %v9785_v50 = vld [vmem:[%s10393_s18 + $0xaec] sm:$0xf] }
 0x46f   : > { %v8962_v30 = vor.u32 %v9785_v50, %v8959_v62  ;;  %v8894_v62 = vor.u32 %v9771_v20, %v8893_v39 }
 0x470   : > { %5808 = vmatpush.bf16.msra.mxu3 %v8986_v9  ;;  %5847 = vmatpush.bf16.msrb.mxu2 %v8030_v16  ;;  %v8534_v9 = vor.u32 %v9681_v12, %v8533_v11  ;;  %v7650_v16 = vor.u32 %v9456_v13, %v7647_v18  ;;  %v8821_v11 = vld [vmem:[%s10393_s18 + $0x9d0] sm:$0xf]  ;;  %v9753_v12 = vld [vmem:[%s10393_s18 + $0x9e4] sm:$0xf0]  ;;  %v9510_v13 = vld [vmem:[%s10393_s18 + $0x254] sm:$0xf] }
 0x471   : > { %5886 = vmatpush.bf16.msra.mxu1 %v8606_v35  ;;  %v5553_v35 = vpop.f32.mrf.mxu3  ;;  %v7863_v18 = vld [vmem:[%s10393_s18 + $0x268] sm:$0xf0] }
 0x472   : > { %5875 = vmatpush.bf16.msra.mxu0 %v8366_v29  ;;  %v9779_v29 = vld [vmem:[%s10393_s18 + $0xabc] sm:$0xf]  ;;  %v5554_v40 = vadd.f32 %v5553_v35, %v5541_v33  ;;  %v9504_v35 = vld [vmem:[%s10393_s18 + $0x224] sm:$0xf] }
 0x473   : > { %v8938_v41 = vor.u32 %v9779_v29, %v8935_v46  ;;  %v8294_v46 = vor.u32 %v9621_v42, %v8293_v26  ;;  %v8487_v26 = vld [vmem:[%s10393_s18 + $0x748] sm:$0xf0]  ;;  %v8197_v42 = vld [vmem:[%s10393_s18 + $0x4f0] sm:$0xf] }
 0x474   : > { %5809 = vmatpush.bf16.msra.mxu3 %v8962_v30  ;;  %5848 = vmatpush.bf16.msrb.mxu2 %v8006_v0  ;;  %v7911_v30 = vld [vmem:[%s10393_s18 + $0x2c8] sm:$0xf0]  ;;  %v5567_v0 = vadd.f32 %v11062_v27, %v5554_v40  ;;  %v9759_v27 = vld [vmem:[%s10393_s18 + $0xa14] sm:$0xf0] }
 0x475   : > { %5887 = vmatpush.bf16.msra.mxu1 %v8582_v58  ;;  %v8870_v58 = vor.u32 %v9765_v60, %v8869_v51  ;;  %v9597_v51 = vld [vmem:[%s10393_s18 + $0x504] sm:$0xf0] }
 0x476   : > { %5876 = vmatpush.bf16.msra.mxu0 %v8342_v6  ;;  %v11225_v56 = vpop.f32.mrf.mxu0  ;;  %v8558_v6 = vor.u32 %v9687_v53, %v8557_v1  ;;  %v7914_v1 = vor.u32 %v9522_v43, %v7911_v30  ;;  %v8845_v53 = vld [vmem:[%s10393_s18 + $0xa00] sm:$0xf]  ;;  %v5580_v33 = vadd.f32 %v11103_v15, %v5567_v0  ;;  %v8773_v0 = vld [vmem:[%s10393_s18 + $0x970] sm:$0xf] }
 0x477   : > { %v8846_v5 = vor.u32 %v9759_v27, %v8845_v53  ;;  %v8173_v53 = vld [vmem:[%s10393_s18 + $0x4c0] sm:$0xf]  ;;  %v9591_v27 = vld [vmem:[%s10393_s18 + $0x4d4] sm:$0xf0] }
 0x478   : > { %5810 = vmatpush.bf16.msra.mxu3 %v8938_v41  ;;  %5849 = vmatpush.bf16.msrb.mxu2 %v7982_v2  ;;  %v9438_v2 = vld [vmem:[%s10393_s18 + $0x14] sm:$0xf] }
 0x479   : > { %5877 = vmatmul.bf16.vlgmr.msra.gmra.mxu0 %v10652_v59  ;;  %5888 = vmatpush.bf16.msra.mxu1 %v8558_v6  ;;  %v5555_v55 = vpop.f32.mrf.mxu3  ;;  %v8245_v6 = vld [vmem:[%s10393_s18 + $0x550] sm:$0xf]  ;;  %v7578_v20 = vor.u32 %v9438_v2, %v7575_v61  ;;  %v9492_v2 = vld [vmem:[%s10393_s18 + $0x1c4] sm:$0xf] }
 0x47a   : > { %5921 = vmatpush.bf16.msrb.mxu0 %v7746_v21  ;;  %v8317_v21 = vld [vmem:[%s10393_s18 + $0x5e0] sm:$0xf]  ;;  %v8439_v55 = vld [vmem:[%s10393_s18 + $0x6e8] sm:$0xf0] }
 0x47b   : > { %v8318_v50 = vor.u32 %v9627_v19, %v8317_v21  ;;  %v9672_v21 = vld [vmem:[%s10393_s18 + $0x764] sm:$0xf]  ;;  %v8511_v19 = vld [vmem:[%s10393_s18 + $0x778] sm:$0xf0] }
 0x47c   : > { %5811 = vmatpush.bf16.msra.mxu3 %v8914_v23  ;;  %5850 = vmatpush.bf16.msrb.mxu2 %v7958_v24  ;;  %v11273_v39 = vpop.f32.mrf.mxu1  ;;  %v8822_v24 = vor.u32 %v9753_v12, %v8821_v11  ;;  %v8149_v11 = vld [vmem:[%s10393_s18 + $0x490] sm:$0xf]  ;;  %v9585_v12 = vld [vmem:[%s10393_s18 + $0x4a4] sm:$0xf0] }
 0x47d   : > { %5889 = vmatpush.bf16.msra.mxu1 %v8534_v9  ;;  %v7866_v9 = vor.u32 %v9510_v13, %v7863_v18  ;;  %v8725_v13 = vld [vmem:[%s10393_s18 + $0x910] sm:$0xf] }
 0x47e   : > { %5922 = vmatpush.bf16.msrb.mxu0 %v7722_v36  ;;  %v9450_v36 = vld [vmem:[%s10393_s18 + $0x74] sm:$0xf]  ;;  %v5672_v54 = vpop.f32.mrf.mxu0  ;;  %v11284_v40 = vpop.f32.mrf.mxu2 }
 0x47f   : > { %v7626_v29 = vor.u32 %v9450_v36, %v7623_v37  ;;  %5812 = vmatmul.bf16.vlgmr.msra.gmra.mxu3 %v10855_v63  ;;  %5851 = vmatmul.bf16.vlgmr.msrb.gmra.mxu2 %v10602_v14  ;;  %v7839_v36 = vld [vmem:[%s10393_s18 + $0x238] sm:$0xf0]  ;;  %v9666_v37 = vld [vmem:[%s10393_s18 + $0x734] sm:$0xf]  ;;  %v5593_v54 = vadd.f32 %v11201_v28, %v5580_v33  ;;  %v9660_v28 = vld [vmem:[%s10393_s18 + $0x704] sm:$0xf] }
 0x480   : > { %5856 = vmatpush.bf16.msrb.mxu3 %v8318_v50  ;;  %5895 = vmatpush.bf16.msra.mxu2 %v8894_v62  ;;  %v8797_v50 = vld [vmem:[%s10393_s18 + $0x9a0] sm:$0xf]  ;;  %v9747_v62 = vld [vmem:[%s10393_s18 + $0x9b4] sm:$0xf0]  ;;  %v7842_v60 = vor.u32 %v9504_v35, %v7839_v36  ;;  %v8490_v43 = vor.u32 %v9666_v37, %v8487_v26  ;;  %v9720_v36 = vld [vmem:[%s10393_s18 + $0x8e4] sm:$0xf] }
 0x481   : > { %5934 = vmatpush.bf16.msrb.mxu1 %v7938_v38  ;;  %v8222_v38 = vor.u32 %v9603_v22, %v8221_v25  ;;  %v8798_v15 = vor.u32 %v9747_v62, %v8797_v50  ;;  %v5605_v30 = vpop.f32.mrf.mxu3  ;;  %v9648_v25 = vld [vmem:[%s10393_s18 + $0x6a4] sm:$0xf]  ;;  %v8415_v22 = vld [vmem:[%s10393_s18 + $0x6b8] sm:$0xf0]  ;;  %v9085_v33 = vld [vmem:[%s10393_s18 + $0xbe0] sm:$0xf]  ;;  %v8150_v62 = vor.u32 %v9585_v12, %v8149_v11 }
 0x482   : > { %5923 = vmatpush.bf16.msrb.mxu0 %v7698_v47  ;;  %v9444_v47 = vld [vmem:[%s10393_s18 + $0x44] sm:$0xf]  ;;  %5890 = vmatmul.bf16.vlgmr.msra.gmra.mxu1 %v10722_v17  ;;  %v8127_v50 = vld [vmem:[%s10393_s18 + $0x478] sm:$0xf0]  ;;  %v9013_v11 = vld [vmem:[%s10393_s18 + $0xb50] sm:$0xf] }
 0x483   : > { %v7602_v41 = vor.u32 %v9444_v47, %v7599_v48  ;;  %v7815_v47 = vld [vmem:[%s10393_s18 + $0x208] sm:$0xf0]  ;;  %v8463_v48 = vld [vmem:[%s10393_s18 + $0x718] sm:$0xf0] }
 0x484   : > { %5857 = vmatpush.bf16.msrb.mxu3 %v8294_v46  ;;  %5896 = vmatpush.bf16.msra.mxu2 %v8870_v58  ;;  %v9498_v46 = vld [vmem:[%s10393_s18 + $0x1f4] sm:$0xf]  ;;  %v5606_v58 = vadd.f32 %v5605_v30, %v5593_v54  ;;  %v5685_v49 = vpop.f32.mrf.mxu1  ;;  %v8466_v57 = vor.u32 %v9660_v28, %v8463_v48  ;;  %v8703_v37 = vld [vmem:[%s10393_s18 + $0x8f8] sm:$0xf0] }
 0x485   : > { %5935 = vmatpush.bf16.msrb.mxu1 %v7914_v1  ;;  %v8198_v1 = vor.u32 %v9597_v51, %v8197_v42  ;;  %v9642_v42 = vld [vmem:[%s10393_s18 + $0x674] sm:$0xf]  ;;  %v8391_v51 = vld [vmem:[%s10393_s18 + $0x688] sm:$0xf0] }
 0x486   : > { %5924 = vmatpush.bf16.msrb.mxu0 %v7674_v31  ;;  %v9609_v31 = vld [vmem:[%s10393_s18 + $0x564] sm:$0xf0]  ;;  %6026 = vst [vmem:[%s11207_s27 + $0x8] sm:$0xff] %v5606_v58  ;;  %v9714_v58 = vld [vmem:[%s10393_s18 + $0x8b4] sm:$0xf]  ;;  %v8394_v28 = vor.u32 %v9642_v42, %v8391_v51 }
 0x487   : > { %v8246_v23 = vor.u32 %v9609_v31, %v8245_v6  ;;  %v8174_v6 = vor.u32 %v9591_v27, %v8173_v53  ;;  %v9037_v53 = vld [vmem:[%s10393_s18 + $0xb80] sm:$0xf] }
 0x488   : > { %5858 = vmatpush.bf16.msrb.mxu3 %v8270_v4  ;;  %5897 = vmatpush.bf16.msra.mxu2 %v8846_v5  ;;  %v7791_v4 = vld [vmem:[%s10393_s18 + $0x1d8] sm:$0xf0]  ;;  %v9654_v5 = vld [vmem:[%s10393_s18 + $0x6d4] sm:$0xf] }
 0x489   : > { %5936 = vmatpush.bf16.msrb.mxu1 %v7890_v7  ;;  %v5646_v7 = vpop.f32.mrf.mxu2  ;;  %v7794_v18 = vor.u32 %v9492_v2, %v7791_v4  ;;  %v9708_v2 = vld [vmem:[%s10393_s18 + $0x884] sm:$0xf]  ;;  %v8655_v4 = vld [vmem:[%s10393_s18 + $0x898] sm:$0xf0] }
 0x48a   : > { %5925 = vmatpush.bf16.msrb.mxu0 %v7650_v16  ;;  %v8514_v16 = vor.u32 %v9672_v21, %v8511_v19  ;;  %v8442_v21 = vor.u32 %v9654_v5, %v8439_v55  ;;  %v5607_v19 = vpop.f32.mrf.mxu3  ;;  %v8343_v7 = vld [vmem:[%s10393_s18 + $0x628] sm:$0xf0]  ;;  %v8658_v12 = vor.u32 %v9708_v2, %v8655_v4 }
 0x48b   : > { %v9702_v19 = vld [vmem:[%s10393_s18 + $0x854] sm:$0xf] }
 0x48c   : > { %5859 = vmatpush.bf16.msrb.mxu3 %v8246_v23  ;;  %5898 = vmatpush.bf16.msra.mxu2 %v8822_v24  ;;  %v9486_v23 = vld [vmem:[%s10393_s18 + $0x194] sm:$0xf]  ;;  %v7767_v24 = vld [vmem:[%s10393_s18 + $0x1a8] sm:$0xf0] }
 0x48d   : > { %5937 = vmatpush.bf16.msrb.mxu1 %v7866_v9  ;;  %v9819_v9 = vld [vmem:[%s10393_s18 + $0xbf4] sm:$0xf0]  ;;  %v7770_v26 = vor.u32 %v9486_v23, %v7767_v24 }
 0x48e   : > { %5926 = vmatpush.bf16.msrb.mxu0 %v7626_v29  ;;  %v9741_v29 = vld [vmem:[%s10393_s18 + $0x984] sm:$0xf0] }
 0x48f   : > { %v8774_v44 = vor.u32 %v9741_v29, %v8773_v0  ;;  %v9813_v0 = vld [vmem:[%s10393_s18 + $0xbc4] sm:$0xf0]  ;;  %v9570_v29 = vld [vmem:[%s10393_s18 + $0x434] sm:$0xf] }
 0x490   : > { %5860 = vmatpush.bf16.msrb.mxu3 %v8222_v38  ;;  %5899 = vmatpush.bf16.msra.mxu2 %v8798_v15  ;;  %v8418_v38 = vor.u32 %v9648_v25, %v8415_v22  ;;  %v9086_v15 = vor.u32 %v9819_v9, %v9085_v33  ;;  %v8989_v9 = vld [vmem:[%s10393_s18 + $0xb20] sm:$0xf] }
 0x491   : > { %5938 = vmatpush.bf16.msrb.mxu1 %v7842_v60  ;;  %v9061_v60 = vld [vmem:[%s10393_s18 + $0xbb0] sm:$0xf] }
 0x492   : > { %5927 = vmatpush.bf16.msrb.mxu0 %v7602_v41  ;;  %v9735_v41 = vld [vmem:[%s10393_s18 + $0x954] sm:$0xf0]  ;;  %v9062_v48 = vor.u32 %v9813_v0, %v9061_v60  ;;  %v8583_v0 = vld [vmem:[%s10393_s18 + $0x808] sm:$0xf0] }
 0x493   : > { %v8750_v31 = vor.u32 %v9735_v41, %v8749_v45  ;;  %v8079_v45 = vld [vmem:[%s10393_s18 + $0x418] sm:$0xf0]  ;;  %v3472_v41 = vperm.slane %v11169_v10, 3 }
 0x494   : > { %5861 = vmatpush.bf16.msrb.mxu3 %v8198_v1  ;;  %5900 = vmatpush.bf16.msra.mxu2 %v8774_v44  ;;  %v9636_v1 = vld [vmem:[%s10393_s18 + $0x644] sm:$0xf]  ;;  %v8367_v44 = vld [vmem:[%s10393_s18 + $0x658] sm:$0xf0] }
 0x495   : > { %v8370_v5 = vor.u32 %v9636_v1, %v8367_v44  ;;  %v9540_v1 = vld [vmem:[%s10393_s18 + $0x344] sm:$0xf] }
 0x496   : > { %5928 = vmatpush.bf16.msrb.mxu0 %v7578_v20  ;;  %v11305_v61 = vpop.f32.mrf.mxu0  ;;  %v9729_v20 = vld [vmem:[%s10393_s18 + $0x924] sm:$0xf0]  ;;  %v9684_v44 = vld [vmem:[%s10393_s18 + $0x7c4] sm:$0xf] }
 0x497   : > { %v8726_v35 = vor.u32 %v9729_v20, %v8725_v13  ;;  %v9801_v13 = vld [vmem:[%s10393_s18 + $0xb64] sm:$0xf0]  ;;  %v8631_v20 = vld [vmem:[%s10393_s18 + $0x868] sm:$0xf0] }
 0x498   : > { %5862 = vmatpush.bf16.msrb.mxu3 %v8174_v6  ;;  %5901 = vmatpush.bf16.msra.mxu2 %v8750_v31  ;;  %v9630_v31 = vld [vmem:[%s10393_s18 + $0x614] sm:$0xf]  ;;  %v9014_v22 = vor.u32 %v9801_v13, %v9013_v11  ;;  %v8319_v11 = vld [vmem:[%s10393_s18 + $0x5f8] sm:$0xf0] }
 0x499   : > { %5929 = vmatmul.bf16.vlgmr.msrb.gmra.mxu0 %v10551_v3  ;;  %v7818_v3 = vor.u32 %v9498_v46, %v7815_v47  ;;  %v8103_v46 = vld [vmem:[%s10393_s18 + $0x448] sm:$0xf0]  ;;  %v8346_v24 = vor.u32 %v9630_v31, %v8343_v7  ;;  %v9624_v7 = vld [vmem:[%s10393_s18 + $0x5e4] sm:$0xf]  ;;  %v8895_v13 = vld [vmem:[%s10393_s18 + $0xa78] sm:$0xf0] }
 0x49a   : > { %5973 = vmatpush.bf16.msra.mxu0 %v8514_v16  ;;  %v9576_v16 = vld [vmem:[%s10393_s18 + $0x464] sm:$0xf]  ;;  %v8679_v47 = vld [vmem:[%s10393_s18 + $0x8c8] sm:$0xf0]  ;;  %v8106_v49 = vor.u32 %v9570_v29, %v8103_v46 }
 0x49b   : > { %5939 = vmatpush.bf16.msrb.mxu1 %v7818_v3  ;;  %v8130_v54 = vor.u32 %v9576_v16, %v8127_v50  ;;  %v8682_v27 = vor.u32 %v9714_v58, %v8679_v47  ;;  %v9807_v3 = vld [vmem:[%s10393_s18 + $0xb94] sm:$0xf0]  ;;  %v8634_v16 = vor.u32 %v9702_v19, %v8631_v20  ;;  %v8535_v31 = vld [vmem:[%s10393_s18 + $0x7a8] sm:$0xf0]  ;;  %v8322_v19 = vor.u32 %v9624_v7, %v8319_v11 }
 0x49c   : > { %5863 = vmatpush.bf16.msrb.mxu3 %v8150_v62  ;;  %5902 = vmatpush.bf16.msra.mxu2 %v8726_v35  ;;  %v9038_v55 = vor.u32 %v9807_v3, %v9037_v53  ;;  %v5735_v23 = vpop.f32.mrf.mxu1  ;;  %v9795_v50 = vld [vmem:[%s10393_s18 + $0xb34] sm:$0xf0]  ;;  %v8031_v62 = vld [vmem:[%s10393_s18 + $0x3b8] sm:$0xf0]  ;;  %v9696_v35 = vld [vmem:[%s10393_s18 + $0x824] sm:$0xf] }
 0x49d   : > { %v8727_v11 = vld [vmem:[%s10393_s18 + $0x928] sm:$0xf0] }
 0x49e   : > { %5974 = vmatpush.bf16.msra.mxu0 %v8490_v43  ;;  %v8706_v43 = vor.u32 %v9720_v36, %v8703_v37  ;;  %v5724_v30 = vpop.f32.mrf.mxu0  ;;  %v8607_v36 = vld [vmem:[%s10393_s18 + $0x838] sm:$0xf0]  ;;  %v5645_v37 = vadd.f32 %v11284_v40, %v11190_v8  ;;  %v11361_v60 = vpop.f32.mrf.mxu2  ;;  %v8007_v8 = vld [vmem:[%s10393_s18 + $0x388] sm:$0xf0]  ;;  %v9690_v40 = vld [vmem:[%s10393_s18 + $0x7f4] sm:$0xf] }
 0x49f   : > { %5940 = vmatpush.bf16.msrb.mxu1 %v7794_v18  ;;  %5864 = vmatmul.bf16.vlgmr.msrb.gmra.mxu3 %v10611_v32  ;;  %v9558_v18 = vld [vmem:[%s10393_s18 + $0x3d4] sm:$0xf]  ;;  %v8610_v42 = vor.u32 %v9696_v35, %v8607_v36  ;;  %v9756_v35 = vld [vmem:[%s10393_s18 + $0xa04] sm:$0xf]  ;;  %v8847_v36 = vld [vmem:[%s10393_s18 + $0xa18] sm:$0xf0] }
 0x4a0   : > { %5908 = vmatpush.bf16.msra.mxu3 %v9086_v15  ;;  %5947 = vmatpush.bf16.msrb.mxu2 %v8130_v54  ;;  %v8965_v54 = vld [vmem:[%s10393_s18 + $0xaf0] sm:$0xf]  ;;  %v9546_v30 = vld [vmem:[%s10393_s18 + $0x374] sm:$0xf] }
 0x4a1   : > { %5903 = vmatmul.bf16.vlgmr.msra.gmra.mxu2 %v10787_v52  ;;  %v5657_v15 = vpop.f32.mrf.mxu3  ;;  %v8010_v47 = vor.u32 %v9546_v30, %v8007_v8  ;;  %v9600_v30 = vld [vmem:[%s10393_s18 + $0x524] sm:$0xf]  ;;  %v8223_v8 = vld [vmem:[%s10393_s18 + $0x538] sm:$0xf0] }
 0x4a2   : > { %5975 = vmatpush.bf16.msra.mxu0 %v8466_v57  ;;  %v9564_v57 = vld [vmem:[%s10393_s18 + $0x404] sm:$0xf]  ;;  %v5658_v51 = vadd.f32 %v5657_v15, %v5645_v37  ;;  %v8247_v15 = vld [vmem:[%s10393_s18 + $0x568] sm:$0xf0] }
 0x4a3   : > { %5941 = vmatpush.bf16.msrb.mxu1 %v7770_v26  ;;  %v8082_v6 = vor.u32 %v9564_v57, %v8079_v45  ;;  %v8990_v26 = vor.u32 %v9795_v50, %v8989_v9  ;;  %v8917_v45 = vld [vmem:[%s10393_s18 + $0xa90] sm:$0xf]  ;;  %v8871_v9 = vld [vmem:[%s10393_s18 + $0xa48] sm:$0xf0] }
 0x4a4   : > { %5909 = vmatpush.bf16.msra.mxu3 %v9062_v48  ;;  %5948 = vmatpush.bf16.msrb.mxu2 %v8106_v49  ;;  %v11370_v29 = vadd.f32 %v11225_v56, %v5658_v51  ;;  %v5737_v46 = vpop.f32.mrf.mxu1  ;;  %v8586_v48 = vor.u32 %v9690_v40, %v8583_v0  ;;  %v9783_v49 = vld [vmem:[%s10393_s18 + $0xad4] sm:$0xf0]  ;;  %v8559_v56 = vld [vmem:[%s10393_s18 + $0x7d8] sm:$0xf0]  ;;  %v9744_v40 = vld [vmem:[%s10393_s18 + $0x9a4] sm:$0xf] }
 0x4a5   : > { %v8562_v2 = vor.u32 %v9684_v44, %v8559_v56  ;;  %v8799_v0 = vld [vmem:[%s10393_s18 + $0x9b8] sm:$0xf0] }
 0x4a6   : > { %5976 = vmatpush.bf16.msra.mxu0 %v8442_v21  ;;  %5942 = vmatmul.bf16.vlgmr.msrb.gmra.mxu1 %v10568_v34  ;;  %v8055_v34 = vld [vmem:[%s10393_s18 + $0x3e8] sm:$0xf0]  ;;  %v5723_v21 = vadd.f32 %v11305_v61, %v3472_v41  ;;  %v9552_v61 = vld [vmem:[%s10393_s18 + $0x3a4] sm:$0xf]  ;;  %v9777_v41 = vld [vmem:[%s10393_s18 + $0xaa4] sm:$0xf0]  ;;  %v5698_v4 = vpop.f32.mrf.mxu2  ;;  %v5684_v51 = vadd.f32 %v11273_v39, %v11370_v29  ;;  %v8802_v39 = vor.u32 %v9744_v40, %v8799_v0 }
 0x4a7   : > { %5986 = vmatpush.bf16.msra.mxu1 %v8706_v43  ;;  %v8058_v33 = vor.u32 %v9558_v18, %v8055_v34  ;;  %v9789_v43 = vld [vmem:[%s10393_s18 + $0xb04] sm:$0xf0]  ;;  %v8918_v18 = vor.u32 %v9777_v41, %v8917_v45  ;;  %v8751_v45 = vld [vmem:[%s10393_s18 + $0x958] sm:$0xf0] }
 0x4a8   : > { %5910 = vmatpush.bf16.msra.mxu3 %v9038_v55  ;;  %5949 = vmatpush.bf16.msrb.mxu2 %v8082_v6  ;;  %v11350_v25 = vadd.f32 %v5735_v23, %v5723_v21  ;;  %v8966_v58 = vor.u32 %v9789_v43, %v8965_v54  ;;  %v7959_v55 = vld [vmem:[%s10393_s18 + $0x328] sm:$0xf0]  ;;  %v9678_v6 = vld [vmem:[%s10393_s18 + $0x794] sm:$0xf]  ;;  %v5697_v46 = vadd.f32 %v11361_v60, %v5684_v51  ;;  %v8943_v40 = vld [vmem:[%s10393_s18 + $0xad8] sm:$0xf0] }
 0x4a9   : > { %v5659_v57 = vpop.f32.mrf.mxu3  ;;  %v8538_v21 = vor.u32 %v9678_v6, %v8535_v31  ;;  %v9618_v23 = vld [vmem:[%s10393_s18 + $0x5b4] sm:$0xf]  ;;  %v8151_v6 = vld [vmem:[%s10393_s18 + $0x4a8] sm:$0xf0] }
 0x4aa   : > { %5977 = vmatpush.bf16.msra.mxu0 %v8418_v38  ;;  %v8034_v38 = vor.u32 %v9552_v61, %v8031_v62  ;;  %v9612_v61 = vld [vmem:[%s10393_s18 + $0x584] sm:$0xf]  ;;  %v8271_v62 = vld [vmem:[%s10393_s18 + $0x598] sm:$0xf0]  ;;  %v9750_v54 = vld [vmem:[%s10393_s18 + $0x9d4] sm:$0xf] }
 0x4ab   : > { %5987 = vmatpush.bf16.msra.mxu1 %v8682_v27  ;;  %v8274_v37 = vor.u32 %v9612_v61, %v8271_v62  ;;  %v9732_v57 = vld [vmem:[%s10393_s18 + $0x944] sm:$0xf]  ;;  %v9726_v31 = vld [vmem:[%s10393_s18 + $0x914] sm:$0xf]  ;;  %v9015_v61 = vld [vmem:[%s10393_s18 + $0xb68] sm:$0xf0] }
 0x4ac   : > { %5911 = vmatpush.bf16.msra.mxu3 %v9014_v22  ;;  %5950 = vmatpush.bf16.msrb.mxu2 %v8058_v33  ;;  %v9762_v33 = vld [vmem:[%s10393_s18 + $0xa34] sm:$0xf]  ;;  %v8754_v4 = vor.u32 %v9732_v57, %v8751_v45  ;;  %v9926_v45 = vld [vmem:[%s10834_s19] sm:$0x3f] }
 0x4ad   : > { %v8874_v50 = vor.u32 %v9762_v33, %v8871_v9  ;;  %v9039_v33 = vld [vmem:[%s10393_s18 + $0xb98] sm:$0xf0]  ;;  %v3473_v9 = vperm.slane %v11169_v10, 4  ;;  %v9786_v10 = vld [vmem:[%s10393_s18 + $0xaf4] sm:$0xf] }
 0x4ae   : > { %5978 = vmatpush.bf16.msra.mxu0 %v8394_v28  ;;  %v8941_v28 = vld [vmem:[%s10393_s18 + $0xac0] sm:$0xf] }
 0x4af   : > { %5988 = vmatpush.bf16.msra.mxu1 %v8658_v12  ;;  %v8942_v27 = vor.u32 %v9783_v49, %v8941_v28  ;;  %v9768_v12 = vld [vmem:[%s10393_s18 + $0xa64] sm:$0xf]  ;;  %v8199_v28 = vld [vmem:[%s10393_s18 + $0x508] sm:$0xf0] }
 0x4b0   : > { %5912 = vmatpush.bf16.msra.mxu3 %v8990_v26  ;;  %5951 = vmatpush.bf16.msrb.mxu2 %v8034_v38  ;;  %v8898_v20 = vor.u32 %v9768_v12, %v8895_v13  ;;  %v8850_v26 = vor.u32 %v9756_v35, %v8847_v36  ;;  %v9606_v38 = vld [vmem:[%s10393_s18 + $0x554] sm:$0xf]  ;;  %v9816_v12 = vld [vmem:[%s10393_s18 + $0xbe4] sm:$0xf]  ;;  %v9087_v13 = vld [vmem:[%s10393_s18 + $0xbf8] sm:$0xf0] }
 0x4b2   : > { %5979 = vmatpush.bf16.msra.mxu0 %v8370_v5  ;;  %v9534_v5 = vld [vmem:[%s10393_s18 + $0x314] sm:$0xf] }
 0x4b3   : > { %5989 = vmatpush.bf16.msra.mxu1 %v8634_v16  ;;  %v7962_v34 = vor.u32 %v9534_v5, %v7959_v55  ;;  %v9582_v55 = vld [vmem:[%s10393_s18 + $0x494] sm:$0xf] }
 0x4b4   : > { %5913 = vmatpush.bf16.msra.mxu3 %v8966_v58  ;;  %5952 = vmatpush.bf16.msrb.mxu2 %v8010_v47  ;;  %v8226_v58 = vor.u32 %v9600_v30, %v8223_v8  ;;  %v9594_v47 = vld [vmem:[%s10393_s18 + $0x4f4] sm:$0xf]  ;;  %v9780_v8 = vld [vmem:[%s10393_s18 + $0xac4] sm:$0xf] }
 0x4b5   : > { %v8202_v44 = vor.u32 %v9594_v47, %v8199_v28  ;;  %v8946_v0 = vor.u32 %v9780_v8, %v8943_v40 }
 0x4b6   : > { %5980 = vmatpush.bf16.msra.mxu0 %v8346_v24  ;;  %v11378_v53 = vpop.f32.mrf.mxu0  ;;  %v8295_v24 = vld [vmem:[%s10393_s18 + $0x5c8] sm:$0xf0] }
 0x4b7   : > { %5990 = vmatpush.bf16.msra.mxu1 %v8610_v42  ;;  %v8298_v16 = vor.u32 %v9618_v23, %v8295_v24  ;;  %v8823_v42 = vld [vmem:[%s10393_s18 + $0x9e8] sm:$0xf0] }
 0x4b8   : > { %5914 = vmatpush.bf16.msra.mxu3 %v8942_v27  ;;  %v8826_v43 = vor.u32 %v9750_v54, %v8823_v42  ;;  %v9588_v27 = vld [vmem:[%s10393_s18 + $0x4c4] sm:$0xf] }
 0x4b9   : > { %5981 = vmatmul.bf16.vlgmr.msra.gmra.mxu0 %v10652_v59  ;;  %v7983_v59 = vld [vmem:[%s10393_s18 + $0x358] sm:$0xf0] }
 0x4ba   : > { %v7986_v3 = vor.u32 %v9540_v1, %v7983_v59  ;;  %v9738_v1 = vld [vmem:[%s10393_s18 + $0x974] sm:$0xf]  ;;  %v8775_v59 = vld [vmem:[%s10393_s18 + $0x988] sm:$0xf0] }
 0x4bb   : > { %5991 = vmatpush.bf16.msra.mxu1 %v8586_v48  ;;  %v8778_v56 = vor.u32 %v9738_v1, %v8775_v59 }
 0x4bc   : > { %5953 = vmatpush.bf16.msrb.mxu2 %v7986_v3  ;;  %5915 = vmatpush.bf16.msra.mxu3 %v8918_v18  ;;  %v8175_v3 = vld [vmem:[%s10393_s18 + $0x4d8] sm:$0xf0]  ;;  %v8154_v18 = vor.u32 %v9582_v55, %v8151_v6 }
 0x4be   : > { %v5776_v22 = vpop.f32.mrf.mxu0 }
 0x4bf   : > { %5992 = vmatpush.bf16.msra.mxu1 %v8562_v2  ;;  %5916 = vmatmul.bf16.vlgmr.msra.gmra.mxu3 %v10855_v63  ;;  %v8178_v2 = vor.u32 %v9588_v27, %v8175_v3  ;;  %v9804_v22 = vld [vmem:[%s10393_s18 + $0xb84] sm:$0xf] }
 0x4c0   : > { %5954 = vmatpush.bf16.msrb.mxu2 %v7962_v34  ;;  %5960 = vmatpush.bf16.msrb.mxu3 %v8322_v19  ;;  %v8730_v34 = vor.u32 %v9726_v31, %v8727_v11  ;;  %v9810_v19 = vld [vmem:[%s10393_s18 + $0xbb4] sm:$0xf] }
 0x4c1   : > { %v5709_v29 = vpop.f32.mrf.mxu3 }
 0x4c2   : > { %v5710_v48 = vadd.f32 %v5709_v29, %v5697_v46  ;;  %v5748_v49 = vpop.f32.mrf.mxu2 }
 0x4c3   : > { %5993 = vmatpush.bf16.msra.mxu1 %v8538_v21  ;;  %5955 = vmatmul.bf16.vlgmr.msrb.gmra.mxu2 %v10602_v14  ;;  %v11407_v14 = vpop.f32.mrf.mxu1  ;;  %v9090_v21 = vor.u32 %v9816_v12, %v9087_v13 }
 0x4c4   : > { %5999 = vmatpush.bf16.msra.mxu2 %v8898_v20  ;;  %5961 = vmatpush.bf16.msrb.mxu3 %v8298_v16  ;;  %6027 = vst [vmem:[%s11207_s27 + $0x10] sm:$0xff] %v5710_v48  ;;  %v9063_v20 = vld [vmem:[%s10393_s18 + $0xbc8] sm:$0xf0]  ;;  %v9042_v16 = vor.u32 %v9804_v22, %v9039_v33 }
 0x4c5   : > { %v9066_v24 = vor.u32 %v9810_v19, %v9063_v20 }
 0x4c6   : > { %5994 = vmatmul.bf16.vlgmr.msra.gmra.mxu1 %v10722_v17  ;;  %v8250_v17 = vor.u32 %v9606_v38, %v8247_v15  ;;  %v8967_v15 = vld [vmem:[%s10393_s18 + $0xb08] sm:$0xf0] }
 0x4c8   : > { %6000 = vmatpush.bf16.msra.mxu2 %v8874_v50  ;;  %5962 = vmatpush.bf16.msrb.mxu3 %v8274_v37  ;;  %v9798_v50 = vld [vmem:[%s10393_s18 + $0xb54] sm:$0xf]  ;;  %v9792_v37 = vld [vmem:[%s10393_s18 + $0xb24] sm:$0xf] }
 0x4c9   : > { %v5711_v5 = vpop.f32.mrf.mxu3  ;;  %v9018_v35 = vor.u32 %v9798_v50, %v9015_v61 }
 0x4ca   : > { %v5750_v7 = vpop.f32.mrf.mxu2 }
 0x4cb   : > { %v5789_v60 = vpop.f32.mrf.mxu1 }
 0x4cc   : > { %6001 = vmatpush.bf16.msra.mxu2 %v8850_v26  ;;  %5963 = vmatpush.bf16.msrb.mxu3 %v8250_v17  ;;  %v8991_v26 = vld [vmem:[%s10393_s18 + $0xb38] sm:$0xf0]  ;;  %v8970_v17 = vor.u32 %v9786_v10, %v8967_v15 }
 0x4d0   : > { %6002 = vmatpush.bf16.msra.mxu2 %v8826_v43  ;;  %5964 = vmatpush.bf16.msrb.mxu3 %v8226_v58  ;;  %v9774_v58 = vld [vmem:[%s10393_s18 + $0xa94] sm:$0xf] }
 0x4d4   : > { %6003 = vmatpush.bf16.msra.mxu2 %v8802_v39  ;;  %5965 = vmatpush.bf16.msrb.mxu3 %v8202_v44  ;;  %v8919_v39 = vld [vmem:[%s10393_s18 + $0xaa8] sm:$0xf0] }
 0x4d5   : > { %v8922_v47 = vor.u32 %v9774_v58, %v8919_v39 }
 0x4d6   : > { %v5826_v41 = vpop.f32.mrf.mxu0 }
 0x4d7   : > { %v5827_v62 = vadd.f32 %v5826_v41, %v3473_v9  ;;  %v3474_v41 = vperm.slane %v9926_v45, 5 }
 0x4d8   : > { %6004 = vmatpush.bf16.msra.mxu2 %v8778_v56  ;;  %5966 = vmatpush.bf16.msrb.mxu3 %v8178_v2 }
 0x4dc   : > { %6005 = vmatpush.bf16.msra.mxu2 %v8754_v4  ;;  %5967 = vmatpush.bf16.msrb.mxu3 %v8154_v18 }
 0x4de   : > { %v5828_v23 = vpop.f32.mrf.mxu0 }
 0x4df   : > { %5968 = vmatmul.bf16.vlgmr.msrb.gmra.mxu3 %v10611_v32  ;;  %v5839_v36 = vpop.f32.mrf.mxu1  ;;  %v8994_v32 = vor.u32 %v9792_v37, %v8991_v26 }
 0x4e0   : > { %6006 = vmatpush.bf16.msra.mxu2 %v8730_v34  ;;  %6012 = vmatpush.bf16.msra.mxu3 %v9090_v21  ;;  %v5840_v38 = vadd.f32 %v5839_v36, %v5827_v62 }
 0x4e2   : > { %v5761_v54 = vpop.f32.mrf.mxu3  ;;  %v5800_v51 = vpop.f32.mrf.mxu2 }
 0x4e3   : > { %6007 = vmatmul.bf16.vlgmr.msra.gmra.mxu2 %v10787_v52  ;;  %v5749_v52 = vadd.f32 %v5748_v49, %v11350_v25 }
 0x4e4   : > { %6013 = vmatpush.bf16.msra.mxu3 %v9066_v24 }
 0x4e5   : > { %v5762_v42 = vadd.f32 %v5761_v54, %v5749_v52 }
 0x4e7   : > { %v5775_v43 = vadd.f32 %v11378_v53, %v5762_v42  ;;  %v5841_v30 = vpop.f32.mrf.mxu1 }
 0x4e8   : > { %6014 = vmatpush.bf16.msra.mxu3 %v9042_v16 }
 0x4e9   : > { %v5788_v53 = vadd.f32 %v11407_v14, %v5775_v43 }
 0x4ea   : > { %v5763_v25 = vpop.f32.mrf.mxu3  ;;  %v5802_v29 = vpop.f32.mrf.mxu2 }
 0x4eb   : > { %v5801_v49 = vadd.f32 %v5800_v51, %v5788_v53 }
 0x4ec   : > { %6015 = vmatpush.bf16.msra.mxu3 %v9018_v35 }
 0x4f0   : > { %6016 = vmatpush.bf16.msra.mxu3 %v8994_v32 }
 0x4f4   : > { %6017 = vmatpush.bf16.msra.mxu3 %v8970_v17 }
 0x4f6   : > { %v5878_v46 = vpop.f32.mrf.mxu0 }
 0x4f8   : > { %6018 = vmatpush.bf16.msra.mxu3 %v8946_v0 }
 0x4fc   : > { %6019 = vmatpush.bf16.msra.mxu3 %v8922_v47 }
 0x4fe   : > { %v5880_v28 = vpop.f32.mrf.mxu0 }
 0x4ff   : > { %6020 = vmatmul.bf16.vlgmr.msra.gmra.mxu3 %v10855_v63  ;;  %v5891_v48 = vpop.f32.mrf.mxu1 }
 0x502   : > { %v5813_v1 = vpop.f32.mrf.mxu3  ;;  %v5852_v60 = vpop.f32.mrf.mxu2 }
 0x503   : > { %v5814_v59 = vadd.f32 %v5813_v1, %v5801_v49  ;;  %v5853_v55 = vadd.f32 %v5852_v60, %v5840_v38 }
 0x505   : > { %6028 = vst [vmem:[%s11207_s27 + $0x18] sm:$0xff] %v5814_v59 }
 0x507   : > { %v5893_v44 = vpop.f32.mrf.mxu1 }
 0x50a   : > { %v5815_v27 = vpop.f32.mrf.mxu3  ;;  %v5854_v3 = vpop.f32.mrf.mxu2 }
 0x516   : > { %v5930_v56 = vpop.f32.mrf.mxu0 }
 0x517   : > { %v5931_v2 = vadd.f32 %v5930_v56, %v3474_v41 }
 0x51e   : > { %v5932_v57 = vpop.f32.mrf.mxu0 }
 0x522   : > { %v5865_v63 = vpop.f32.mrf.mxu3 }
 0x523   : > { %v5943_v4 = vpop.f32.mrf.mxu1  ;;  %v5866_v14 = vadd.f32 %v5865_v63, %v5853_v55 }
 0x524   : > { %v5944_v5 = vadd.f32 %v5943_v4, %v5931_v2  ;;  %v5904_v6 = vpop.f32.mrf.mxu2 }
 0x525   : > { %v5879_v31 = vadd.f32 %v5878_v46, %v5866_v14 }
 0x527   : > { %v5892_v34 = vadd.f32 %v5891_v48, %v5879_v31 }
 0x529   : > { %v5905_v19 = vadd.f32 %v5904_v6, %v5892_v34 }
 0x52a   : > { %v5867_v12 = vpop.f32.mrf.mxu3 }
 0x52b   : > { %v5945_v7 = vpop.f32.mrf.mxu1 }
 0x52c   : > { %v5906_v13 = vpop.f32.mrf.mxu2 }
 0x536   : > { %v5982_v11 = vpop.f32.mrf.mxu0 }
 0x53e   : > { %v5984_v18 = vpop.f32.mrf.mxu0 }
 0x542   : > { %v5917_v20 = vpop.f32.mrf.mxu3 }
 0x543   : > { %v5995_v21 = vpop.f32.mrf.mxu1  ;;  %v5918_v24 = vadd.f32 %v5917_v20, %v5905_v19 }
 0x545   : > { %6029 = vst [vmem:[%s11207_s27 + $0x20] sm:$0xff] %v5918_v24 }
 0x546   : > { %v5956_v23 = vpop.f32.mrf.mxu2 }
 0x547   : > { %v5957_v16 = vadd.f32 %v5956_v23, %v5944_v5 }
 0x54a   : > { %v5919_v33 = vpop.f32.mrf.mxu3 }
 0x54b   : > { %v5997_v22 = vpop.f32.mrf.mxu1 }
 0x54e   : > { %v5958_v9 = vpop.f32.mrf.mxu2 }
 0x562   : > { %v5969_v50 = vpop.f32.mrf.mxu3 }
 0x563   : > { %v5970_v61 = vadd.f32 %v5969_v50, %v5957_v16 }
 0x565   : > { %v5983_v35 = vadd.f32 %v5982_v11, %v5970_v61 }
 0x566   : > { %v6008_v62 = vpop.f32.mrf.mxu2 }
 0x567   : > { %v5996_v26 = vadd.f32 %v5995_v21, %v5983_v35 }
 0x569   : > { %v6009_v38 = vadd.f32 %v6008_v62, %v5996_v26 }
 0x56a   : > { %v5971_v36 = vpop.f32.mrf.mxu3 }
 0x56e   : > { %v6010_v37 = vpop.f32.mrf.mxu2 }
 0x582   : > { %v6021_v32 = vpop.f32.mrf.mxu3 }
 0x583   : > { %v6022_v52 = vadd.f32 %v6021_v32, %v6009_v38 }
 0x585   : > { %6030 = vst [vmem:[%s11207_s27 + $0x28] sm:$0xff] %v6022_v52 }
 0x586   : > { %10134 = shalt.err (!%p10131_p7)
}
 0x587   : > { %9846 = dma.vmem_to_hbm [thread:$0]  (%p10285_p11), %s6046_s16, 768, %s6048_s1, %s6032_s21  }
 0x58a   : > { %v6023_v10 = vpop.f32.mrf.mxu3 }
 0x58b PF: > { %s11522_s11 = sld [smem:[#allocation18_spill]]  ;;  %p9881_p2 = scmp.ge.s32.totalorder %s10185_s24, 2 }
 0x58d   : > { %p9869_p4 = pnand %p9881_p2, %p10289_p12 }
 0x58f   : > { %p9870_p5 = pneg %p9869_p4 }
 0x591   : > { %s6059_s20 = sand.u32 1, %s11522_s11  }
 0x592   : > { %s6060_s15 = scalar_lea.sflag [#allocation4], %s6059_s20 }
 0x593   : > { %10168 = dma.done.wait (%p9870_p5), %s6060_s15, 768  }
 0x594   : > { %10170 = vsyncadd (%p9870_p5), %s6060_s15, 4294966528  ;;  %s11524_s24 = sld [smem:[#allocation19_spill]]  ;;  %s11526_s21 = smov %s10177_s22 }
 0x595   : > { %s11525_s18 = sld [smem:[#allocation20_spill]]  ;;  %s11527_s22 = smov %s10181_s23 }
 0x59a   : > { %p19_p8 = scmp.ge.s32.totalorder %s11524_s24, 6  }
 0x59b   : > { %s11528_s23 = smov %s11525_s18 }
 0x59c   :  { %21 = sbr.rel (!%p19_p8) target bundleno = 10 (0xa), region = 118 }
 0x5a1   :  { %6066 = vsyncpa [#allocation3], 1 }
 0x5a2   :  { %6068 = vsyncpa [#allocation3 + $0x1], 1 }
 0x5a3   :  { %6069 = vsyncpa [#allocation6], 1 }
 0x5a4   :  { %6070 = vsyncpa [#allocation9], 1 }
 0x5a5   :  { %6071 = vsyncpa [#allocation4], 1 }
 0x5a6   :  { %6073 = vsyncpa [#allocation4 + $0x1], 1 }

</bundles_post_ra>
